<compile_context>
chip_gen: v7x
topology: tpu7x:2x2x1
jax: 0.10.0
libtpu: 0.0.40
codegen_flags: <defaults>
</compile_context>

<pallas_src>
import functools

import jax
import jax.numpy as jnp
from jax.experimental import pallas as pl
from jax.experimental.pallas import tpu as pltpu

EPS = 1e-5  # nn.SyncBatchNorm default eps


def _round_up(v, m):
    return -(-v // m) * m


def _round_down(v, m):
    return (v // m) * m


# --------------------------------------------------------------------------
# Fused kernel: per-tile backbone stand-in + dense1, full-batch head at end.
# --------------------------------------------------------------------------
def embedding_net_kernel(
    x_ref, wf_ref, bf_ref,
    w1_ref, b1_ref, g1_ref, beta1_ref,
    w2_ref, b2_ref, g2_ref, beta2_ref,
    wo_ref, bo_ref,
    o_ref,
    h1_ref,
    *, n_valid, tile_m,
):
    i = pl.program_id(0)

    # ---------------- per batch tile: backbone stand-in + dense1 -----------
    # x tile stays in its native f32; the lane-axis (H*W) sum streams straight
    # off the pipeline buffer -- no f32/bf16 copy of the big tile is made.
    # The 1/(H*W) avg-pool scale is folded into wf at init time.
    pooled = jnp.sum(x_ref[...], axis=-1)                        # (tile_m, C)
    feats = (
        jnp.dot(pooled.astype(jnp.bfloat16), wf_ref[...],
                preferred_element_type=jnp.float32)
        + bf_ref[...]
    )                                                            # (tile_m, 2048)
    # dense1 (+bias+ReLU) runs per tile so its matmul overlaps the x DMA
    # pipeline instead of being a serial tail.
    h1 = (
        jnp.dot(feats.astype(jnp.bfloat16), w1_ref[...],
                preferred_element_type=jnp.float32)
        + b1_ref[...]
    )
    h1 = jnp.maximum(h1, 0.0)
    # No wrapper-side batch padding: the last x tile may overrun the true
    # batch and contain undefined rows -> zero them before the scratch store.
    row0 = pl.multiple_of(i * tile_m, tile_m)
    rows = row0 + jax.lax.broadcasted_iota(jnp.int32, (tile_m, 1), 0)
    h1 = jnp.where(rows < n_valid, h1, 0.0)
    h1_ref[pl.ds(row0, tile_m), :] = h1

    # ---------------- last tile: BN1 -> dense2+ReLU+BN2 -> output ----------
    # SyncBatchNorm (training mode) needs full-batch statistics, so this runs
    # once after every tile has deposited its h1 rows.
    @pl.when(i == pl.num_programs(0) - 1)
    def _():
        n_pad = h1_ref.shape[0]
        all_rows = jax.lax.broadcasted_iota(jnp.int32, (n_pad, 1), 0)
        valid = all_rows < n_valid
        inv_n = 1.0 / float(n_valid)

        def batchnorm(h, g_ref, beta_ref):
            # One masked pass (sum + sum-of-squares).  jnp.where (select, not
            # 0*h) so non-finite padded rows can never poison the statistics.
            hm = jnp.where(valid, h, 0.0)
            mu = jnp.sum(hm, axis=0, keepdims=True) * inv_n
            ex2 = jnp.sum(hm * hm, axis=0, keepdims=True) * inv_n
            var = jnp.maximum(ex2 - mu * mu, 0.0)   # biased var (training BN)
            return g_ref[...] * (h - mu) * jax.lax.rsqrt(var + EPS) + beta_ref[...]

        h1n = batchnorm(h1_ref[...], g1_ref, beta1_ref)
        h2 = (
            jnp.dot(h1n.astype(jnp.bfloat16), w2_ref[...],
                    preferred_element_type=jnp.float32)
            + b2_ref[...]
        )
        h2 = jnp.maximum(h2, 0.0)
        h2n = batchnorm(h2, g2_ref, beta2_ref)
        o_ref[...] = (
            jnp.dot(h2n.astype(jnp.bfloat16), wo_ref[...],
                    preferred_element_type=jnp.float32)
            + bo_ref[...]
        )


# --------------------------------------------------------------------------
# Parameter construction (deterministic, matches module __init__ shapes).
# Matmul weights are stored bf16 (MXU path, half the DMA/VMEM); biases and
# BN affine parameters stay f32.
# --------------------------------------------------------------------------
def init_params(key, c_in, hw):
    ks = jax.random.split(key, 8)

    def lin(kw, kb, fan_in, fan_out):
        bound = 1.0 / jnp.sqrt(fan_in)
        w = jax.random.uniform(kw, (fan_in, fan_out), jnp.float32, -bound, bound)
        b = jax.random.uniform(kb, (1, fan_out), jnp.float32, -bound, bound)
        return w, b

    p = {}
    # backbone stand-in: pooled channels -> 2048; fold the 1/(H*W) avg-pool
    # scale into the weight so the kernel only needs a lane-axis sum.
    wf, bf = lin(ks[0], ks[1], c_in, 2048)
    p["wf"] = (wf / float(hw)).astype(jnp.bfloat16)
    p["bf"] = bf
    # dense1: Linear(2048, 512) + SyncBatchNorm(512)
    w1, b1 = lin(ks[2], ks[3], 2048, 512)
    p["w1"] = w1.astype(jnp.bfloat16); p["b1"] = b1
    p["g1"] = jnp.ones((1, 512), jnp.float32)
    p["beta1"] = jnp.zeros((1, 512), jnp.float32)
    # dense2: Linear(512, 256) + SyncBatchNorm(256)
    w2, b2 = lin(ks[4], ks[5], 512, 256)
    p["w2"] = w2.astype(jnp.bfloat16); p["b2"] = b2
    p["g2"] = jnp.ones((1, 256), jnp.float32)
    p["beta2"] = jnp.zeros((1, 256), jnp.float32)
    # output: Linear(256, 256)
    wo, bo = lin(ks[6], ks[7], 256, 256)
    p["wo"] = wo.astype(jnp.bfloat16); p["bo"] = bo
    return p


# --------------------------------------------------------------------------
# VMEM budget / tile sizing
# --------------------------------------------------------------------------
def _vmem_limit_bytes():
    try:
        phys = pltpu.get_tpu_info().vmem_capacity_bytes
    except Exception:
        phys = 64 * 1024 * 1024            # v7x per-TensorCore VMEM (worst case)
    # ~3/4 of physical (96 MiB on v5e/v6e, 48 MiB on v7x), capped, leaving
    # headroom for compiler-internal scratch.
    return int(min(phys * 3 // 4, 112 * 1024 * 1024))


# --------------------------------------------------------------------------
# Forward pass (single fused pallas_call)
# --------------------------------------------------------------------------
@jax.jit
def embedding_net_forward(x_nchw, params):
    n, c, h, w = x_nchw.shape
    hw = h * w
    # Free reshape (merges contiguous minor dims).  NO wrapper dtype cast and
    # NO full-tensor jnp.pad -- both were extra full HBM passes on the
    # largest tensor; raggedness is handled in-kernel instead.
    x = x_nchw.reshape(n, c, hw)

    vmem_limit = _vmem_limit_bytes()

    # --- budget-driven batch tile size --------------------------------------
    weights = (params["wf"], params["bf"], params["w1"], params["b1"],
               params["g1"], params["beta1"], params["w2"], params["b2"],
               params["g2"], params["beta2"], params["wo"], params["bo"])
    # default pipelining keeps 2 VMEM copies of each input even with constant
    # index maps.
    weight_bytes = 2 * sum(int(v.size) * v.dtype.itemsize for v in weights)
    n8 = _round_up(max(n, 1), 8)
    head_bytes = n8 * (3 * 512 + 3 * 256) * 4        # h1 scratch + head temps
    # x tile footprint includes the sublane pad of C up to 8.
    row_bytes = _round_up(c, 8) * _round_up(hw, 128) * x.dtype.itemsize
    budget = vmem_limit - weight_bytes - head_bytes - (8 << 20)  # misc headroom
    tile_m = budget // (2 * row_bytes)                # x is double-buffered
    tile_m = max(8, min(_round_down(tile_m, 8), 512, n8))
    grid_m = -(-n // tile_m)
    n_pad = grid_m * tile_m                           # rows covered by the grid

    def resident(shape):
        # whole-array block, constant index map -> weight stays in VMEM across
        # all batch tiles (DMA'd once, never re-fetched).
        return pl.BlockSpec(shape, lambda i: (0,) * len(shape))

    grid_spec = pltpu.PrefetchScalarGridSpec(
        num_scalar_prefetch=0,
        grid=(grid_m,),
        in_specs=[
            pl.BlockSpec((tile_m, c, hw), lambda i: (i, 0, 0)),   # image tile
            resident((c, 2048)), resident((1, 2048)),             # wf, bf
            resident((2048, 512)), resident((1, 512)),            # w1, b1
            resident((1, 512)), resident((1, 512)),               # g1, beta1
            resident((512, 256)), resident((1, 256)),             # w2, b2
            resident((1, 256)), resident((1, 256)),               # g2, beta2
            resident((256, 256)), resident((1, 256)),             # wo, bo
        ],
        out_specs=pl.BlockSpec((n_pad, 256), lambda i: (0, 0)),
        scratch_shapes=[pltpu.VMEM((n_pad, 512), jnp.float32)],   # h1 rows
    )

    out = pl.pallas_call(
        functools.partial(embedding_net_kernel, n_valid=n, tile_m=tile_m),
        out_shape=jax.ShapeDtypeStruct((n_pad, 256), jnp.float32),
        grid_spec=grid_spec,
        compiler_params=pltpu.CompilerParams(
            # h1/out are resident accumulators across the batch-tile axis, so
            # the single grid axis must be sequential.
            # TODO(synk): on v7x the per-tile phase could be split across the
            # 2 TensorCores (core_map + VMEM_SHARED h1 + core_barrier).
            dimension_semantics=("arbitrary",),
            vmem_limit_bytes=vmem_limit,
        ),
    )(
        x,
        params["wf"], params["bf"],
        params["w1"], params["b1"], params["g1"], params["beta1"],
        params["w2"], params["b2"], params["g2"], params["beta2"],
        params["wo"], params["bo"],
    )
    return out[:n]


if __name__ == "__main__":
    key = jax.random.PRNGKey(0)
    k_x, k_p = jax.random.split(key)

    N, C, H, W = 2, 4, 16, 16
    x = jax.random.normal(k_x, (N, C, H, W), jnp.float32)
    params = init_params(k_p, C, H * W)

    out = jax.block_until_ready(embedding_net_forward(x, params))

    assert out.shape == (N, 256) and out.dtype == jnp.float32
    assert bool(jnp.all(jnp.isfinite(out)))
    print("KERNEL_OK")
</pallas_src>

<mosaic_0001>
module attributes {stable_mosaic.version = 11 : i64} {
  func.func @embedding_net_kernel(%arg0: i32, %arg1: memref<8x4x256xf32, #tpu.memory_space<vmem>>, %arg2: memref<4x2048xbf16, #tpu.memory_space<vmem>>, %arg3: memref<1x2048xf32, #tpu.memory_space<vmem>>, %arg4: memref<2048x512xbf16, #tpu.memory_space<vmem>>, %arg5: memref<1x512xf32, #tpu.memory_space<vmem>>, %arg6: memref<1x512xf32, #tpu.memory_space<vmem>>, %arg7: memref<1x512xf32, #tpu.memory_space<vmem>>, %arg8: memref<512x256xbf16, #tpu.memory_space<vmem>>, %arg9: memref<1x256xf32, #tpu.memory_space<vmem>>, %arg10: memref<1x256xf32, #tpu.memory_space<vmem>>, %arg11: memref<1x256xf32, #tpu.memory_space<vmem>>, %arg12: memref<256x256xbf16, #tpu.memory_space<vmem>>, %arg13: memref<1x256xf32, #tpu.memory_space<vmem>>, %arg14: memref<8x256xf32, #tpu.memory_space<vmem>>, %arg15: memref<8x512xf32, #tpu.memory_space<vmem>>) attributes {dimension_semantics = [#tpu.dimension_semantics<arbitrary>], iteration_bounds = array<i64: 1>, scalar_prefetch = 0 : i64, scratch_operands = 1 : i64, tpu.core_type = #tpu.core_type<tc>, window_params = [{transform_indices = @transform_0, window_bounds = array<i64: 8, 4, 256>}, {pipeline_mode = #tpu.pipeline_mode<synchronous>, transform_indices = @transform_1, window_bounds = array<i64: 4, 2048>}, {pipeline_mode = #tpu.pipeline_mode<synchronous>, transform_indices = @transform_2, window_bounds = array<i64: 1, 2048>}, {pipeline_mode = #tpu.pipeline_mode<synchronous>, transform_indices = @transform_3, window_bounds = array<i64: 2048, 512>}, {pipeline_mode = #tpu.pipeline_mode<synchronous>, transform_indices = @transform_4, window_bounds = array<i64: 1, 512>}, {pipeline_mode = #tpu.pipeline_mode<synchronous>, transform_indices = @transform_5, window_bounds = array<i64: 1, 512>}, {pipeline_mode = #tpu.pipeline_mode<synchronous>, transform_indices = @transform_6, window_bounds = array<i64: 1, 512>}, {pipeline_mode = #tpu.pipeline_mode<synchronous>, transform_indices = @transform_7, window_bounds = array<i64: 512, 256>}, {pipeline_mode = #tpu.pipeline_mode<synchronous>, transform_indices = @transform_8, window_bounds = array<i64: 1, 256>}, {pipeline_mode = #tpu.pipeline_mode<synchronous>, transform_indices = @transform_9, window_bounds = array<i64: 1, 256>}, {pipeline_mode = #tpu.pipeline_mode<synchronous>, transform_indices = @transform_10, window_bounds = array<i64: 1, 256>}, {pipeline_mode = #tpu.pipeline_mode<synchronous>, transform_indices = @transform_11, window_bounds = array<i64: 256, 256>}, {pipeline_mode = #tpu.pipeline_mode<synchronous>, transform_indices = @transform_12, window_bounds = array<i64: 1, 256>}, {pipeline_mode = #tpu.pipeline_mode<synchronous>, transform_indices = @transform_13, window_bounds = array<i64: 8, 256>}]} {
    %c0 = arith.constant 0 : index
    %c0_0 = arith.constant 0 : index
    %c0_1 = arith.constant 0 : index
    %0 = vector.load %arg1[%c0, %c0_0, %c0_1] : memref<8x4x256xf32, #tpu.memory_space<vmem>>, vector<8x4x256xf32>
    %cst = arith.constant dense<0.000000e+00> : vector<8x4xf32>
    %1 = vector.multi_reduction <add>, %0, %cst [2] : vector<8x4x256xf32> to vector<8x4xf32>
    %2 = arith.truncf %1 : vector<8x4xf32> to vector<8x4xbf16>
    %c0_2 = arith.constant 0 : index
    %c0_3 = arith.constant 0 : index
    %3 = vector.load %arg2[%c0_2, %c0_3] : memref<4x2048xbf16, #tpu.memory_space<vmem>>, vector<4x2048xbf16>
    %cst_4 = arith.constant dense<0.000000e+00> : vector<8x2048xf32>
    %4 = tpu.matmul %2, %3, %cst_4 {dimension_numbers = #tpu.dot_dimension_numbers<[1], [0], [0], [1], [0, 0, 1, 1], [], []>} : vector<8x4xbf16>, vector<4x2048xbf16>, vector<8x2048xf32> -> vector<8x2048xf32>
    %c0_5 = arith.constant 0 : index
    %c0_6 = arith.constant 0 : index
    %5 = vector.load %arg3[%c0_5, %c0_6] : memref<1x2048xf32, #tpu.memory_space<vmem>>, vector<1x2048xf32>
    %6 = vector.broadcast %5 : vector<1x2048xf32> to vector<8x2048xf32>
    %7 = arith.addf %4, %6 : vector<8x2048xf32>
    %8 = arith.truncf %7 : vector<8x2048xf32> to vector<8x2048xbf16>
    %c0_7 = arith.constant 0 : index
    %c0_8 = arith.constant 0 : index
    %9 = vector.load %arg4[%c0_7, %c0_8] : memref<2048x512xbf16, #tpu.memory_space<vmem>>, vector<2048x512xbf16>
    %cst_9 = arith.constant dense<0.000000e+00> : vector<8x512xf32>
    %10 = tpu.matmul %8, %9, %cst_9 {dimension_numbers = #tpu.dot_dimension_numbers<[1], [0], [0], [1], [0, 0, 1, 1], [], []>} : vector<8x2048xbf16>, vector<2048x512xbf16>, vector<8x512xf32> -> vector<8x512xf32>
    %c0_10 = arith.constant 0 : index
    %c0_11 = arith.constant 0 : index
    %11 = vector.load %arg5[%c0_10, %c0_11] : memref<1x512xf32, #tpu.memory_space<vmem>>, vector<1x512xf32>
    %12 = vector.broadcast %11 : vector<1x512xf32> to vector<8x512xf32>
    %13 = arith.addf %10, %12 : vector<8x512xf32>
    %cst_12 = arith.constant 0.000000e+00 : f32
    %14 = vector.broadcast %cst_12 : f32 to vector<8x512xf32>
    %15 = arith.maximumf %13, %14 : vector<8x512xf32>
    %c8_i32 = arith.constant 8 : i32
    %16 = arith.muli %arg0, %c8_i32 : i32
    %17 = tpu.assume_multiple %16, 8 : i32
    %18 = tpu.iota {dimensions = array<i32: 0>} : vector<8x1xi32>
    %19 = vector.broadcast %17 : i32 to vector<8x1xi32>
    %20 = arith.addi %19, %18 : vector<8x1xi32>
    %c2_i32 = arith.constant 2 : i32
    %21 = vector.broadcast %c2_i32 : i32 to vector<8x1xi32>
    %22 = arith.cmpi slt, %20, %21 : vector<8x1xi32>
    %cst_13 = arith.constant 0.000000e+00 : f32
    %23 = vector.shape_cast %22 : vector<8x1xi1> to vector<8x1xi1>
    %24 = vector.broadcast %23 : vector<8x1xi1> to vector<8x512xi1>
    %25 = vector.broadcast %cst_13 : f32 to vector<8x512xf32>
    %26 = arith.select %24, %15, %25 : vector<8x512xi1>, vector<8x512xf32>
    %27 = arith.index_cast %17 : i32 to index
    %c0_14 = arith.constant 0 : index
    %28 = vector.load %arg15[%27, %c0_14] : memref<8x512xf32, #tpu.memory_space<vmem>>, vector<8x512xf32>
    tpu.vector_store %arg15[%27, %c0_14], %26 {strides = array<i32>} : memref<8x512xf32, #tpu.memory_space<vmem>>, vector<8x512xf32>,
    %c0_i32 = arith.constant 0 : i32
    %29 = arith.cmpi eq, %arg0, %c0_i32 : i32
    %30 = arith.extui %29 : i1 to i32
    %c0_i32_15 = arith.constant 0 : i32
    %31 = arith.cmpi ne, %30, %c0_i32_15 : i32
    scf.if %31 {
      %32 = tpu.iota {dimensions = array<i32: 0>} : vector<8x1xi32>
      %c2_i32_16 = arith.constant 2 : i32
      %33 = vector.broadcast %c2_i32_16 : i32 to vector<8x1xi32>
      %34 = arith.cmpi slt, %32, %33 : vector<8x1xi32>
      %c0_17 = arith.constant 0 : index
      %c0_18 = arith.constant 0 : index
      %35 = vector.load %arg15[%c0_17, %c0_18] : memref<8x512xf32, #tpu.memory_space<vmem>>, vector<8x512xf32>
      %cst_19 = arith.constant 0.000000e+00 : f32
      %36 = vector.shape_cast %34 : vector<8x1xi1> to vector<8x1xi1>
      %37 = vector.broadcast %36 : vector<8x1xi1> to vector<8x512xi1>
      %38 = vector.broadcast %cst_19 : f32 to vector<8x512xf32>
      %39 = arith.select %37, %35, %38 : vector<8x512xi1>, vector<8x512xf32>
      %cst_20 = arith.constant dense<0.000000e+00> : vector<512xf32>
      %40 = vector.multi_reduction <add>, %39, %cst_20 [0] : vector<8x512xf32> to vector<512xf32>
      %41 = vector.shape_cast %40 : vector<512xf32> to vector<1x512xf32>
      %cst_21 = arith.constant 5.000000e-01 : f32
      %42 = vector.broadcast %cst_21 : f32 to vector<1x512xf32>
      %43 = arith.mulf %41, %42 : vector<1x512xf32>
      %44 = arith.mulf %39, %39 : vector<8x512xf32>
      %cst_22 = arith.constant dense<0.000000e+00> : vector<512xf32>
      %45 = vector.multi_reduction <add>, %44, %cst_22 [0] : vector<8x512xf32> to vector<512xf32>
      %46 = vector.shape_cast %45 : vector<512xf32> to vector<1x512xf32>
      %cst_23 = arith.constant 5.000000e-01 : f32
      %47 = vector.broadcast %cst_23 : f32 to vector<1x512xf32>
      %48 = arith.mulf %46, %47 : vector<1x512xf32>
      %49 = arith.mulf %43, %43 : vector<1x512xf32>
      %50 = arith.subf %48, %49 : vector<1x512xf32>
      %cst_24 = arith.constant 0.000000e+00 : f32
      %51 = vector.broadcast %cst_24 : f32 to vector<1x512xf32>
      %52 = arith.maximumf %50, %51 : vector<1x512xf32>
      %c0_25 = arith.constant 0 : index
      %c0_26 = arith.constant 0 : index
      %53 = vector.load %arg6[%c0_25, %c0_26] : memref<1x512xf32, #tpu.memory_space<vmem>>, vector<1x512xf32>
      %54 = vector.broadcast %43 : vector<1x512xf32> to vector<8x512xf32>
      %55 = arith.subf %35, %54 : vector<8x512xf32>
      %56 = vector.broadcast %53 : vector<1x512xf32> to vector<8x512xf32>
      %57 = arith.mulf %56, %55 : vector<8x512xf32>
      %cst_27 = arith.constant 9.99999974E-6 : f32
      %58 = vector.broadcast %cst_27 : f32 to vector<1x512xf32>
      %59 = arith.addf %52, %58 : vector<1x512xf32>
      %60 = math.rsqrt %59 : vector<1x512xf32>
      %61 = vector.broadcast %60 : vector<1x512xf32> to vector<8x512xf32>
      %62 = arith.mulf %57, %61 : vector<8x512xf32>
      %c0_28 = arith.constant 0 : index
      %c0_29 = arith.constant 0 : index
      %63 = vector.load %arg7[%c0_28, %c0_29] : memref<1x512xf32, #tpu.memory_space<vmem>>, vector<1x512xf32>
      %64 = vector.broadcast %63 : vector<1x512xf32> to vector<8x512xf32>
      %65 = arith.addf %62, %64 : vector<8x512xf32>
      %66 = arith.truncf %65 : vector<8x512xf32> to vector<8x512xbf16>
      %c0_30 = arith.constant 0 : index
      %c0_31 = arith.constant 0 : index
      %67 = vector.load %arg8[%c0_30, %c0_31] : memref<512x256xbf16, #tpu.memory_space<vmem>>, vector<512x256xbf16>
      %cst_32 = arith.constant dense<0.000000e+00> : vector<8x256xf32>
      %68 = tpu.matmul %66, %67, %cst_32 {dimension_numbers = #tpu.dot_dimension_numbers<[1], [0], [0], [1], [0, 0, 1, 1], [], []>} : vector<8x512xbf16>, vector<512x256xbf16>, vector<8x256xf32> -> vector<8x256xf32>
      %c0_33 = arith.constant 0 : index
      %c0_34 = arith.constant 0 : index
      %69 = vector.load %arg9[%c0_33, %c0_34] : memref<1x256xf32, #tpu.memory_space<vmem>>, vector<1x256xf32>
      %70 = vector.broadcast %69 : vector<1x256xf32> to vector<8x256xf32>
      %71 = arith.addf %68, %70 : vector<8x256xf32>
      %cst_35 = arith.constant 0.000000e+00 : f32
      %72 = vector.broadcast %cst_35 : f32 to vector<8x256xf32>
      %73 = arith.maximumf %71, %72 : vector<8x256xf32>
      %cst_36 = arith.constant 0.000000e+00 : f32
      %74 = vector.shape_cast %34 : vector<8x1xi1> to vector<8x1xi1>
      %75 = vector.broadcast %74 : vector<8x1xi1> to vector<8x256xi1>
      %76 = vector.broadcast %cst_36 : f32 to vector<8x256xf32>
      %77 = arith.select %75, %73, %76 : vector<8x256xi1>, vector<8x256xf32>
      %cst_37 = arith.constant dense<0.000000e+00> : vector<256xf32>
      %78 = vector.multi_reduction <add>, %77, %cst_37 [0] : vector<8x256xf32> to vector<256xf32>
      %79 = vector.shape_cast %78 : vector<256xf32> to vector<1x256xf32>
      %cst_38 = arith.constant 5.000000e-01 : f32
      %80 = vector.broadcast %cst_38 : f32 to vector<1x256xf32>
      %81 = arith.mulf %79, %80 : vector<1x256xf32>
      %82 = arith.mulf %77, %77 : vector<8x256xf32>
      %cst_39 = arith.constant dense<0.000000e+00> : vector<256xf32>
      %83 = vector.multi_reduction <add>, %82, %cst_39 [0] : vector<8x256xf32> to vector<256xf32>
      %84 = vector.shape_cast %83 : vector<256xf32> to vector<1x256xf32>
      %cst_40 = arith.constant 5.000000e-01 : f32
      %85 = vector.broadcast %cst_40 : f32 to vector<1x256xf32>
      %86 = arith.mulf %84, %85 : vector<1x256xf32>
      %87 = arith.mulf %81, %81 : vector<1x256xf32>
      %88 = arith.subf %86, %87 : vector<1x256xf32>
      %cst_41 = arith.constant 0.000000e+00 : f32
      %89 = vector.broadcast %cst_41 : f32 to vector<1x256xf32>
      %90 = arith.maximumf %88, %89 : vector<1x256xf32>
      %c0_42 = arith.constant 0 : index
      %c0_43 = arith.constant 0 : index
      %91 = vector.load %arg10[%c0_42, %c0_43] : memref<1x256xf32, #tpu.memory_space<vmem>>, vector<1x256xf32>
      %92 = vector.broadcast %81 : vector<1x256xf32> to vector<8x256xf32>
      %93 = arith.subf %73, %92 : vector<8x256xf32>
      %94 = vector.broadcast %91 : vector<1x256xf32> to vector<8x256xf32>
      %95 = arith.mulf %94, %93 : vector<8x256xf32>
      %cst_44 = arith.constant 9.99999974E-6 : f32
      %96 = vector.broadcast %cst_44 : f32 to vector<1x256xf32>
      %97 = arith.addf %90, %96 : vector<1x256xf32>
      %98 = math.rsqrt %97 : vector<1x256xf32>
      %99 = vector.broadcast %98 : vector<1x256xf32> to vector<8x256xf32>
      %100 = arith.mulf %95, %99 : vector<8x256xf32>
      %c0_45 = arith.constant 0 : index
      %c0_46 = arith.constant 0 : index
      %101 = vector.load %arg11[%c0_45, %c0_46] : memref<1x256xf32, #tpu.memory_space<vmem>>, vector<1x256xf32>
      %102 = vector.broadcast %101 : vector<1x256xf32> to vector<8x256xf32>
      %103 = arith.addf %100, %102 : vector<8x256xf32>
      %104 = arith.truncf %103 : vector<8x256xf32> to vector<8x256xbf16>
      %c0_47 = arith.constant 0 : index
      %c0_48 = arith.constant 0 : index
      %105 = vector.load %arg12[%c0_47, %c0_48] : memref<256x256xbf16, #tpu.memory_space<vmem>>, vector<256x256xbf16>
      %cst_49 = arith.constant dense<0.000000e+00> : vector<8x256xf32>
      %106 = tpu.matmul %104, %105, %cst_49 {dimension_numbers = #tpu.dot_dimension_numbers<[1], [0], [0], [1], [0, 0, 1, 1], [], []>} : vector<8x256xbf16>, vector<256x256xbf16>, vector<8x256xf32> -> vector<8x256xf32>
      %c0_50 = arith.constant 0 : index
      %c0_51 = arith.constant 0 : index
      %107 = vector.load %arg13[%c0_50, %c0_51] : memref<1x256xf32, #tpu.memory_space<vmem>>, vector<1x256xf32>
      %108 = vector.broadcast %107 : vector<1x256xf32> to vector<8x256xf32>
      %109 = arith.addf %106, %108 : vector<8x256xf32>
      %c0_52 = arith.constant 0 : index
      %c0_53 = arith.constant 0 : index
      %110 = vector.load %arg14[%c0_52, %c0_53] : memref<8x256xf32, #tpu.memory_space<vmem>>, vector<8x256xf32>
      tpu.vector_store %arg14[%c0_52, %c0_53], %109 {strides = array<i32>} : memref<8x256xf32, #tpu.memory_space<vmem>>, vector<8x256xf32>,
    } else {
    }
    return
  }
  func.func @transform_0(%arg0: i32) -> (i32, i32, i32) {
    %c0_i32 = arith.constant 0 : i32
    %c0_i32_0 = arith.constant 0 : i32
    %c0_i32_1 = arith.constant 0 : i32
    return %arg0, %c0_i32, %c0_i32_0 : i32, i32, i32
  }
  func.func @transform_1(%arg0: i32) -> (i32, i32) {
    %c0_i32 = arith.constant 0 : i32
    %c0_i32_0 = arith.constant 0 : i32
    %c0_i32_1 = arith.constant 0 : i32
    return %c0_i32, %c0_i32_0 : i32, i32
  }
  func.func @transform_2(%arg0: i32) -> (i32, i32) {
    %c0_i32 = arith.constant 0 : i32
    %c0_i32_0 = arith.constant 0 : i32
    %c0_i32_1 = arith.constant 0 : i32
    return %c0_i32, %c0_i32_0 : i32, i32
  }
  func.func @transform_3(%arg0: i32) -> (i32, i32) {
    %c0_i32 = arith.constant 0 : i32
    %c0_i32_0 = arith.constant 0 : i32
    %c0_i32_1 = arith.constant 0 : i32
    return %c0_i32, %c0_i32_0 : i32, i32
  }
  func.func @transform_4(%arg0: i32) -> (i32, i32) {
    %c0_i32 = arith.constant 0 : i32
    %c0_i32_0 = arith.constant 0 : i32
    %c0_i32_1 = arith.constant 0 : i32
    return %c0_i32, %c0_i32_0 : i32, i32
  }
  func.func @transform_5(%arg0: i32) -> (i32, i32) {
    %c0_i32 = arith.constant 0 : i32
    %c0_i32_0 = arith.constant 0 : i32
    %c0_i32_1 = arith.constant 0 : i32
    return %c0_i32, %c0_i32_0 : i32, i32
  }
  func.func @transform_6(%arg0: i32) -> (i32, i32) {
    %c0_i32 = arith.constant 0 : i32
    %c0_i32_0 = arith.constant 0 : i32
    %c0_i32_1 = arith.constant 0 : i32
    return %c0_i32, %c0_i32_0 : i32, i32
  }
  func.func @transform_7(%arg0: i32) -> (i32, i32) {
    %c0_i32 = arith.constant 0 : i32
    %c0_i32_0 = arith.constant 0 : i32
    %c0_i32_1 = arith.constant 0 : i32
    return %c0_i32, %c0_i32_0 : i32, i32
  }
  func.func @transform_8(%arg0: i32) -> (i32, i32) {
    %c0_i32 = arith.constant 0 : i32
    %c0_i32_0 = arith.constant 0 : i32
    %c0_i32_1 = arith.constant 0 : i32
    return %c0_i32, %c0_i32_0 : i32, i32
  }
  func.func @transform_9(%arg0: i32) -> (i32, i32) {
    %c0_i32 = arith.constant 0 : i32
    %c0_i32_0 = arith.constant 0 : i32
    %c0_i32_1 = arith.constant 0 : i32
    return %c0_i32, %c0_i32_0 : i32, i32
  }
  func.func @transform_10(%arg0: i32) -> (i32, i32) {
    %c0_i32 = arith.constant 0 : i32
    %c0_i32_0 = arith.constant 0 : i32
    %c0_i32_1 = arith.constant 0 : i32
    return %c0_i32, %c0_i32_0 : i32, i32
  }
  func.func @transform_11(%arg0: i32) -> (i32, i32) {
    %c0_i32 = arith.constant 0 : i32
    %c0_i32_0 = arith.constant 0 : i32
    %c0_i32_1 = arith.constant 0 : i32
    return %c0_i32, %c0_i32_0 : i32, i32
  }
  func.func @transform_12(%arg0: i32) -> (i32, i32) {
    %c0_i32 = arith.constant 0 : i32
    %c0_i32_0 = arith.constant 0 : i32
    %c0_i32_1 = arith.constant 0 : i32
    return %c0_i32, %c0_i32_0 : i32, i32
  }
  func.func @transform_13(%arg0: i32) -> (i32, i32) {
    %c0_i32 = arith.constant 0 : i32
    %c0_i32_0 = arith.constant 0 : i32
    %c0_i32_1 = arith.constant 0 : i32
    return %c0_i32, %c0_i32_0 : i32, i32
  }
}

</mosaic_0001>

<bundles_post_ra>
// kernel: embedding_net_forward.1
= control target key start
LH: loop header
LB: loop body
LE: loop exit
PB: predicated region body
PF: predicated region fallthrough
CT: control target
= control target key end

     0   :  { %18 = vsyncpa [#allocation4], 0  ;;  %s8086_s0 = inlined_call_operand.vmem [shape: f32[2,4,256], index: 0, kind: input, shape index: {}]   ;;  %s8087_s1 = inlined_call_operand.hbm [shape: bf16[4,2048], index: 1, kind: input, shape index: {}]   ;;  %s8088_s2 = inlined_call_operand.hbm [shape: f32[1,2048], index: 2, kind: input, shape index: {}]   ;;  %s8089_s3 = inlined_call_operand.hbm [shape: bf16[2048,512], index: 3, kind: input, shape index: {}]   ;;  %s8090_s4 = inlined_call_operand.hbm [shape: f32[1,512], index: 4, kind: input, shape index: {}]   ;;  %s8091_s5 = inlined_call_operand.hbm [shape: f32[1,512], index: 5, kind: input, shape index: {}]   ;;  %s8092_s6 = inlined_call_operand.hbm [shape: f32[1,512], index: 6, kind: input, shape index: {}]   ;;  %s8093_s7 = inlined_call_operand.hbm [shape: bf16[512,256], index: 7, kind: input, shape index: {}]   ;;  %s8094_s8 = inlined_call_operand.hbm [shape: f32[1,256], index: 8, kind: input, shape index: {}]   ;;  %s8095_s9 = inlined_call_operand.hbm [shape: f32[1,256], index: 9, kind: input, shape index: {}]   ;;  %s8096_s10 = inlined_call_operand.hbm [shape: f32[1,256], index: 10, kind: input, shape index: {}]   ;;  %s8097_s11 = inlined_call_operand.hbm [shape: bf16[256,256], index: 11, kind: input, shape index: {}]   ;;  %s8098_s12 = inlined_call_operand.hbm [shape: f32[1,256], index: 12, kind: input, shape index: {}]   ;;  %s8099_s13 = inlined_call_operand.vmem [shape: f32[8,256], index: 13, kind: output, shape index: {}]  }
   0x1   :  { %19 = vsyncpa [#allocation6], 0 }
   0x2   :  { %20 = vsyncpa [#allocation9], 0 }
   0x3   :  { %21 = vsyncpa [#allocation12], 0 }
   0x4   :  { %22 = vsyncpa [#allocation15], 0 }
   0x5   :  { %23 = vsyncpa [#allocation18], 0 }
   0x6   :  { %24 = vsyncpa [#allocation21], 0  ;;  %s7566_s25 = smov [#allocation5]   ;;  %s7567_s27 = smov [#allocation8]  }
   0x7   :  { %s43_s26 = sshll.u32 %s7566_s25, 4  ;;  %s65_s28 = sshll.u32 %s7567_s27, 4  ;;  %s44_s26 = int_to_ptr.vmem [resolvable:$true] %s43_s26  ;;  %s66_s28 = int_to_ptr.vmem [resolvable:$true] %s65_s28 }
   0x8   :  { %s7288_s14 = scalar_lea.hbm %s8088_s2, 256 }
   0x9   :  { %p7289_p0 = scmp.ne.s32.totalorder %s8088_s2, %s7288_s14  ;;  %p7292_p1 = scmp.lt.u32.totalorder %s7288_s14, %s8088_s2 }
   0xb   :  { %p7294_p2 = pnand %p7292_p1, %p7289_p0 }
   0xd   :  { %7297 = shalt.err (!%p7294_p2)
}
   0xe   :  { %s7298_s19 = scalar_lea.vmem %s44_s26, 256  ;;  %p7303_p4 = scmp.lt.s32.totalorder %s44_s26, %s44_s26 }
   0xf   :  { %p7299_p3 = scmp.ne.s32.totalorder %s44_s26, %s7298_s19  ;;  %p7304_p5 = scmp.lt.s32.totalorder %s7298_s19, %s7298_s19 }
  0x11   :  { %p7305_p6 = por %p7304_p5, %p7303_p4 }
  0x13   :  { %p7306_p7 = pnand %p7305_p6, %p7299_p3 }
  0x15   :  { %7309 = shalt.err (!%p7306_p7)
}
  0x16   :  { %46 = dma.hbm_to_vmem [thread:$0]  %s8088_s2, 256, %s44_s26, [#allocation6]  }
  0x17   :  { %s7310_s24 = scalar_lea.hbm %s8090_s4, 64 }
  0x18   :  { %p7311_p8 = scmp.ne.s32.totalorder %s8090_s4, %s7310_s24  ;;  %p7314_p9 = scmp.lt.u32.totalorder %s7310_s24, %s8090_s4 }
  0x1a   :  { %p7316_p10 = pnand %p7314_p9, %p7311_p8 }
  0x1c   :  { %7319 = shalt.err (!%p7316_p10)
}
  0x1d   :  { %s7320_s14 = scalar_lea.vmem %s66_s28, 64  ;;  %p7325_p12 = scmp.lt.s32.totalorder %s66_s28, %s66_s28 }
  0x1e   :  { %p7321_p11 = scmp.ne.s32.totalorder %s66_s28, %s7320_s14  ;;  %p7326_p13 = scmp.lt.s32.totalorder %s7320_s14, %s7320_s14 }
  0x20   :  { %p7327_p0 = por %p7326_p13, %p7325_p12 }
  0x22   :  { %p7328_p1 = pnand %p7327_p0, %p7321_p11 }
  0x24   :  { %7331 = shalt.err (!%p7328_p1)
}
  0x25   :  { %68 = dma.hbm_to_vmem [thread:$0]  %s8090_s4, 64, %s66_s28, [#allocation9]  }
  0x26   :  { %s7568_s15 = smov [#allocation11]   ;;  %s7569_s17 = smov [#allocation14]  }
  0x27   :  { %s85_s16 = sshll.u32 %s7568_s15, 4  ;;  %s107_s18 = sshll.u32 %s7569_s17, 4  ;;  %s86_s16 = int_to_ptr.vmem [resolvable:$true] %s85_s16  ;;  %s108_s18 = int_to_ptr.vmem [resolvable:$true] %s107_s18 }
  0x28   :  { %s7332_s21 = scalar_lea.hbm %s8092_s6, 64 }
  0x29   :  { %p7333_p2 = scmp.ne.s32.totalorder %s8092_s6, %s7332_s21  ;;  %p7336_p3 = scmp.lt.u32.totalorder %s7332_s21, %s8092_s6 }
  0x2b   :  { %p7338_p4 = pnand %p7336_p3, %p7333_p2 }
  0x2d   :  { %7341 = shalt.err (!%p7338_p4)
}
  0x2e   :  { %s7342_s4 = scalar_lea.vmem %s86_s16, 64  ;;  %p7347_p6 = scmp.lt.s32.totalorder %s86_s16, %s86_s16 }
  0x2f   :  { %p7343_p5 = scmp.ne.s32.totalorder %s86_s16, %s7342_s4  ;;  %p7348_p7 = scmp.lt.s32.totalorder %s7342_s4, %s7342_s4 }
  0x31   :  { %p7349_p8 = por %p7348_p7, %p7347_p6 }
  0x33   :  { %p7350_p9 = pnand %p7349_p8, %p7343_p5 }
  0x35   :  { %7353 = shalt.err (!%p7350_p9)
}
  0x36   :  { %88 = dma.hbm_to_vmem [thread:$0]  %s8092_s6, 64, %s86_s16, [#allocation12]  }
  0x37   :  { %s7354_s14 = scalar_lea.hbm %s8094_s8, 32 }
  0x38   :  { %p7355_p10 = scmp.ne.s32.totalorder %s8094_s8, %s7354_s14  ;;  %p7358_p11 = scmp.lt.u32.totalorder %s7354_s14, %s8094_s8 }
  0x3a   :  { %p7360_p12 = pnand %p7358_p11, %p7355_p10 }
  0x3c   :  { %7363 = shalt.err (!%p7360_p12)
}
  0x3d   :  { %s7364_s19 = scalar_lea.vmem %s108_s18, 32  ;;  %p7369_p0 = scmp.lt.s32.totalorder %s108_s18, %s108_s18 }
  0x3e   :  { %p7365_p13 = scmp.ne.s32.totalorder %s108_s18, %s7364_s19  ;;  %p7370_p1 = scmp.lt.s32.totalorder %s7364_s19, %s7364_s19 }
  0x40   :  { %p7371_p2 = por %p7370_p1, %p7369_p0 }
  0x42   :  { %p7372_p3 = pnand %p7371_p2, %p7365_p13 }
  0x44   :  { %7375 = shalt.err (!%p7372_p3)
}
  0x45   :  { %110 = dma.hbm_to_vmem [thread:$0]  %s8094_s8, 32, %s108_s18, [#allocation15]  }
  0x46   :  { %s7570_s20 = smov [#allocation17]   ;;  %s7571_s22 = smov [#allocation3]  }
  0x47   :  { %s127_s21 = sshll.u32 %s7570_s20, 4  ;;  %s33_s23 = sshll.u32 %s7571_s22, 4  ;;  %s128_s21 = int_to_ptr.vmem [resolvable:$true] %s127_s21  ;;  %s34_s23 = int_to_ptr.vmem [resolvable:$true] %s33_s23 }
  0x48   :  { %s7376_s4 = scalar_lea.hbm %s8096_s10, 32 }
  0x49   :  { %p7377_p4 = scmp.ne.s32.totalorder %s8096_s10, %s7376_s4  ;;  %p7380_p5 = scmp.lt.u32.totalorder %s7376_s4, %s8096_s10 }
  0x4b   :  { %p7382_p6 = pnand %p7380_p5, %p7377_p4 }
  0x4d   :  { %7385 = shalt.err (!%p7382_p6)
}
  0x4e   :  { %s7386_s8 = scalar_lea.vmem %s128_s21, 32  ;;  %p7391_p8 = scmp.lt.s32.totalorder %s128_s21, %s128_s21 }
  0x4f   :  { %p7387_p7 = scmp.ne.s32.totalorder %s128_s21, %s7386_s8  ;;  %p7392_p9 = scmp.lt.s32.totalorder %s7386_s8, %s7386_s8 }
  0x51   :  { %p7393_p10 = por %p7392_p9, %p7391_p8 }
  0x53   :  { %p7394_p11 = pnand %p7393_p10, %p7387_p7 }
  0x55   :  { %7397 = shalt.err (!%p7394_p11)
}
  0x56   :  { %130 = dma.hbm_to_vmem [thread:$0]  %s8096_s10, 32, %s128_s21, [#allocation18]  }
  0x57   :  { %s7398_s15 = scalar_lea.hbm %s8087_s1, 512 }
  0x58   :  { %p7399_p12 = scmp.ne.s32.totalorder %s8087_s1, %s7398_s15  ;;  %p7402_p13 = scmp.lt.u32.totalorder %s7398_s15, %s8087_s1 }
  0x5a   :  { %p7404_p0 = pnand %p7402_p13, %p7399_p12 }
  0x5c   :  { %7407 = shalt.err (!%p7404_p0)
}
  0x5d   :  { %s7408_s20 = scalar_lea.vmem %s34_s23, 512  ;;  %p7413_p2 = scmp.lt.s32.totalorder %s34_s23, %s34_s23 }
  0x5e   :  { %p7409_p1 = scmp.ne.s32.totalorder %s34_s23, %s7408_s20  ;;  %p7414_p3 = scmp.lt.s32.totalorder %s7408_s20, %s7408_s20 }
  0x60   :  { %p7415_p4 = por %p7414_p3, %p7413_p2 }
  0x62   :  { %p7416_p5 = pnand %p7415_p4, %p7409_p1 }
  0x64   :  { %7419 = shalt.err (!%p7416_p5)
}
  0x65   :  { %36 = dma.hbm_to_vmem [thread:$0]  %s8087_s1, 512, %s34_s23, [#allocation4]  }
  0x66   :  { %s7572_s22 = smov [#allocation7]   ;;  %s7420_s28 = scalar_lea.hbm %s8089_s3, 65536 }
  0x67   :  { %s52_s24 = sshll.u32 %s7572_s22, 4  ;;  %p7421_p6 = scmp.ne.s32.totalorder %s8089_s3, %s7420_s28  ;;  %s53_s24 = int_to_ptr.vmem [resolvable:$true] %s52_s24 }
  0x68   :  { %p7424_p7 = scmp.lt.u32.totalorder %s7420_s28, %s8089_s3 }
  0x6a   :  { %p7426_p8 = pnand %p7424_p7, %p7421_p6 }
  0x6c   :  { %7429 = shalt.err (!%p7426_p8)
}
  0x6d   :  { %s7430_s18 = scalar_lea.vmem %s53_s24, 65536  ;;  %p7435_p10 = scmp.lt.s32.totalorder %s53_s24, %s53_s24 }
  0x6e   :  { %p7431_p9 = scmp.ne.s32.totalorder %s53_s24, %s7430_s18  ;;  %p7436_p11 = scmp.lt.s32.totalorder %s7430_s18, %s7430_s18 }
  0x70   :  { %p7437_p12 = por %p7436_p11, %p7435_p10 }
  0x72   :  { %p7438_p13 = pnand %p7437_p12, %p7431_p9 }
  0x74   :  { %7441 = shalt.err (!%p7438_p13)
}
  0x75   :  { %s7573_s1 = smov 256   ;;  %s7574_s23 = smov 16  }
  0x76   :  { %58 = dma.hbm_to_vmem [thread:$0]  %s8089_s3, 65536, %s53_s24, [#allocation6], %s7573_s1, %s7573_s1, %s7574_s23  }
  0x77   :  { %s7575_s26 = smov [#allocation10]   ;;  %s7576_s17 = smov [#allocation13]  }
  0x78   :  { %s75_s15 = sshll.u32 %s7575_s26, 4  ;;  %s94_s19 = sshll.u32 %s7576_s17, 4  ;;  %s76_s15 = int_to_ptr.vmem [resolvable:$true] %s75_s15  ;;  %s95_s19 = int_to_ptr.vmem [resolvable:$true] %s94_s19 }
  0x79   :  { %s7442_s20 = scalar_lea.hbm %s8091_s5, 64 }
  0x7a   :  { %p7443_p0 = scmp.ne.s32.totalorder %s8091_s5, %s7442_s20  ;;  %p7446_p1 = scmp.lt.u32.totalorder %s7442_s20, %s8091_s5 }
  0x7c   :  { %p7448_p2 = pnand %p7446_p1, %p7443_p0 }
  0x7e   :  { %7451 = shalt.err (!%p7448_p2)
}
  0x7f   :  { %s7452_s3 = scalar_lea.vmem %s76_s15, 64  ;;  %p7457_p4 = scmp.lt.s32.totalorder %s76_s15, %s76_s15 }
  0x80   :  { %p7453_p3 = scmp.ne.s32.totalorder %s76_s15, %s7452_s3  ;;  %p7458_p5 = scmp.lt.s32.totalorder %s7452_s3, %s7452_s3 }
  0x82   :  { %p7459_p6 = por %p7458_p5, %p7457_p4 }
  0x84   :  { %p7460_p7 = pnand %p7459_p6, %p7453_p3 }
  0x86   :  { %7463 = shalt.err (!%p7460_p7)
}
  0x87   :  { %78 = dma.hbm_to_vmem [thread:$0]  %s8091_s5, 64, %s76_s15, [#allocation9]  }
  0x88   :  { %s7464_s29 = scalar_lea.hbm %s8093_s7, 8192 }
  0x89   :  { %p7465_p8 = scmp.ne.s32.totalorder %s8093_s7, %s7464_s29  ;;  %p7468_p9 = scmp.lt.u32.totalorder %s7464_s29, %s8093_s7 }
  0x8b   :  { %p7470_p10 = pnand %p7468_p9, %p7465_p8 }
  0x8d   :  { %7473 = shalt.err (!%p7470_p10)
}
  0x8e   :  { %s7474_s23 = scalar_lea.vmem %s95_s19, 8192  ;;  %p7479_p12 = scmp.lt.s32.totalorder %s95_s19, %s95_s19 }
  0x8f   :  { %p7475_p11 = scmp.ne.s32.totalorder %s95_s19, %s7474_s23  ;;  %p7480_p13 = scmp.lt.s32.totalorder %s7474_s23, %s7474_s23 }
  0x91   :  { %p7481_p0 = por %p7480_p13, %p7479_p12 }
  0x93   :  { %p7482_p1 = pnand %p7481_p0, %p7475_p11 }
  0x95   :  { %7485 = shalt.err (!%p7482_p1)
}
  0x96   :  { %s7577_s5 = smov 128   ;;  %s7578_s14 = smov 8  }
  0x97   :  { %100 = dma.hbm_to_vmem [thread:$0]  %s8093_s7, 8192, %s95_s19, [#allocation12], %s7577_s5, %s7577_s5, %s7578_s14  }
  0x98   :  { %s7579_s15 = smov [#allocation16]   ;;  %s7580_s6 = smov [#allocation19]  }
  0x99   :  { %s117_s17 = sshll.u32 %s7579_s15, 4  ;;  %s136_s16 = sshll.u32 %s7580_s6, 4  ;;  %s118_s17 = int_to_ptr.vmem [resolvable:$true] %s117_s17  ;;  %s137_s16 = int_to_ptr.vmem [resolvable:$true] %s136_s16 }
  0x9a   :  { %s7486_s21 = scalar_lea.hbm %s8095_s9, 32 }
  0x9b   :  { %p7487_p2 = scmp.ne.s32.totalorder %s8095_s9, %s7486_s21  ;;  %p7490_p3 = scmp.lt.u32.totalorder %s7486_s21, %s8095_s9 }
  0x9d   :  { %p7492_p4 = pnand %p7490_p3, %p7487_p2 }
  0x9f   :  { %7495 = shalt.err (!%p7492_p4)
}
  0xa0   :  { %s7496_s7 = scalar_lea.vmem %s118_s17, 32  ;;  %p7501_p6 = scmp.lt.s32.totalorder %s118_s17, %s118_s17 }
  0xa1   :  { %p7497_p5 = scmp.ne.s32.totalorder %s118_s17, %s7496_s7  ;;  %p7502_p7 = scmp.lt.s32.totalorder %s7496_s7, %s7496_s7 }
  0xa3   :  { %p7503_p8 = por %p7502_p7, %p7501_p6 }
  0xa5   :  { %p7504_p9 = pnand %p7503_p8, %p7497_p5 }
  0xa7   :  { %7507 = shalt.err (!%p7504_p9)
}
  0xa8   :  { %120 = dma.hbm_to_vmem [thread:$0]  %s8095_s9, 32, %s118_s17, [#allocation15]  }
  0xa9   :  { %s7508_s29 = scalar_lea.hbm %s8097_s11, 4096 }
  0xaa   :  { %p7509_p10 = scmp.ne.s32.totalorder %s8097_s11, %s7508_s29  ;;  %p7512_p11 = scmp.lt.u32.totalorder %s7508_s29, %s8097_s11 }
  0xac   :  { %p7514_p12 = pnand %p7512_p11, %p7509_p10 }
  0xae   :  { %7517 = shalt.err (!%p7514_p12)
}
  0xaf   :  { %s7518_s23 = scalar_lea.vmem %s137_s16, 4096  ;;  %p7523_p0 = scmp.lt.s32.totalorder %s137_s16, %s137_s16 }
  0xb0   :  { %p7519_p13 = scmp.ne.s32.totalorder %s137_s16, %s7518_s23  ;;  %p7524_p1 = scmp.lt.s32.totalorder %s7518_s23, %s7518_s23 }
  0xb2   :  { %p7525_p2 = por %p7524_p1, %p7523_p0 }
  0xb4   :  { %p7526_p3 = pnand %p7525_p2, %p7519_p13 }
  0xb6   :  { %7529 = shalt.err (!%p7526_p3)
}
  0xb7   :  { %142 = dma.hbm_to_vmem [thread:$0]  %s8097_s11, 4096, %s137_s16, [#allocation18], %s7577_s5, %s7577_s5, %s7578_s14  }
  0xb8   :  { %s7581_s26 = smov [#allocation20]   ;;  %s7530_s20 = scalar_lea.hbm %s8098_s12, 32 }
  0xb9   :  { %s149_s15 = sshll.u32 %s7581_s26, 4  ;;  %p7531_p4 = scmp.ne.s32.totalorder %s8098_s12, %s7530_s20  ;;  %s150_s15 = int_to_ptr.vmem [resolvable:$true] %s149_s15 }
  0xba   :  { %p7534_p5 = scmp.lt.u32.totalorder %s7530_s20, %s8098_s12 }
  0xbc   :  { %p7536_p6 = pnand %p7534_p5, %p7531_p4 }
  0xbe   :  { %7539 = shalt.err (!%p7536_p6)
}
  0xbf   :  { %s7540_s3 = scalar_lea.vmem %s150_s15, 32  ;;  %p7545_p8 = scmp.lt.s32.totalorder %s150_s15, %s150_s15 }
  0xc0   :  { %p7541_p7 = scmp.ne.s32.totalorder %s150_s15, %s7540_s3  ;;  %p7546_p9 = scmp.lt.s32.totalorder %s7540_s3, %s7540_s3 }
  0xc2   :  { %p7547_p10 = por %p7546_p9, %p7545_p8 }
  0xc4   :  { %p7548_p11 = pnand %p7547_p10, %p7541_p7 }
  0xc6   :  { %7551 = shalt.err (!%p7548_p11)
}
  0xc7   :  { %152 = dma.hbm_to_vmem [thread:$0]  %s8098_s12, 32, %s150_s15, [#allocation21]  }
  0xc8   :  { %7552 = dma.done.wait [#allocation4], 512  }
  0xc9   :  { %7553 = vsyncadd [#allocation4], 4294966784 }
  0xca   :  { %7554 = dma.done.wait [#allocation6], 65792  }
  0xcb   :  { %7555 = vsyncadd [#allocation6], 4294901504 }
  0xcc   :  { %7556 = dma.done.wait [#allocation9], 128  }
  0xcd   :  { %7557 = vsyncadd [#allocation9], 4294967168 }
  0xce   :  { %7558 = dma.done.wait [#allocation12], 8256  }
  0xcf   :  { %7559 = vsyncadd [#allocation12], 4294959040 }
  0xd0   :  { %7560 = dma.done.wait [#allocation15], 64  }
  0xd1   :  { %7561 = vsyncadd [#allocation15], 4294967232 }
  0xd2   :  { %7562 = dma.done.wait [#allocation18], 4128  }
  0xd3   :  { %7563 = vsyncadd [#allocation18], 4294963168 }
  0xd4   :  { %7564 = dma.done.wait [#allocation21], 32  }
  0xd5   :  { %7565 = vsyncadd [#allocation21], 4294967264  ;;  %vm222_vm0 = vcmask 1043456   ;;  %v190_v0 = vld [vmem:[%s8086_s0] sm:$0xff]  ;;  %v192_v1 = vld [vmem:[%s8086_s0 + $0x10] sm:$0xff]  ;;  %v279_v40 = vlaneseq  ;;  %vm500_vm1 = vcmask 1041408  }
  0xd6   :  { %v191_v2 = vld [vmem:[%s8086_s0 + $0x8] sm:$0xff]  ;;  %v206_v3 = vcombine.high %v190_v0, %v190_v0  ;;  %v223_v4 = vsel %vm222_vm0, %v190_v0, 0.0  ;;  %v208_v5 = vcombine.high %v192_v1, %v192_v1  ;;  %v233_v6 = vsel %vm222_vm0, %v192_v1, 0.0  ;;  %v193_v7 = vld [vmem:[%s8086_s0 + $0x18] sm:$0xff]  ;;  %v194_v8 = vld [vmem:[%s8086_s0 + $0x20] sm:$0xff] }
  0xd7   :  { %v195_v9 = vld [vmem:[%s8086_s0 + $0x28] sm:$0xff]  ;;  %v207_v10 = vcombine.high %v191_v2, %v191_v2  ;;  %v228_v11 = vsel %vm222_vm0, %v191_v2, 0.0  ;;  %v209_v12 = vcombine.high %v193_v7, %v193_v7  ;;  %v196_v13 = vld [vmem:[%s8086_s0 + $0x30] sm:$0xff]  ;;  %v197_v14 = vld [vmem:[%s8086_s0 + $0x38] sm:$0xff]  ;;  %v238_v17 = vsel %vm222_vm0, %v193_v7, 0.0 }
  0xd8   :  { %v224_v15 = vsel %vm222_vm0, %v206_v3, 0.0  ;;  %v234_v16 = vsel %vm222_vm0, %v208_v5, 0.0  ;;  %v210_v18 = vcombine.high %v194_v8, %v194_v8  ;;  %v211_v23 = vcombine.high %v195_v9, %v195_v9  ;;  %v271_v46 = vld [vmem:[#allocation3] sm:$0xff] }
  0xd9   :  { %v225_v19 = vadd.f32 %v224_v15, %v223_v4  ;;  %v235_v20 = vadd.f32 %v234_v16, %v233_v6  ;;  %v229_v21 = vsel %vm222_vm0, %v207_v10, 0.0  ;;  %v239_v22 = vsel %vm222_vm0, %v209_v12, 0.0  ;;  %v6363_v54 = vld [vmem:[#allocation7 + $0x4] ss:$16 sps:$4 sm:$0xff]   ;;  %v6368_v55 = vld [vmem:[#allocation7] ss:$16 sps:$4 sm:$0xff]  }
  0xda   :  { %v230_v24 = vadd.f32 %v229_v21, %v228_v11  ;;  %v240_v25 = vadd.f32 %v239_v22, %v238_v17  ;;  %v243_v26 = vsel %vm222_vm0, %v194_v8, 0.0  ;;  %v244_v27 = vsel %vm222_vm0, %v210_v18, 0.0  ;;  %v6369_v56 = vld [vmem:[#allocation7 + $0x24] ss:$16 sps:$4 sm:$0xff]   ;;  %3987 = vmatprep.subr.bf16.mxu0 %v6363_v54  ;;  %v6374_v57 = vld [vmem:[#allocation7 + $0x20] ss:$16 sps:$4 sm:$0xff]  }
  0xdb   :  { %226 = vadd.xlane.f32.xlu0 %v225_v19  ;;  %236 = vadd.xlane.f32.xlu1 %v235_v20  ;;  %v248_v28 = vsel %vm222_vm0, %v195_v9, 0.0  ;;  %v249_v29 = vsel %vm222_vm0, %v211_v23, 0.0  ;;  %v212_v30 = vcombine.high %v196_v13, %v196_v13  ;;  %v213_v31 = vcombine.high %v197_v14, %v197_v14  ;;  %v6375_v58 = vld [vmem:[#allocation7 + $0x44] ss:$16 sps:$4 sm:$0xff]   ;;  %v6380_v59 = vld [vmem:[#allocation7 + $0x40] ss:$16 sps:$4 sm:$0xff]  }
  0xdc   :  { %v245_v32 = vadd.f32 %v244_v27, %v243_v26  ;;  %v250_v33 = vadd.f32 %v249_v29, %v248_v28  ;;  %v253_v34 = vsel %vm222_vm0, %v196_v13, 0.0  ;;  %v258_v36 = vsel %vm222_vm0, %v197_v14, 0.0  ;;  %3988 = vmatpush1.bf16.msra.mxu0 %v6368_v55  ;;  %v6381_v60 = vld [vmem:[#allocation7 + $0x64] ss:$16 sps:$4 sm:$0xff]   ;;  %v6386_v61 = vld [vmem:[#allocation7 + $0x60] ss:$16 sps:$4 sm:$0xff]  }
  0xdd   :  { %v254_v35 = vsel %vm222_vm0, %v212_v30, 0.0  ;;  %v259_v37 = vsel %vm222_vm0, %v213_v31, 0.0  ;;  %v7582_v41 = vmov 1983009808   ;;  %v7845_v43 = vshrl.u32 %v279_v40, 7  ;;  %3989 = vmatprep.subr.bf16.mxu0 %v6369_v56 }
  0xde   :  { %v255_v38 = vadd.f32 %v254_v35, %v253_v34  ;;  %v260_v39 = vadd.f32 %v259_v37, %v258_v36  ;;  %v430_v42 = vunpack.c.l.s4 %v7582_v41  ;;  %v428_v50 = vcombine.high %v271_v46, %v271_v46  ;;  %v6387_v62 = vld [vmem:[#allocation7 + $0x84] ss:$16 sps:$4 sm:$0xff]   ;;  %v6392_v63 = vld [vmem:[#allocation7 + $0x80] ss:$16 sps:$4 sm:$0xff]  }
  0xdf   :  { %231 = vadd.xlane.f32.xlu0 %v230_v24  ;;  %241 = vadd.xlane.f32.xlu1 %v240_v25  ;;  %v7583_v51 = vmov 0   ;;  %v6393_v0 = vld [vmem:[#allocation7 + $0xa4] ss:$16 sps:$4 sm:$0xff]   ;;  %v6398_v1 = vld [vmem:[#allocation7 + $0xa0] ss:$16 sps:$4 sm:$0xff]   ;;  %v376_v16 = vand.u32 127, %v279_v40 }
  0xe0   :  { %v431_v44 = vunpack.c.0.s8 %v430_v42  ;;  %581 = vmatprep.mubr.bf16.mxu1 %v7583_v51  ;;  %3990 = vmatpush1.bf16.msra.mxu0 %v6374_v57  ;;  %v6399_v2 = vld [vmem:[#allocation7 + $0xc4] ss:$16 sps:$4 sm:$0xff]   ;;  %v6404_v3 = vld [vmem:[#allocation7 + $0xc0] ss:$16 sps:$4 sm:$0xff]   ;;  %vm409_vm2 = vcmask 1041409   ;;  %vm411_vm3 = vcmask 1042434  }
  0xe1   :  { %3991 = vmatprep.subr.bf16.mxu0 %v6375_v58  ;;  %v6405_v4 = vld [vmem:[#allocation7 + $0xe4] ss:$16 sps:$4 sm:$0xff]   ;;  %v6410_v5 = vld [vmem:[#allocation7 + $0xe0] ss:$16 sps:$4 sm:$0xff]   ;;  %v379_v23 = vsub.s32 %v376_v16, %v7845_v43  ;;  %vm413_vm4 = vcmask 1043459   ;;  %vm415_vm5 = vcmask 1044484  }
  0xe2   :  { %v7848_v45 = vsub.s32 %v431_v44, %v7845_v43  ;;  %v6411_v6 = vld [vmem:[#allocation7 + $0x104] ss:$16 sps:$4 sm:$0xff]   ;;  %v6416_v7 = vld [vmem:[#allocation7 + $0x100] ss:$16 sps:$4 sm:$0xff]   ;;  %vm417_vm6 = vcmask 1045509   ;;  %vm419_vm7 = vcmask 1046534  }
  0xe3   :  { %246 = vadd.xlane.f32.xlu0 %v245_v32  ;;  %251 = vadd.xlane.f32.xlu1 %v250_v33  ;;  %v6417_v8 = vld [vmem:[#allocation7 + $0x124] ss:$16 sps:$4 sm:$0xff]   ;;  %v6422_v9 = vld [vmem:[#allocation7 + $0x120] ss:$16 sps:$4 sm:$0xff]   ;;  %vm421_vm8 = vcmask 1047559   ;;  %vm496_vm9 = vcmask 31744  }
  0xe4   :  { %v435_v47 = vrot.slane %v271_v46, %v7848_v45  ;;  %v7855_v52 = vrot.slane %v428_v50, %v7848_v45  ;;  %3992 = vmatpush1.bf16.msra.mxu0 %v6380_v59  ;;  %v6423_v10 = vld [vmem:[#allocation7 + $0x144] ss:$16 sps:$4 sm:$0xff]   ;;  %v6428_v11 = vld [vmem:[#allocation7 + $0x140] ss:$16 sps:$4 sm:$0xff]   ;;  %v272_v50 = vld [vmem:[#allocation3 + $0x8] sm:$0xff]  ;;  %vm4652_vm10 = vcmp.lt.s32.totalorder %v7845_v43, 2 }
  0xe5   :  { %3993 = vmatprep.subr.bf16.mxu0 %v6381_v60  ;;  %v6429_v12 = vld [vmem:[#allocation7 + $0x164] ss:$16 sps:$4 sm:$0xff]   ;;  %v6434_v13 = vld [vmem:[#allocation7 + $0x160] ss:$16 sps:$4 sm:$0xff]  }
  0xe6   :  { %v443_v48 = vcombine.high %v435_v47, %v435_v47  ;;  %v502_v49 = vsel %vm500_vm1, %v435_v47, 0  ;;  %v444_v53 = vcombine.high %v7855_v52, %v7855_v52  ;;  %v6435_v14 = vld [vmem:[#allocation7 + $0x184] ss:$16 sps:$4 sm:$0xff]   ;;  %v6440_v15 = vld [vmem:[#allocation7 + $0x180] ss:$16 sps:$4 sm:$0xff]  }
  0xe7   :  { %256 = vadd.xlane.f32.xlu0 %v255_v38  ;;  %261 = vadd.xlane.f32.xlu1 %v260_v39  ;;  %v6441_v19 = vld [vmem:[#allocation7 + $0x1a4] ss:$16 sps:$4 sm:$0xff]   ;;  %v6446_v21 = vld [vmem:[#allocation7 + $0x1a0] ss:$16 sps:$4 sm:$0xff]  }
  0xe8   :  { %5643 = vmatprep.subr.msk.bf16.mxu1 %vm500_vm1, %v443_v48  ;;  %3994 = vmatpush1.bf16.msra.mxu0 %v6386_v61  ;;  %v6447_v27 = vld [vmem:[#allocation7 + $0x1c4] ss:$16 sps:$4 sm:$0xff]   ;;  %v6452_v30 = vld [vmem:[#allocation7 + $0x1c0] ss:$16 sps:$4 sm:$0xff]  }
  0xe9   :  { %550 = vmatpush1.bf16.msra.mxu1 %v502_v49  ;;  %3995 = vmatprep.subr.bf16.mxu0 %v6387_v62  ;;  %v452_v62 = vrot.slane %v272_v50, %v7848_v45 }
  0xea   :  { %5645 = vmatprep.subr.msk.bf16.mxu1 %vm500_vm1, %v444_v53 }
  0xec   :  { %3996 = vmatpush1.bf16.msra.mxu0 %v6392_v63 }
  0xed   :  { %3997 = vmatprep.subr.bf16.mxu0 %v6393_v0 }
  0xf0   :  { %3998 = vmatpush1.bf16.msra.mxu0 %v6398_v1 }
  0xf1   :  { %3999 = vmatprep.subr.bf16.mxu0 %v6399_v2 }
  0xf4   :  { %4000 = vmatpush1.bf16.msra.mxu0 %v6404_v3 }
  0xf5   :  { %4001 = vmatprep.subr.bf16.mxu0 %v6405_v4  ;;  %v508_v4 = vsel %vm500_vm1, %v7855_v52, 0 }
  0xf8   :  { %4002 = vmatpush1.bf16.msra.mxu0 %v6410_v5  ;;  %v460_v5 = vcombine.high %v452_v62, %v452_v62 }
  0xf9   :  { %4003 = vmatprep.subr.bf16.mxu0 %v6411_v6  ;;  %v445_v6 = vcombine.high %v272_v50, %v272_v50  ;;  %v6425_v50 = vld [vmem:[#allocation7 + $0x148] ss:$16 sps:$4 sm:$0xff]  }
  0xfc   :  { %4004 = vmatpush1.bf16.msra.mxu0 %v6416_v7  ;;  %v459_v7 = vrot.slane %v445_v6, %v7848_v45  ;;  %v309_v6 = vsub.s32 7, %v7845_v43 }
  0xfd   :  { %4005 = vmatprep.subr.bf16.mxu0 %v6417_v8  ;;  %v273_v8 = vld [vmem:[#allocation3 + $0x10] sm:$0xff] }
  0xfe   :  { %v469_v52 = vrot.slane %v273_v8, %v7848_v45 }
 0x100   :  { %4006 = vmatpush1.bf16.msra.mxu0 %v6422_v9  ;;  %v514_v9 = vsel %vm500_vm1, %v452_v62, 0  ;;  %v526_v16 = vsel %vm500_vm1, %v469_v52, 0  ;;  %v6455_v62 = vld [vmem:[#allocation7 + $0x1e8] ss:$16 sps:$4 sm:$0xff]  }
 0x101   :  { %4007 = vmatprep.subr.bf16.mxu0 %v6423_v10  ;;  %v461_v10 = vcombine.high %v459_v7, %v459_v7 }
 0x104   :  { %4008 = vmatpush1.bf16.msra.mxu0 %v6428_v11  ;;  %v520_v11 = vsel %vm500_vm1, %v459_v7, 0 }
 0x105   :  { %4009 = vmatprep.subr.bf16.mxu0 %v6429_v12  ;;  %v477_v12 = vcombine.high %v469_v52, %v469_v52  ;;  %v7929_v52 = vsub.s32 1, %v7845_v43 }
 0x108   :  { %4010 = vmatpush1.bf16.msra.mxu0 %v6434_v13  ;;  %v462_v13 = vcombine.high %v273_v8, %v273_v8 }
 0x109   :  { %4011 = vmatprep.subr.bf16.mxu0 %v6435_v14 }
 0x10a   :  { %v476_v14 = vrot.slane %v462_v13, %v7848_v45 }
 0x10c   :  { %4012 = vmatpush1.bf16.msra.mxu0 %v6440_v15  ;;  %v274_v15 = vld [vmem:[#allocation3 + $0x18] sm:$0xff] }
 0x10d   :  { %4013 = vmatprep.subr.bf16.mxu0 %v6441_v19  ;;  %v532_v19 = vsel %vm500_vm1, %v476_v14, 0 }
 0x110   :  { %4014 = vmatpush1.bf16.msra.mxu0 %v6446_v21  ;;  %v479_v21 = vcombine.high %v274_v15, %v274_v15 }
 0x111   :  { %4015 = vmatprep.subr.bf16.mxu0 %v6447_v27  ;;  %v6373_v27 = vld [vmem:[#allocation7 + $0x2c] ss:$16 sps:$4 sm:$0xff]  }
 0x114   :  { %4016 = vmatpush1.bf16.msra.mxu0 %v6452_v30  ;;  %v6377_v30 = vld [vmem:[#allocation7 + $0x48] ss:$16 sps:$4 sm:$0xff]  }
 0x168   :  { %v227_v17 = vpop.xlane.xlu0 %226  ;;  %v237_v18 = vpop.xlane.xlu1 %236 }
 0x169   :  { %v263_v20 = vpack.c.bf16 %v227_v17, %v227_v17  ;;  %v265_v22 = vpack.c.bf16 %v237_v18, %v237_v18  ;;  %v478_v17 = vcombine.high %v476_v14, %v476_v14  ;;  %v486_v18 = vrot.slane %v274_v15, %v7848_v45 }
 0x16b   :  { %v367_v24 = vunpack.c.l.b16 %v263_v20  ;;  %v369_v31 = vunpack.c.l.b16 %v265_v22  ;;  %v494_v20 = vcombine.high %v486_v18, %v486_v18  ;;  %v493_v22 = vrot.slane %v479_v21, %v7848_v45  ;;  %v6365_v45 = vld [vmem:[#allocation7 + $0x8] ss:$16 sps:$4 sm:$0xff]   ;;  %v6459_v21 = vld [vmem:[#allocation7 + $0x200] ss:$16 sps:$4 sm:$0xff]  }
 0x16c   :  { %v232_v25 = vpop.xlane.xlu0 %231  ;;  %v242_v26 = vpop.xlane.xlu1 %241 }
 0x16d   :  { %v264_v28 = vpack.c.bf16 %v232_v25, %v232_v25  ;;  %v266_v29 = vpack.c.bf16 %v242_v26, %v242_v26  ;;  %v380_v34 = vrot.slane %v367_v24, %v379_v23  ;;  %v388_v41 = vrot.slane %v369_v31, %v379_v23  ;;  %v6367_v25 = vld [vmem:[#allocation7 + $0xc] ss:$16 sps:$4 sm:$0xff]  }
 0x16e   :  { %v495_v24 = vcombine.high %v493_v22, %v493_v22  ;;  %v544_v26 = vsel %vm500_vm1, %v493_v22, 0  ;;  %v6385_v31 = vld [vmem:[#allocation7 + $0x6c] ss:$16 sps:$4 sm:$0xff]   ;;  %v6462_v22 = vld [vmem:[#allocation7 + $0x208] ss:$16 sps:$4 sm:$0xff]  }
 0x16f   :  { %v368_v32 = vunpack.c.l.b16 %v264_v28  ;;  %v370_v33 = vunpack.c.l.b16 %v266_v29  ;;  %v6371_v28 = vld [vmem:[#allocation7 + $0x28] ss:$16 sps:$4 sm:$0xff]   ;;  %v6379_v29 = vld [vmem:[#allocation7 + $0x4c] ss:$16 sps:$4 sm:$0xff]  }
 0x170   :  { %v247_v35 = vpop.xlane.xlu0 %246  ;;  %v252_v36 = vpop.xlane.xlu1 %251 }
 0x171   :  { %v384_v37 = vrot.slane %v368_v32, %v379_v23  ;;  %v392_v38 = vrot.slane %v370_v33, %v379_v23  ;;  %v267_v39 = vpack.c.bf16 %v247_v35, %v247_v35  ;;  %v268_v40 = vpack.c.bf16 %v252_v36, %v252_v36  ;;  %v6383_v32 = vld [vmem:[#allocation7 + $0x68] ss:$16 sps:$4 sm:$0xff]   ;;  %v6391_v33 = vld [vmem:[#allocation7 + $0x8c] ss:$16 sps:$4 sm:$0xff]  }
 0x172   :  { %v6395_v35 = vld [vmem:[#allocation7 + $0xa8] ss:$16 sps:$4 sm:$0xff]   ;;  %v6403_v36 = vld [vmem:[#allocation7 + $0xcc] ss:$16 sps:$4 sm:$0xff]  }
 0x173   :  { %v410_v42 = vsel %vm409_vm2, %v384_v37, %v380_v34  ;;  %v371_v44 = vunpack.c.l.b16 %v267_v39  ;;  %v372_v46 = vunpack.c.l.b16 %v268_v40  ;;  %v6389_v34 = vld [vmem:[#allocation7 + $0x88] ss:$16 sps:$4 sm:$0xff]   ;;  %v6415_v40 = vld [vmem:[#allocation7 + $0x10c] ss:$16 sps:$4 sm:$0xff]  }
 0x174   :  { %v412_v47 = vsel %vm411_vm3, %v388_v41, %v410_v42  ;;  %v257_v48 = vpop.xlane.xlu0 %256  ;;  %v262_v49 = vpop.xlane.xlu1 %261  ;;  %v6401_v37 = vld [vmem:[#allocation7 + $0xc8] ss:$16 sps:$4 sm:$0xff]   ;;  %v6453_v41 = vld [vmem:[#allocation7 + $0x1e4] ss:$16 sps:$4 sm:$0xff]   ;;  %v6458_v42 = vld [vmem:[#allocation7 + $0x1e0] ss:$16 sps:$4 sm:$0xff]  }
 0x175   :  { %v414_v53 = vsel %vm413_vm4, %v392_v38, %v412_v47  ;;  %v396_v54 = vrot.slane %v371_v44, %v379_v23  ;;  %v269_v55 = vpack.c.bf16 %v257_v48, %v257_v48  ;;  %v400_v56 = vrot.slane %v372_v46, %v379_v23  ;;  %v6409_v38 = vld [vmem:[#allocation7 + $0xec] ss:$16 sps:$4 sm:$0xff]   ;;  %v6407_v39 = vld [vmem:[#allocation7 + $0xe8] ss:$16 sps:$4 sm:$0xff]   ;;  %4017 = vmatprep.subr.bf16.mxu0 %v6453_v41  ;;  %v6461_v47 = vld [vmem:[#allocation7 + $0x204] ss:$16 sps:$4 sm:$0xff]  }
 0x176   :  { %v270_v57 = vpack.c.bf16 %v262_v49, %v262_v49  ;;  %v6413_v44 = vld [vmem:[#allocation7 + $0x108] ss:$16 sps:$4 sm:$0xff]   ;;  %v6421_v46 = vld [vmem:[#allocation7 + $0x12c] ss:$16 sps:$4 sm:$0xff]   ;;  %4018 = vmatpush1.bf16.msra.mxu0 %v6458_v42 }
 0x177   :  { %v416_v58 = vsel %vm415_vm5, %v396_v54, %v414_v53  ;;  %v373_v59 = vunpack.c.l.b16 %v269_v55  ;;  %v6419_v48 = vld [vmem:[#allocation7 + $0x128] ss:$16 sps:$4 sm:$0xff]   ;;  %4028 = vmatprep.subr.bf16.mxu0 %v6461_v47  ;;  %v6427_v49 = vld [vmem:[#allocation7 + $0x14c] ss:$16 sps:$4 sm:$0xff]  }
 0x178   :  { %v374_v60 = vunpack.c.l.b16 %v270_v57  ;;  %v418_v63 = vsel %vm417_vm6, %v400_v56, %v416_v58  ;;  %v6433_v53 = vld [vmem:[#allocation7 + $0x16c] ss:$16 sps:$4 sm:$0xff]   ;;  %v6431_v54 = vld [vmem:[#allocation7 + $0x168] ss:$16 sps:$4 sm:$0xff]  }
 0x179   :  { %v404_v61 = vrot.slane %v373_v59, %v379_v23  ;;  %v6439_v55 = vld [vmem:[#allocation7 + $0x18c] ss:$16 sps:$4 sm:$0xff]   ;;  %v6437_v56 = vld [vmem:[#allocation7 + $0x188] ss:$16 sps:$4 sm:$0xff]  }
 0x17a   :  { %v408_v0 = vrot.slane %v374_v60, %v379_v23  ;;  %v538_v23 = vsel %vm500_vm1, %v486_v18, 0  ;;  %v6445_v57 = vld [vmem:[#allocation7 + $0x1ac] ss:$16 sps:$4 sm:$0xff]   ;;  %v6443_v58 = vld [vmem:[#allocation7 + $0x1a8] ss:$16 sps:$4 sm:$0xff]   ;;  %v7936_v18 = vsub.s32 3, %v7845_v43 }
 0x17b   :  { %v420_v1 = vsel %vm419_vm7, %v404_v61, %v418_v63  ;;  %v6451_v59 = vld [vmem:[#allocation7 + $0x1cc] ss:$16 sps:$4 sm:$0xff]   ;;  %v6449_v60 = vld [vmem:[#allocation7 + $0x1c8] ss:$16 sps:$4 sm:$0xff]  }
 0x17c   :  { %v422_v2 = vsel %vm421_vm8, %v408_v0, %v420_v1  ;;  %v6457_v61 = vld [vmem:[#allocation7 + $0x1ec] ss:$16 sps:$4 sm:$0xff]   ;;  %v297_v0 = vsub.s32 4, %v7845_v43  ;;  %v301_v1 = vsub.s32 5, %v7845_v43  ;;  %v6480_v41 = vld [vmem:[#allocation7 + $0x268] ss:$16 sps:$4 sm:$0xff]  }
 0x17d   :  { %v423_v3 = vpack.c.b16 %v422_v2, %v422_v2  ;;  %v6464_v63 = vld [vmem:[#allocation7 + $0x20c] ss:$16 sps:$4 sm:$0xff]  }
 0x17e   :  { %v7899_v2 = vld [vmem:[#allocation5 + $0x8] sm:$0xff] }
 0x17f   :  { %5644 = vmatmul.mubr.msk.bf16.vlgmr.msra.gmra.mrb[0].mxu1 %vm496_vm9, %v423_v3  ;;  %v7921_v8 = vrot.slane %v7899_v2, %v309_v6 }
 0x180   :  { %591 = vmatpush1.bf16.msra.mxu1 %v508_v4  ;;  %622 = vmatprep.mubr.bf16.mxu1 %v7583_v51  ;;  %v7909_v4 = vrot.slane %v7899_v2, %v301_v1 }
 0x181   :  { %5647 = vmatprep.subr.msk.bf16.mxu1 %vm500_vm1, %v460_v5  ;;  %v305_v5 = vsub.s32 6, %v7845_v43 }
 0x183   :  { %v7916_v7 = vrot.slane %v7899_v2, %v305_v5 }
 0x187   :  { %5646 = vmatmul.mubr.msk.bf16.vlgmr.msra.gmra.mrb[4].mxu1 %vm496_vm9, %v423_v3 }
 0x188   :  { %632 = vmatpush1.bf16.msra.mxu1 %v514_v9  ;;  %663 = vmatprep.mubr.bf16.mxu1 %v7583_v51  ;;  %v7924_v9 = vsub.s32 0, %v7845_v43 }
 0x189   :  { %5649 = vmatprep.subr.msk.bf16.mxu1 %vm500_vm1, %v461_v10  ;;  %v7926_v10 = vld [vmem:[#allocation5] sm:$0xff] }
 0x18f   :  { %5648 = vmatmul.mubr.msk.bf16.vlgmr.msra.gmra.mrb[8].mxu1 %vm496_vm9, %v423_v3 }
 0x190   :  { %673 = vmatpush1.bf16.msra.mxu1 %v520_v11  ;;  %704 = vmatprep.mubr.bf16.mxu1 %v7583_v51  ;;  %v282_v11 = vrot.slane %v7926_v10, %v7924_v9 }
 0x191   :  { %5651 = vmatprep.subr.msk.bf16.mxu1 %vm500_vm1, %v477_v12  ;;  %v286_v12 = vrot.slane %v7926_v10, %v7929_v52 }
 0x197   :  { %5650 = vmatmul.mubr.msk.bf16.vlgmr.msra.gmra.mrb[12].mxu1 %vm496_vm9, %v423_v3 }
 0x198   :  { %714 = vmatpush1.bf16.msra.mxu1 %v526_v16  ;;  %745 = vmatprep.mubr.bf16.mxu1 %v7583_v51 }
 0x199   :  { %5653 = vmatprep.subr.msk.bf16.mxu1 %vm500_vm1, %v478_v17 }
 0x19f   :  { %5652 = vmatmul.mubr.msk.bf16.vlgmr.msra.gmra.mrb[16].mxu1 %vm496_vm9, %v423_v3 }
 0x1a0   :  { %755 = vmatpush1.bf16.msra.mxu1 %v532_v19  ;;  %786 = vmatprep.mubr.bf16.mxu1 %v7583_v51 }
 0x1a1   :  { %5655 = vmatprep.subr.msk.bf16.mxu1 %vm500_vm1, %v494_v20 }
 0x1a7   :  { %5654 = vmatmul.mubr.msk.bf16.vlgmr.msra.gmra.mrb[20].mxu1 %vm496_vm9, %v423_v3 }
 0x1a8   :  { %796 = vmatpush1.bf16.msra.mxu1 %v538_v23  ;;  %827 = vmatprep.mubr.bf16.mxu1 %v7583_v51 }
 0x1a9   :  { %5657 = vmatprep.subr.msk.bf16.mxu1 %vm500_vm1, %v495_v24  ;;  %v6467_v24 = vld [vmem:[#allocation7 + $0x224] ss:$16 sps:$4 sm:$0xff]  }
 0x1af   :  { %5656 = vmatmul.mubr.msk.bf16.vlgmr.msra.gmra.mrb[24].mxu1 %vm496_vm9, %v423_v3 }
 0x1b0   :  { %837 = vmatpush1.bf16.msra.mxu1 %v544_v26  ;;  %868 = vmatprep.mubr.bf16.mxu1 %v7583_v51  ;;  %v6397_v51 = vld [vmem:[#allocation7 + $0xac] ss:$16 sps:$4 sm:$0xff]   ;;  %v294_v26 = vrot.slane %v7926_v10, %v7936_v18 }
 0x1b1   :  { %4315 = vmatprep.subr.bf16.mxu1 %v6367_v25  ;;  %v6470_v25 = vld [vmem:[#allocation7 + $0x22c] ss:$16 sps:$4 sm:$0xff]  }
 0x1b7   :  { %5658 = vmatmul.mubr.msk.bf16.vlgmr.msra.gmra.mrb[28].mxu1 %vm496_vm9, %v423_v3  ;;  %v7904_v3 = vrot.slane %v7899_v2, %v297_v0 }
 0x1b8   :  { %4316 = vmatpush1.bf16.msra.mxu1 %v6365_v45 }
 0x1b9   :  { %4317 = vmatprep.subr.bf16.mxu1 %v6373_v27  ;;  %v6465_v27 = vld [vmem:[#allocation7 + $0x220] ss:$16 sps:$4 sm:$0xff]  }
 0x1bc   :  { %4318 = vmatpush1.bf16.msra.mxu1 %v6371_v28  ;;  %v6468_v28 = vld [vmem:[#allocation7 + $0x228] ss:$16 sps:$4 sm:$0xff]  }
 0x1bd   :  { %4319 = vmatprep.subr.bf16.mxu1 %v6379_v29 }
 0x1c0   :  { %4320 = vmatpush1.bf16.msra.mxu1 %v6377_v30  ;;  %v6473_v30 = vld [vmem:[#allocation7 + $0x244] ss:$16 sps:$4 sm:$0xff]  }
 0x1c1   :  { %4321 = vmatprep.subr.bf16.mxu1 %v6385_v31  ;;  %v6476_v31 = vld [vmem:[#allocation7 + $0x24c] ss:$16 sps:$4 sm:$0xff]  }
 0x1c4   :  { %4322 = vmatpush1.bf16.msra.mxu1 %v6383_v32 }
 0x1c5   :  { %4323 = vmatprep.subr.bf16.mxu1 %v6391_v33 }
 0x1c8   :  { %4324 = vmatpush1.bf16.msra.mxu1 %v6389_v34 }
 0x1c9   :  { %4325 = vmatprep.subr.bf16.mxu1 %v6397_v51 }
 0x1cc   :  { %4326 = vmatpush1.bf16.msra.mxu1 %v6395_v35  ;;  %v6471_v35 = vld [vmem:[#allocation7 + $0x240] ss:$16 sps:$4 sm:$0xff]  }
 0x1cd   :  { %4327 = vmatprep.subr.bf16.mxu1 %v6403_v36  ;;  %v6474_v36 = vld [vmem:[#allocation7 + $0x248] ss:$16 sps:$4 sm:$0xff]  }
 0x1d0   :  { %4328 = vmatpush1.bf16.msra.mxu1 %v6401_v37  ;;  %v6479_v37 = vld [vmem:[#allocation7 + $0x264] ss:$16 sps:$4 sm:$0xff]  }
 0x1d1   :  { %4329 = vmatprep.subr.bf16.mxu1 %v6409_v38  ;;  %v6482_v38 = vld [vmem:[#allocation7 + $0x26c] ss:$16 sps:$4 sm:$0xff]  }
 0x1d4   :  { %4330 = vmatpush1.bf16.msra.mxu1 %v6407_v39 }
 0x1d5   :  { %4331 = vmatprep.subr.bf16.mxu1 %v6415_v40  ;;  %v6477_v40 = vld [vmem:[#allocation7 + $0x260] ss:$16 sps:$4 sm:$0xff]  }
 0x1d8   :  { %4332 = vmatpush1.bf16.msra.mxu1 %v6413_v44  ;;  %v6485_v44 = vld [vmem:[#allocation7 + $0x284] ss:$16 sps:$4 sm:$0xff]  }
 0x1d9   :  { %4333 = vmatprep.subr.bf16.mxu1 %v6421_v46  ;;  %v6488_v46 = vld [vmem:[#allocation7 + $0x28c] ss:$16 sps:$4 sm:$0xff]  }
 0x1dc   :  { %4334 = vmatpush1.bf16.msra.mxu1 %v6419_v48 }
 0x1dd   :  { %4335 = vmatprep.subr.bf16.mxu1 %v6427_v49  ;;  %v6483_v49 = vld [vmem:[#allocation7 + $0x280] ss:$16 sps:$4 sm:$0xff]  }
 0x1e0   :  { %4336 = vmatpush1.bf16.msra.mxu1 %v6425_v50  ;;  %v6486_v50 = vld [vmem:[#allocation7 + $0x288] ss:$16 sps:$4 sm:$0xff]  }
 0x1e1   :  { %4337 = vmatprep.subr.bf16.mxu1 %v6433_v53  ;;  %v6491_v53 = vld [vmem:[#allocation7 + $0x2a4] ss:$16 sps:$4 sm:$0xff]  }
 0x1e4   :  { %4338 = vmatpush1.bf16.msra.mxu1 %v6431_v54  ;;  %v6494_v54 = vld [vmem:[#allocation7 + $0x2ac] ss:$16 sps:$4 sm:$0xff]  }
 0x1e5   :  { %4339 = vmatprep.subr.bf16.mxu1 %v6439_v55 }
 0x1e8   :  { %4340 = vmatpush1.bf16.msra.mxu1 %v6437_v56  ;;  %v6489_v56 = vld [vmem:[#allocation7 + $0x2a0] ss:$16 sps:$4 sm:$0xff]  }
 0x1e9   :  { %4341 = vmatprep.subr.bf16.mxu1 %v6445_v57  ;;  %v6492_v57 = vld [vmem:[#allocation7 + $0x2a8] ss:$16 sps:$4 sm:$0xff]  }
 0x1ec   :  { %4342 = vmatpush1.bf16.msra.mxu1 %v6443_v58 }
 0x1ed   :  { %4343 = vmatprep.subr.bf16.mxu1 %v6451_v59  ;;  %v6497_v59 = vld [vmem:[#allocation7 + $0x2c4] ss:$16 sps:$4 sm:$0xff]  }
 0x1f0   :  { %4344 = vmatpush1.bf16.msra.mxu1 %v6449_v60  ;;  %v6500_v60 = vld [vmem:[#allocation7 + $0x2cc] ss:$16 sps:$4 sm:$0xff]  }
 0x1f1   :  { %4345 = vmatprep.subr.bf16.mxu1 %v6457_v61 }
 0x1f4   :  { %4346 = vmatpush1.bf16.msra.mxu1 %v6455_v62 }
 0x1f5   :  { %4356 = vmatprep.subr.bf16.mxu1 %v6464_v63  ;;  %v6495_v63 = vld [vmem:[#allocation7 + $0x2c0] ss:$16 sps:$4 sm:$0xff]  }
 0x252   :  { %v583_v13 = vpop.f32.mrb[0].mxu1 }
 0x253   :  { %v584_v14 = vadd.f32 %v583_v13, %v282_v11  ;;  %v585_v15 = vpop.f32.mrb[1].mxu1  ;;  %v6498_v11 = vld [vmem:[#allocation7 + $0x2c8] ss:$16 sps:$4 sm:$0xff]   ;;  %v6506_v13 = vld [vmem:[#allocation7 + $0x2ec] ss:$16 sps:$4 sm:$0xff]  }
 0x254   :  { %v586_v16 = vadd.f32 %v585_v15, %v286_v12  ;;  %v587_v17 = vpop.f32.mrb[2].mxu1  ;;  %v6503_v12 = vld [vmem:[#allocation7 + $0x2e4] ss:$16 sps:$4 sm:$0xff]   ;;  %v6501_v15 = vld [vmem:[#allocation7 + $0x2e0] ss:$16 sps:$4 sm:$0xff]  }
 0x255   :  { %v588_v19 = vpop.f32.mrb[3].mxu1  ;;  %v877_v23 = vpack.c.bf16 %v584_v14, %v584_v14 }
 0x256   :  { %v878_v20 = vpack.c.bf16 %v586_v16, %v586_v16  ;;  %v6504_v16 = vld [vmem:[#allocation7 + $0x2e8] ss:$16 sps:$4 sm:$0xff]   ;;  %v6509_v19 = vld [vmem:[#allocation7 + $0x304] ss:$16 sps:$4 sm:$0xff]  }
 0x258   :  { %4019 = vmatprep.mubr.bf16.mxu0 %v878_v20  ;;  %4347 = vmatprep.mubr.bf16.mxu1 %v878_v20  ;;  %v6512_v20 = vld [vmem:[#allocation7 + $0x30c] ss:$16 sps:$4 sm:$0xff]  }
 0x259   :  { %4020 = vmatmul.mubr.bf16.vlgmr.msra.gmra.mrb[0].mxu0 %v877_v23  ;;  %4348 = vmatmul.mubr.bf16.vlgmr.msra.gmra.mrb[32].mxu1 %v877_v23 }
 0x25a   :  { %4029 = vmatpush1.bf16.msra.mxu0 %v6459_v21  ;;  %4357 = vmatpush1.bf16.msra.mxu1 %v6462_v22  ;;  %v7940_v45 = vpop.f32.mrb[4].mxu1  ;;  %v7955_v22 = vsub.s32 2, %v7845_v43 }
 0x25b   :  { %v626_v29 = vpop.f32.mrb[5].mxu1  ;;  %4030 = vmatprep.subr.bf16.mxu0 %v6467_v24  ;;  %4358 = vmatprep.subr.bf16.mxu1 %v6470_v25  ;;  %v6507_v24 = vld [vmem:[#allocation7 + $0x300] ss:$16 sps:$4 sm:$0xff]   ;;  %v6510_v25 = vld [vmem:[#allocation7 + $0x308] ss:$16 sps:$4 sm:$0xff]  }
 0x25c   :  { %v627_v32 = vadd.f32 %v626_v29, %v294_v26  ;;  %v628_v33 = vpop.f32.mrb[6].mxu1  ;;  %v322_v26 = vrot.slane %v7899_v2, %v7955_v22  ;;  %v326_v29 = vrot.slane %v7899_v2, %v7936_v18 }
 0x25d   :  { %v629_v34 = vpop.f32.mrb[7].mxu1 }
 0x25e   :  { %v880_v51 = vpack.c.bf16 %v627_v32, %v627_v32  ;;  %4031 = vmatpush1.bf16.msra.mxu0 %v6465_v27  ;;  %4359 = vmatpush1.bf16.msra.mxu1 %v6468_v28  ;;  %v6515_v27 = vld [vmem:[#allocation7 + $0x324] ss:$16 sps:$4 sm:$0xff]   ;;  %v6518_v28 = vld [vmem:[#allocation7 + $0x32c] ss:$16 sps:$4 sm:$0xff]   ;;  %v6516_v32 = vld [vmem:[#allocation7 + $0x328] ss:$16 sps:$4 sm:$0xff]  }
 0x25f   :  { %4032 = vmatprep.subr.bf16.mxu0 %v6473_v30  ;;  %4360 = vmatprep.subr.bf16.mxu1 %v6476_v31  ;;  %v6513_v31 = vld [vmem:[#allocation7 + $0x320] ss:$16 sps:$4 sm:$0xff]  }
 0x260   :  { %4060 = vmatprep.mubr.bf16.mxu0 %v880_v51  ;;  %4388 = vmatprep.mubr.bf16.mxu1 %v880_v51  ;;  %v6521_v51 = vld [vmem:[#allocation7 + $0x344] ss:$16 sps:$4 sm:$0xff]  }
 0x262   :  { %4033 = vmatpush1.bf16.msra.mxu0 %v6471_v35  ;;  %4361 = vmatpush1.bf16.msra.mxu1 %v6474_v36  ;;  %v7942_v39 = vpop.f32.mrb[8].mxu1  ;;  %v6524_v35 = vld [vmem:[#allocation7 + $0x34c] ss:$16 sps:$4 sm:$0xff]  }
 0x263   :  { %v7944_v42 = vpop.f32.mrb[9].mxu1  ;;  %4034 = vmatprep.subr.bf16.mxu0 %v6479_v37  ;;  %4362 = vmatprep.subr.bf16.mxu1 %v6482_v38 }
 0x264   :  { %v669_v47 = vpop.f32.mrb[10].mxu1 }
 0x265   :  { %v670_v48 = vpop.f32.mrb[11].mxu1 }
 0x266   :  { %4035 = vmatpush1.bf16.msra.mxu0 %v6477_v40  ;;  %4363 = vmatpush1.bf16.msra.mxu1 %v6480_v41  ;;  %v6519_v40 = vld [vmem:[#allocation7 + $0x340] ss:$16 sps:$4 sm:$0xff]   ;;  %v6522_v41 = vld [vmem:[#allocation7 + $0x348] ss:$16 sps:$4 sm:$0xff]  }
 0x267   :  { %4036 = vmatprep.subr.bf16.mxu0 %v6485_v44  ;;  %4364 = vmatprep.subr.bf16.mxu1 %v6488_v46  ;;  %v6527_v44 = vld [vmem:[#allocation7 + $0x364] ss:$16 sps:$4 sm:$0xff]   ;;  %v6530_v46 = vld [vmem:[#allocation7 + $0x36c] ss:$16 sps:$4 sm:$0xff]   ;;  %v6525_v48 = vld [vmem:[#allocation7 + $0x360] ss:$16 sps:$4 sm:$0xff]  }
 0x26a   :  { %4037 = vmatpush1.bf16.msra.mxu0 %v6483_v49  ;;  %4365 = vmatpush1.bf16.msra.mxu1 %v6486_v50  ;;  %v7946_v55 = vpop.f32.mrb[12].mxu1  ;;  %v6528_v49 = vld [vmem:[#allocation7 + $0x368] ss:$16 sps:$4 sm:$0xff]  }
 0x26b   :  { %v7948_v58 = vpop.f32.mrb[13].mxu1  ;;  %4038 = vmatprep.subr.bf16.mxu0 %v6491_v53  ;;  %4366 = vmatprep.subr.bf16.mxu1 %v6494_v54  ;;  %v6533_v54 = vld [vmem:[#allocation7 + $0x384] ss:$16 sps:$4 sm:$0xff]  }
 0x26c   :  { %v710_v61 = vpop.f32.mrb[14].mxu1 }
 0x26d   :  { %v711_v62 = vpop.f32.mrb[15].mxu1  ;;  %v6531_v61 = vld [vmem:[#allocation7 + $0x380] ss:$16 sps:$4 sm:$0xff]  }
 0x26e   :  { %4039 = vmatpush1.bf16.msra.mxu0 %v6489_v56  ;;  %4367 = vmatpush1.bf16.msra.mxu1 %v6492_v57  ;;  %v6536_v56 = vld [vmem:[#allocation7 + $0x38c] ss:$16 sps:$4 sm:$0xff]   ;;  %v6534_v62 = vld [vmem:[#allocation7 + $0x388] ss:$16 sps:$4 sm:$0xff]  }
 0x26f   :  { %4040 = vmatprep.subr.bf16.mxu0 %v6497_v59  ;;  %4368 = vmatprep.subr.bf16.mxu1 %v6500_v60 }
 0x272   :  { %4041 = vmatpush1.bf16.msra.mxu0 %v6495_v63  ;;  %4369 = vmatpush1.bf16.msra.mxu1 %v6498_v11  ;;  %v7950_v14 = vpop.f32.mrb[16].mxu1  ;;  %v6539_v63 = vld [vmem:[#allocation7 + $0x3a4] ss:$16 sps:$4 sm:$0xff]   ;;  %v6542_v11 = vld [vmem:[#allocation7 + $0x3ac] ss:$16 sps:$4 sm:$0xff]  }
 0x273   :  { %v7952_v17 = vpop.f32.mrb[17].mxu1  ;;  %4042 = vmatprep.subr.bf16.mxu0 %v6503_v12  ;;  %4370 = vmatprep.subr.bf16.mxu1 %v6506_v13  ;;  %v6537_v12 = vld [vmem:[#allocation7 + $0x3a0] ss:$16 sps:$4 sm:$0xff]   ;;  %v6540_v13 = vld [vmem:[#allocation7 + $0x3a8] ss:$16 sps:$4 sm:$0xff]  }
 0x274   :  { %v751_v21 = vpop.f32.mrb[18].mxu1 }
 0x275   :  { %v752_v23 = vpop.f32.mrb[19].mxu1 }
 0x276   :  { %4043 = vmatpush1.bf16.msra.mxu0 %v6501_v15  ;;  %4371 = vmatpush1.bf16.msra.mxu1 %v6504_v16  ;;  %v6545_v16 = vld [vmem:[#allocation7 + $0x3c4] ss:$16 sps:$4 sm:$0xff]  }
 0x277   :  { %4044 = vmatprep.subr.bf16.mxu0 %v6509_v19  ;;  %4372 = vmatprep.subr.bf16.mxu1 %v6512_v20  ;;  %v6548_v19 = vld [vmem:[#allocation7 + $0x3cc] ss:$16 sps:$4 sm:$0xff]  }
 0x27a   :  { %4045 = vmatpush1.bf16.msra.mxu0 %v6507_v24  ;;  %4373 = vmatpush1.bf16.msra.mxu1 %v6510_v25  ;;  %v788_v30 = vpop.f32.mrb[20].mxu1  ;;  %v6543_v24 = vld [vmem:[#allocation7 + $0x3c0] ss:$16 sps:$4 sm:$0xff]   ;;  %v6546_v25 = vld [vmem:[#allocation7 + $0x3c8] ss:$16 sps:$4 sm:$0xff]  }
 0x27b   :  { %v7961_v33 = vadd.f32 %v788_v30, %v322_v26  ;;  %v790_v34 = vpop.f32.mrb[21].mxu1  ;;  %4046 = vmatprep.subr.bf16.mxu0 %v6515_v27  ;;  %4374 = vmatprep.subr.bf16.mxu1 %v6518_v28  ;;  %v290_v26 = vrot.slane %v7926_v10, %v7955_v22  ;;  %v6554_v27 = vld [vmem:[#allocation7 + $0x3ec] ss:$16 sps:$4 sm:$0xff]   ;;  %v302_v28 = vrot.slane %v7926_v10, %v301_v1 }
 0x27c   :  { %v7963_v36 = vadd.f32 %v790_v34, %v326_v29  ;;  %v792_v37 = vpop.f32.mrb[22].mxu1  ;;  %v6552_v29 = vld [vmem:[#allocation7 + $0x3e8] ss:$16 sps:$4 sm:$0xff]  }
 0x27d   :  { %v793_v38 = vpop.f32.mrb[23].mxu1  ;;  %v625_v30 = vadd.f32 %v7940_v45, %v290_v26  ;;  %v668_v34 = vadd.f32 %v7944_v42, %v302_v28  ;;  %v6558_v37 = vld [vmem:[#allocation7 + $0x408] ss:$16 sps:$4 sm:$0xff]   ;;  %v6561_v45 = vld [vmem:[#allocation7 + $0x420] ss:$16 sps:$4 sm:$0xff]  }
 0x27e   :  { %4047 = vmatpush1.bf16.msra.mxu0 %v6513_v31  ;;  %4375 = vmatpush1.bf16.msra.mxu1 %v6516_v32  ;;  %v6557_v31 = vld [vmem:[#allocation7 + $0x404] ss:$16 sps:$4 sm:$0xff]   ;;  %v6560_v32 = vld [vmem:[#allocation7 + $0x40c] ss:$16 sps:$4 sm:$0xff]  }
 0x27f   :  { %4048 = vmatprep.subr.bf16.mxu0 %v6521_v51  ;;  %4376 = vmatprep.subr.bf16.mxu1 %v6524_v35  ;;  %v6555_v51 = vld [vmem:[#allocation7 + $0x400] ss:$16 sps:$4 sm:$0xff]   ;;  %v879_v35 = vpack.c.bf16 %v625_v30, %v625_v30  ;;  %v882_v1 = vpack.c.bf16 %v668_v34, %v668_v34  ;;  %v6563_v38 = vld [vmem:[#allocation7 + $0x424] ss:$16 sps:$4 sm:$0xff]   ;;  %v6572_v42 = vld [vmem:[#allocation7 + $0x44c] ss:$16 sps:$4 sm:$0xff]  }
 0x280   :  { %v6608_v26 = vld [vmem:[#allocation7 + $0x50c] ss:$16 sps:$4 sm:$0xff]   ;;  %v6611_v28 = vld [vmem:[#allocation7 + $0x524] ss:$16 sps:$4 sm:$0xff]   ;;  %v6612_v30 = vld [vmem:[#allocation7 + $0x528] ss:$16 sps:$4 sm:$0xff]  }
 0x281   :  { %v6615_v34 = vld [vmem:[#allocation7 + $0x540] ss:$16 sps:$4 sm:$0xff]  }
 0x282   :  { %4049 = vmatpush1.bf16.msra.mxu0 %v6519_v40  ;;  %4377 = vmatpush1.bf16.msra.mxu1 %v6522_v41  ;;  %v829_v47 = vpop.f32.mrb[24].mxu1  ;;  %v6566_v40 = vld [vmem:[#allocation7 + $0x42c] ss:$16 sps:$4 sm:$0xff]   ;;  %v6564_v41 = vld [vmem:[#allocation7 + $0x428] ss:$16 sps:$4 sm:$0xff]  }
 0x283   :  { %v7966_v50 = vadd.f32 %v829_v47, %v7904_v3  ;;  %v831_v53 = vpop.f32.mrb[25].mxu1  ;;  %4050 = vmatprep.subr.bf16.mxu0 %v6527_v44  ;;  %4378 = vmatprep.subr.bf16.mxu1 %v6530_v46  ;;  %v6569_v44 = vld [vmem:[#allocation7 + $0x444] ss:$16 sps:$4 sm:$0xff]   ;;  %v6567_v46 = vld [vmem:[#allocation7 + $0x440] ss:$16 sps:$4 sm:$0xff]  }
 0x284   :  { %v7969_v57 = vadd.f32 %v831_v53, %v7909_v4  ;;  %v833_v59 = vpop.f32.mrb[26].mxu1  ;;  %v6570_v47 = vld [vmem:[#allocation7 + $0x448] ss:$16 sps:$4 sm:$0xff]   ;;  %v6573_v53 = vld [vmem:[#allocation7 + $0x460] ss:$16 sps:$4 sm:$0xff]  }
 0x285   :  { %v834_v60 = vpop.f32.mrb[27].mxu1  ;;  %v6584_v59 = vld [vmem:[#allocation7 + $0x48c] ss:$16 sps:$4 sm:$0xff]  }
 0x286   :  { %4051 = vmatpush1.bf16.msra.mxu0 %v6525_v48  ;;  %4379 = vmatpush1.bf16.msra.mxu1 %v6528_v49  ;;  %v6575_v48 = vld [vmem:[#allocation7 + $0x464] ss:$16 sps:$4 sm:$0xff]   ;;  %v6578_v49 = vld [vmem:[#allocation7 + $0x46c] ss:$16 sps:$4 sm:$0xff]   ;;  %v6579_v60 = vld [vmem:[#allocation7 + $0x480] ss:$16 sps:$4 sm:$0xff]  }
 0x287   :  { %4052 = vmatprep.subr.bf16.mxu0 %v6533_v54  ;;  %4380 = vmatprep.subr.bf16.mxu1 %v6536_v56  ;;  %v6576_v54 = vld [vmem:[#allocation7 + $0x468] ss:$16 sps:$4 sm:$0xff]   ;;  %v6581_v56 = vld [vmem:[#allocation7 + $0x484] ss:$16 sps:$4 sm:$0xff]  }
 0x28a   :  { %4053 = vmatpush1.bf16.msra.mxu0 %v6531_v61  ;;  %4381 = vmatpush1.bf16.msra.mxu1 %v6534_v62  ;;  %v870_v3 = vpop.f32.mrb[28].mxu1  ;;  %v6582_v61 = vld [vmem:[#allocation7 + $0x488] ss:$16 sps:$4 sm:$0xff]   ;;  %v6587_v62 = vld [vmem:[#allocation7 + $0x4a4] ss:$16 sps:$4 sm:$0xff]  }
 0x28b   :  { %v7972_v15 = vadd.f32 %v870_v3, %v7916_v7  ;;  %v872_v4 = vpop.f32.mrb[29].mxu1  ;;  %4054 = vmatprep.subr.bf16.mxu0 %v6539_v63  ;;  %4382 = vmatprep.subr.bf16.mxu1 %v6542_v11  ;;  %v6551_v7 = vld [vmem:[#allocation7 + $0x3e4] ss:$16 sps:$4 sm:$0xff]   ;;  %v6590_v63 = vld [vmem:[#allocation7 + $0x4ac] ss:$16 sps:$4 sm:$0xff]  }
 0x28c   :  { %v7975_v20 = vadd.f32 %v872_v4, %v7921_v8  ;;  %v874_v21 = vpop.f32.mrb[30].mxu1  ;;  %v6549_v8 = vld [vmem:[#allocation7 + $0x3e0] ss:$16 sps:$4 sm:$0xff]   ;;  %v6588_v3 = vld [vmem:[#allocation7 + $0x4a8] ss:$16 sps:$4 sm:$0xff]  }
 0x28d   :  { %v875_v23 = vpop.f32.mrb[31].mxu1  ;;  %v6585_v11 = vld [vmem:[#allocation7 + $0x4a0] ss:$16 sps:$4 sm:$0xff]   ;;  %v6602_v21 = vld [vmem:[#allocation7 + $0x4ec] ss:$16 sps:$4 sm:$0xff]  }
 0x28e   :  { %4055 = vmatpush1.bf16.msra.mxu0 %v6537_v12  ;;  %4383 = vmatpush1.bf16.msra.mxu1 %v6540_v13  ;;  %v6593_v12 = vld [vmem:[#allocation7 + $0x4c4] ss:$16 sps:$4 sm:$0xff]   ;;  %v6596_v13 = vld [vmem:[#allocation7 + $0x4cc] ss:$16 sps:$4 sm:$0xff]   ;;  %v6591_v4 = vld [vmem:[#allocation7 + $0x4c0] ss:$16 sps:$4 sm:$0xff]  }
 0x28f   :  { %4056 = vmatprep.subr.bf16.mxu0 %v6545_v16  ;;  %4384 = vmatprep.subr.bf16.mxu1 %v6548_v19  ;;  %v6594_v16 = vld [vmem:[#allocation7 + $0x4c8] ss:$16 sps:$4 sm:$0xff]   ;;  %v6599_v19 = vld [vmem:[#allocation7 + $0x4e4] ss:$16 sps:$4 sm:$0xff]   ;;  %v6597_v23 = vld [vmem:[#allocation7 + $0x4e0] ss:$16 sps:$4 sm:$0xff]  }
 0x292   :  { %4057 = vmatpush1.bf16.msra.mxu0 %v6543_v24  ;;  %4385 = vmatpush1.bf16.msra.mxu1 %v6546_v25  ;;  %v6600_v24 = vld [vmem:[#allocation7 + $0x4e8] ss:$16 sps:$4 sm:$0xff]   ;;  %v6605_v25 = vld [vmem:[#allocation7 + $0x504] ss:$16 sps:$4 sm:$0xff]  }
 0x293   :  { %4058 = vmatprep.subr.bf16.mxu0 %v6551_v7  ;;  %4386 = vmatprep.subr.bf16.mxu1 %v6554_v27  ;;  %v6603_v7 = vld [vmem:[#allocation7 + $0x500] ss:$16 sps:$4 sm:$0xff]   ;;  %v6606_v27 = vld [vmem:[#allocation7 + $0x508] ss:$16 sps:$4 sm:$0xff]  }
 0x296   :  { %4059 = vmatpush1.bf16.msra.mxu0 %v6549_v8  ;;  %4387 = vmatpush1.bf16.msra.mxu1 %v6552_v29  ;;  %v6614_v8 = vld [vmem:[#allocation7 + $0x52c] ss:$16 sps:$4 sm:$0xff]   ;;  %v6609_v29 = vld [vmem:[#allocation7 + $0x520] ss:$16 sps:$4 sm:$0xff]  }
 0x297   :  { %4069 = vmatprep.subr.bf16.mxu0 %v6557_v31  ;;  %4397 = vmatprep.subr.bf16.mxu1 %v6560_v32  ;;  %v6617_v31 = vld [vmem:[#allocation7 + $0x544] ss:$16 sps:$4 sm:$0xff]   ;;  %v6620_v32 = vld [vmem:[#allocation7 + $0x54c] ss:$16 sps:$4 sm:$0xff]  }
 0x299   :  { %4061 = vmatmul.mubr.bf16.vlgmr.msra.gmra.mrb[0].mxu0 %v879_v35  ;;  %4389 = vmatmul.mubr.bf16.vlgmr.msra.gmra.mrb[32].mxu1 %v879_v35  ;;  %v6623_v35 = vld [vmem:[#allocation7 + $0x564] ss:$16 sps:$4 sm:$0xff]  }
 0x29a   :  { %4070 = vmatpush1.bf16.msra.mxu0 %v6555_v51  ;;  %4101 = vmatprep.mubr.bf16.mxu0 %v882_v1  ;;  %v6618_v51 = vld [vmem:[#allocation7 + $0x548] ss:$16 sps:$4 sm:$0xff]  }
 0x29b   :  { %4398 = vmatpush1.bf16.msra.mxu1 %v6558_v37  ;;  %4429 = vmatprep.mubr.bf16.mxu1 %v882_v1  ;;  %v6626_v37 = vld [vmem:[#allocation7 + $0x56c] ss:$16 sps:$4 sm:$0xff]   ;;  %v6621_v1 = vld [vmem:[#allocation7 + $0x560] ss:$16 sps:$4 sm:$0xff]  }
 0x29c   :  { %4071 = vmatprep.subr.bf16.mxu0 %v6563_v38  ;;  %4399 = vmatprep.subr.bf16.mxu1 %v6566_v40  ;;  %v6624_v38 = vld [vmem:[#allocation7 + $0x568] ss:$16 sps:$4 sm:$0xff]   ;;  %v6629_v40 = vld [vmem:[#allocation7 + $0x584] ss:$16 sps:$4 sm:$0xff]  }
 0x29e   :  { %4072 = vmatpush1.bf16.msra.mxu0 %v6561_v45  ;;  %v6632_v45 = vld [vmem:[#allocation7 + $0x58c] ss:$16 sps:$4 sm:$0xff]  }
 0x29f   :  { %4400 = vmatpush1.bf16.msra.mxu1 %v6564_v41  ;;  %4073 = vmatprep.subr.bf16.mxu0 %v6569_v44  ;;  %v6627_v41 = vld [vmem:[#allocation7 + $0x580] ss:$16 sps:$4 sm:$0xff]   ;;  %v6630_v44 = vld [vmem:[#allocation7 + $0x588] ss:$16 sps:$4 sm:$0xff]  }
 0x2a0   :  { %4401 = vmatprep.subr.bf16.mxu1 %v6572_v42  ;;  %v6635_v42 = vld [vmem:[#allocation7 + $0x5a4] ss:$16 sps:$4 sm:$0xff]  }
 0x2a2   :  { %4074 = vmatpush1.bf16.msra.mxu0 %v6567_v46  ;;  %v6638_v46 = vld [vmem:[#allocation7 + $0x5ac] ss:$16 sps:$4 sm:$0xff]  }
 0x2a3   :  { %4402 = vmatpush1.bf16.msra.mxu1 %v6570_v47  ;;  %4075 = vmatprep.subr.bf16.mxu0 %v6575_v48  ;;  %v6633_v47 = vld [vmem:[#allocation7 + $0x5a0] ss:$16 sps:$4 sm:$0xff]   ;;  %v6636_v48 = vld [vmem:[#allocation7 + $0x5a8] ss:$16 sps:$4 sm:$0xff]  }
 0x2a4   :  { %4403 = vmatprep.subr.bf16.mxu1 %v6578_v49  ;;  %v6641_v49 = vld [vmem:[#allocation7 + $0x5c4] ss:$16 sps:$4 sm:$0xff]  }
 0x2a6   :  { %4076 = vmatpush1.bf16.msra.mxu0 %v6573_v53  ;;  %v6644_v53 = vld [vmem:[#allocation7 + $0x5cc] ss:$16 sps:$4 sm:$0xff]  }
 0x2a7   :  { %4404 = vmatpush1.bf16.msra.mxu1 %v6576_v54  ;;  %4077 = vmatprep.subr.bf16.mxu0 %v6581_v56  ;;  %v6639_v54 = vld [vmem:[#allocation7 + $0x5c0] ss:$16 sps:$4 sm:$0xff]   ;;  %v298_v56 = vrot.slane %v7926_v10, %v297_v0  ;;  %v6656_v0 = vld [vmem:[#allocation7 + $0x60c] ss:$16 sps:$4 sm:$0xff]  }
 0x2a8   :  { %4405 = vmatprep.subr.bf16.mxu1 %v6584_v59  ;;  %v6642_v59 = vld [vmem:[#allocation7 + $0x5c8] ss:$16 sps:$4 sm:$0xff]  }
 0x2aa   :  { %4078 = vmatpush1.bf16.msra.mxu0 %v6579_v60  ;;  %v6647_v60 = vld [vmem:[#allocation7 + $0x5e4] ss:$16 sps:$4 sm:$0xff]  }
 0x2ab   :  { %4406 = vmatpush1.bf16.msra.mxu1 %v6582_v61  ;;  %4079 = vmatprep.subr.bf16.mxu0 %v6587_v62  ;;  %v6650_v61 = vld [vmem:[#allocation7 + $0x5ec] ss:$16 sps:$4 sm:$0xff]   ;;  %v310_v62 = vrot.slane %v7926_v10, %v309_v6  ;;  %v6659_v6 = vld [vmem:[#allocation7 + $0x624] ss:$16 sps:$4 sm:$0xff]  }
 0x2ac   :  { %4407 = vmatprep.subr.bf16.mxu1 %v6590_v63  ;;  %v6645_v63 = vld [vmem:[#allocation7 + $0x5e0] ss:$16 sps:$4 sm:$0xff]  }
 0x2ae   :  { %4080 = vmatpush1.bf16.msra.mxu0 %v6585_v11  ;;  %v666_v11 = vadd.f32 %v7942_v39, %v298_v56  ;;  %v6657_v39 = vld [vmem:[#allocation7 + $0x620] ss:$16 sps:$4 sm:$0xff]   ;;  %v6707_v56 = vld [vmem:[#allocation7 + $0x724] ss:$16 sps:$4 sm:$0xff]  }
 0x2af   :  { %4408 = vmatpush1.bf16.msra.mxu1 %v6588_v3  ;;  %4081 = vmatprep.subr.bf16.mxu0 %v6593_v12  ;;  %v6648_v3 = vld [vmem:[#allocation7 + $0x5e8] ss:$16 sps:$4 sm:$0xff]   ;;  %v6653_v12 = vld [vmem:[#allocation7 + $0x604] ss:$16 sps:$4 sm:$0xff]  }
 0x2b0   :  { %4409 = vmatprep.subr.bf16.mxu1 %v6596_v13  ;;  %v709_v13 = vadd.f32 %v7948_v58, %v310_v62  ;;  %v6668_v58 = vld [vmem:[#allocation7 + $0x64c] ss:$16 sps:$4 sm:$0xff]   ;;  %v6713_v62 = vld [vmem:[#allocation7 + $0x744] ss:$16 sps:$4 sm:$0xff]  }
 0x2b2   :  { %4082 = vmatpush1.bf16.msra.mxu0 %v6591_v4  ;;  %v6651_v4 = vld [vmem:[#allocation7 + $0x600] ss:$16 sps:$4 sm:$0xff]  }
 0x2b3   :  { %4410 = vmatpush1.bf16.msra.mxu1 %v6594_v16  ;;  %4083 = vmatprep.subr.bf16.mxu0 %v6599_v19  ;;  %v881_v16 = vpack.c.bf16 %v666_v11, %v666_v11  ;;  %v6654_v19 = vld [vmem:[#allocation7 + $0x608] ss:$16 sps:$4 sm:$0xff]   ;;  %v6711_v11 = vld [vmem:[#allocation7 + $0x740] ss:$16 sps:$4 sm:$0xff]  }
 0x2b4   :  { %4411 = vmatprep.subr.bf16.mxu1 %v6602_v21  ;;  %v884_v21 = vpack.c.bf16 %v709_v13, %v709_v13  ;;  %v6717_v13 = vld [vmem:[#allocation7 + $0x760] ss:$16 sps:$4 sm:$0xff]  }
 0x2b6   :  { %4084 = vmatpush1.bf16.msra.mxu0 %v6597_v23  ;;  %v6662_v23 = vld [vmem:[#allocation7 + $0x62c] ss:$16 sps:$4 sm:$0xff]  }
 0x2b7   :  { %4412 = vmatpush1.bf16.msra.mxu1 %v6600_v24  ;;  %4085 = vmatprep.subr.bf16.mxu0 %v6605_v25  ;;  %v6660_v24 = vld [vmem:[#allocation7 + $0x628] ss:$16 sps:$4 sm:$0xff]   ;;  %v6665_v25 = vld [vmem:[#allocation7 + $0x644] ss:$16 sps:$4 sm:$0xff]  }
 0x2b8   :  { %4413 = vmatprep.subr.bf16.mxu1 %v6608_v26  ;;  %v6663_v26 = vld [vmem:[#allocation7 + $0x640] ss:$16 sps:$4 sm:$0xff]  }
 0x2ba   :  { %4086 = vmatpush1.bf16.msra.mxu0 %v6603_v7  ;;  %v6666_v7 = vld [vmem:[#allocation7 + $0x648] ss:$16 sps:$4 sm:$0xff]  }
 0x2bb   :  { %4414 = vmatpush1.bf16.msra.mxu1 %v6606_v27  ;;  %4087 = vmatprep.subr.bf16.mxu0 %v6611_v28  ;;  %v6671_v27 = vld [vmem:[#allocation7 + $0x664] ss:$16 sps:$4 sm:$0xff]   ;;  %v6674_v28 = vld [vmem:[#allocation7 + $0x66c] ss:$16 sps:$4 sm:$0xff]  }
 0x2bc   :  { %4415 = vmatprep.subr.bf16.mxu1 %v6614_v8  ;;  %v6669_v8 = vld [vmem:[#allocation7 + $0x660] ss:$16 sps:$4 sm:$0xff]  }
 0x2be   :  { %4088 = vmatpush1.bf16.msra.mxu0 %v6609_v29  ;;  %v6672_v29 = vld [vmem:[#allocation7 + $0x668] ss:$16 sps:$4 sm:$0xff]  }
 0x2bf   :  { %4416 = vmatpush1.bf16.msra.mxu1 %v6612_v30  ;;  %4089 = vmatprep.subr.bf16.mxu0 %v6617_v31  ;;  %v6677_v30 = vld [vmem:[#allocation7 + $0x684] ss:$16 sps:$4 sm:$0xff]   ;;  %v6680_v31 = vld [vmem:[#allocation7 + $0x68c] ss:$16 sps:$4 sm:$0xff]  }
 0x2c0   :  { %4417 = vmatprep.subr.bf16.mxu1 %v6620_v32  ;;  %v6675_v32 = vld [vmem:[#allocation7 + $0x680] ss:$16 sps:$4 sm:$0xff]  }
 0x2c2   :  { %4090 = vmatpush1.bf16.msra.mxu0 %v6615_v34  ;;  %v6678_v34 = vld [vmem:[#allocation7 + $0x688] ss:$16 sps:$4 sm:$0xff]  }
 0x2c3   :  { %4418 = vmatpush1.bf16.msra.mxu1 %v6618_v51  ;;  %4091 = vmatprep.subr.bf16.mxu0 %v6623_v35  ;;  %v6683_v51 = vld [vmem:[#allocation7 + $0x6a4] ss:$16 sps:$4 sm:$0xff]   ;;  %v6686_v35 = vld [vmem:[#allocation7 + $0x6ac] ss:$16 sps:$4 sm:$0xff]  }
 0x2c4   :  { %4419 = vmatprep.subr.bf16.mxu1 %v6626_v37  ;;  %v6681_v37 = vld [vmem:[#allocation7 + $0x6a0] ss:$16 sps:$4 sm:$0xff]  }
 0x2c6   :  { %4092 = vmatpush1.bf16.msra.mxu0 %v6621_v1  ;;  %v6684_v1 = vld [vmem:[#allocation7 + $0x6a8] ss:$16 sps:$4 sm:$0xff]  }
 0x2c7   :  { %4420 = vmatpush1.bf16.msra.mxu1 %v6624_v38  ;;  %4093 = vmatprep.subr.bf16.mxu0 %v6629_v40  ;;  %v6689_v38 = vld [vmem:[#allocation7 + $0x6c4] ss:$16 sps:$4 sm:$0xff]   ;;  %v6692_v40 = vld [vmem:[#allocation7 + $0x6cc] ss:$16 sps:$4 sm:$0xff]  }
 0x2c8   :  { %4421 = vmatprep.subr.bf16.mxu1 %v6632_v45  ;;  %v6687_v45 = vld [vmem:[#allocation7 + $0x6c0] ss:$16 sps:$4 sm:$0xff]  }
 0x2ca   :  { %4094 = vmatpush1.bf16.msra.mxu0 %v6627_v41  ;;  %v6690_v41 = vld [vmem:[#allocation7 + $0x6c8] ss:$16 sps:$4 sm:$0xff]  }
 0x2cb   :  { %4422 = vmatpush1.bf16.msra.mxu1 %v6630_v44  ;;  %4095 = vmatprep.subr.bf16.mxu0 %v6635_v42  ;;  %v6695_v44 = vld [vmem:[#allocation7 + $0x6e4] ss:$16 sps:$4 sm:$0xff]   ;;  %v6698_v42 = vld [vmem:[#allocation7 + $0x6ec] ss:$16 sps:$4 sm:$0xff]  }
 0x2cc   :  { %4423 = vmatprep.subr.bf16.mxu1 %v6638_v46  ;;  %v6693_v46 = vld [vmem:[#allocation7 + $0x6e0] ss:$16 sps:$4 sm:$0xff]  }
 0x2ce   :  { %4096 = vmatpush1.bf16.msra.mxu0 %v6633_v47  ;;  %v6696_v47 = vld [vmem:[#allocation7 + $0x6e8] ss:$16 sps:$4 sm:$0xff]  }
 0x2cf   :  { %4424 = vmatpush1.bf16.msra.mxu1 %v6636_v48  ;;  %4097 = vmatprep.subr.bf16.mxu0 %v6641_v49  ;;  %v6701_v48 = vld [vmem:[#allocation7 + $0x704] ss:$16 sps:$4 sm:$0xff]   ;;  %v6704_v49 = vld [vmem:[#allocation7 + $0x70c] ss:$16 sps:$4 sm:$0xff]  }
 0x2d0   :  { %4425 = vmatprep.subr.bf16.mxu1 %v6644_v53  ;;  %v6699_v53 = vld [vmem:[#allocation7 + $0x700] ss:$16 sps:$4 sm:$0xff]  }
 0x2d2   :  { %4098 = vmatpush1.bf16.msra.mxu0 %v6639_v54  ;;  %v6702_v54 = vld [vmem:[#allocation7 + $0x708] ss:$16 sps:$4 sm:$0xff]  }
 0x2d3   :  { %4426 = vmatpush1.bf16.msra.mxu1 %v6642_v59  ;;  %4099 = vmatprep.subr.bf16.mxu0 %v6647_v60  ;;  %v6710_v59 = vld [vmem:[#allocation7 + $0x72c] ss:$16 sps:$4 sm:$0xff]   ;;  %v6705_v60 = vld [vmem:[#allocation7 + $0x720] ss:$16 sps:$4 sm:$0xff]  }
 0x2d4   :  { %4427 = vmatprep.subr.bf16.mxu1 %v6650_v61  ;;  %v6708_v61 = vld [vmem:[#allocation7 + $0x728] ss:$16 sps:$4 sm:$0xff]  }
 0x2d6   :  { %4100 = vmatpush1.bf16.msra.mxu0 %v6645_v63  ;;  %v6716_v63 = vld [vmem:[#allocation7 + $0x74c] ss:$16 sps:$4 sm:$0xff]  }
 0x2d7   :  { %4428 = vmatpush1.bf16.msra.mxu1 %v6648_v3  ;;  %4110 = vmatprep.subr.bf16.mxu0 %v6653_v12  ;;  %v6714_v3 = vld [vmem:[#allocation7 + $0x748] ss:$16 sps:$4 sm:$0xff]   ;;  %v6719_v12 = vld [vmem:[#allocation7 + $0x764] ss:$16 sps:$4 sm:$0xff]  }
 0x2d8   :  { %4438 = vmatprep.subr.bf16.mxu1 %v6656_v0  ;;  %v6722_v0 = vld [vmem:[#allocation7 + $0x76c] ss:$16 sps:$4 sm:$0xff]  }
 0x2d9   :  { %4102 = vmatmul.mubr.bf16.vlgmr.msra.gmra.mrb[0].mxu0 %v881_v16 }
 0x2da   :  { %4430 = vmatmul.mubr.bf16.vlgmr.msra.gmra.mrb[32].mxu1 %v881_v16  ;;  %4111 = vmatpush1.bf16.msra.mxu0 %v6651_v4  ;;  %v6720_v4 = vld [vmem:[#allocation7 + $0x768] ss:$16 sps:$4 sm:$0xff]   ;;  %v6725_v16 = vld [vmem:[#allocation7 + $0x784] ss:$16 sps:$4 sm:$0xff]  }
 0x2db   :  { %4142 = vmatprep.mubr.bf16.mxu0 %v884_v21  ;;  %4439 = vmatpush1.bf16.msra.mxu1 %v6654_v19  ;;  %v6728_v19 = vld [vmem:[#allocation7 + $0x78c] ss:$16 sps:$4 sm:$0xff]  }
 0x2dc   :  { %4470 = vmatprep.mubr.bf16.mxu1 %v884_v21  ;;  %4112 = vmatprep.subr.bf16.mxu0 %v6659_v6  ;;  %v6723_v6 = vld [vmem:[#allocation7 + $0x780] ss:$16 sps:$4 sm:$0xff]   ;;  %v6726_v21 = vld [vmem:[#allocation7 + $0x788] ss:$16 sps:$4 sm:$0xff]  }
 0x2dd   :  { %4440 = vmatprep.subr.bf16.mxu1 %v6662_v23  ;;  %v6731_v23 = vld [vmem:[#allocation7 + $0x7a4] ss:$16 sps:$4 sm:$0xff]  }
 0x2de   :  { %4113 = vmatpush1.bf16.msra.mxu0 %v6657_v39  ;;  %v6734_v39 = vld [vmem:[#allocation7 + $0x7ac] ss:$16 sps:$4 sm:$0xff]  }
 0x2df   :  { %4441 = vmatpush1.bf16.msra.mxu1 %v6660_v24  ;;  %4114 = vmatprep.subr.bf16.mxu0 %v6665_v25  ;;  %v6729_v24 = vld [vmem:[#allocation7 + $0x7a0] ss:$16 sps:$4 sm:$0xff]   ;;  %v6732_v25 = vld [vmem:[#allocation7 + $0x7a8] ss:$16 sps:$4 sm:$0xff]  }
 0x2e0   :  { %4442 = vmatprep.subr.bf16.mxu1 %v6668_v58  ;;  %v6737_v58 = vld [vmem:[#allocation7 + $0x7c4] ss:$16 sps:$4 sm:$0xff]  }
 0x2e2   :  { %4115 = vmatpush1.bf16.msra.mxu0 %v6663_v26  ;;  %v6740_v26 = vld [vmem:[#allocation7 + $0x7cc] ss:$16 sps:$4 sm:$0xff]  }
 0x2e3   :  { %4443 = vmatpush1.bf16.msra.mxu1 %v6666_v7  ;;  %4116 = vmatprep.subr.bf16.mxu0 %v6671_v27  ;;  %v6735_v7 = vld [vmem:[#allocation7 + $0x7c0] ss:$16 sps:$4 sm:$0xff]   ;;  %v306_v27 = vrot.slane %v7926_v10, %v305_v5 }
 0x2e4   :  { %4444 = vmatprep.subr.bf16.mxu1 %v6674_v28  ;;  %v6738_v28 = vld [vmem:[#allocation7 + $0x7c8] ss:$16 sps:$4 sm:$0xff]   ;;  %v6747_v10 = vld [vmem:[#allocation7 + $0x800] ss:$16 sps:$4 sm:$0xff]  }
 0x2e6   :  { %4117 = vmatpush1.bf16.msra.mxu0 %v6669_v8  ;;  %v6743_v8 = vld [vmem:[#allocation7 + $0x7e4] ss:$16 sps:$4 sm:$0xff]  }
 0x2e7   :  { %4445 = vmatpush1.bf16.msra.mxu1 %v6672_v29  ;;  %4118 = vmatprep.subr.bf16.mxu0 %v6677_v30  ;;  %v6746_v29 = vld [vmem:[#allocation7 + $0x7ec] ss:$16 sps:$4 sm:$0xff]   ;;  %v318_v30 = vrot.slane %v7899_v2, %v7929_v52  ;;  %v6755_v2 = vld [vmem:[#allocation7 + $0x824] ss:$16 sps:$4 sm:$0xff]  }
 0x2e8   :  { %4446 = vmatprep.subr.bf16.mxu1 %v6680_v31  ;;  %v6741_v31 = vld [vmem:[#allocation7 + $0x7e0] ss:$16 sps:$4 sm:$0xff]  }
 0x2e9   :  { %v750_v5 = vadd.f32 %v7952_v17, %v318_v30  ;;  %v6764_v17 = vld [vmem:[#allocation7 + $0x84c] ss:$16 sps:$4 sm:$0xff]  }
 0x2ea   :  { %4119 = vmatpush1.bf16.msra.mxu0 %v6675_v32  ;;  %v707_v32 = vadd.f32 %v7946_v55, %v306_v27  ;;  %v6753_v55 = vld [vmem:[#allocation7 + $0x820] ss:$16 sps:$4 sm:$0xff]   ;;  %v6812_v27 = vld [vmem:[#allocation7 + $0x94c] ss:$16 sps:$4 sm:$0xff]  }
 0x2eb   :  { %4447 = vmatpush1.bf16.msra.mxu1 %v6678_v34  ;;  %4120 = vmatprep.subr.bf16.mxu0 %v6683_v51  ;;  %v6744_v34 = vld [vmem:[#allocation7 + $0x7e8] ss:$16 sps:$4 sm:$0xff]   ;;  %v6749_v51 = vld [vmem:[#allocation7 + $0x804] ss:$16 sps:$4 sm:$0xff]   ;;  %v6818_v30 = vld [vmem:[#allocation7 + $0x96c] ss:$16 sps:$4 sm:$0xff]  }
 0x2ec   :  { %4448 = vmatprep.subr.bf16.mxu1 %v6686_v35  ;;  %v6752_v35 = vld [vmem:[#allocation7 + $0x80c] ss:$16 sps:$4 sm:$0xff]  }
 0x2ee   :  { %4121 = vmatpush1.bf16.msra.mxu0 %v6681_v37  ;;  %v883_v37 = vpack.c.bf16 %v707_v32, %v707_v32  ;;  %v6816_v32 = vld [vmem:[#allocation7 + $0x968] ss:$16 sps:$4 sm:$0xff]  }
 0x2ef   :  { %4449 = vmatpush1.bf16.msra.mxu1 %v6684_v1  ;;  %4122 = vmatprep.subr.bf16.mxu0 %v6689_v38  ;;  %v6750_v1 = vld [vmem:[#allocation7 + $0x808] ss:$16 sps:$4 sm:$0xff]   ;;  %v886_v38 = vpack.c.bf16 %v750_v5, %v750_v5 }
 0x2f0   :  { %4450 = vmatprep.subr.bf16.mxu1 %v6692_v40  ;;  %v6758_v40 = vld [vmem:[#allocation7 + $0x82c] ss:$16 sps:$4 sm:$0xff]   ;;  %v6822_v5 = vld [vmem:[#allocation7 + $0x988] ss:$16 sps:$4 sm:$0xff]  }
 0x2f2   :  { %4123 = vmatpush1.bf16.msra.mxu0 %v6687_v45  ;;  %v6756_v45 = vld [vmem:[#allocation7 + $0x828] ss:$16 sps:$4 sm:$0xff]  }
 0x2f3   :  { %4451 = vmatpush1.bf16.msra.mxu1 %v6690_v41  ;;  %4124 = vmatprep.subr.bf16.mxu0 %v6695_v44  ;;  %v6761_v41 = vld [vmem:[#allocation7 + $0x844] ss:$16 sps:$4 sm:$0xff]   ;;  %v6759_v44 = vld [vmem:[#allocation7 + $0x840] ss:$16 sps:$4 sm:$0xff]  }
 0x2f4   :  { %4452 = vmatprep.subr.bf16.mxu1 %v6698_v42  ;;  %v6762_v42 = vld [vmem:[#allocation7 + $0x848] ss:$16 sps:$4 sm:$0xff]  }
 0x2f6   :  { %4125 = vmatpush1.bf16.msra.mxu0 %v6693_v46  ;;  %v6767_v46 = vld [vmem:[#allocation7 + $0x864] ss:$16 sps:$4 sm:$0xff]  }
 0x2f7   :  { %4453 = vmatpush1.bf16.msra.mxu1 %v6696_v47  ;;  %4126 = vmatprep.subr.bf16.mxu0 %v6701_v48  ;;  %v6770_v47 = vld [vmem:[#allocation7 + $0x86c] ss:$16 sps:$4 sm:$0xff]   ;;  %v6765_v48 = vld [vmem:[#allocation7 + $0x860] ss:$16 sps:$4 sm:$0xff]  }
 0x2f8   :  { %4454 = vmatprep.subr.bf16.mxu1 %v6704_v49  ;;  %v6768_v49 = vld [vmem:[#allocation7 + $0x868] ss:$16 sps:$4 sm:$0xff]  }
 0x2fa   :  { %4127 = vmatpush1.bf16.msra.mxu0 %v6699_v53  ;;  %v6773_v53 = vld [vmem:[#allocation7 + $0x884] ss:$16 sps:$4 sm:$0xff]  }
 0x2fb   :  { %4455 = vmatpush1.bf16.msra.mxu1 %v6702_v54  ;;  %4128 = vmatprep.subr.bf16.mxu0 %v6707_v56  ;;  %v6776_v54 = vld [vmem:[#allocation7 + $0x88c] ss:$16 sps:$4 sm:$0xff]   ;;  %v6771_v56 = vld [vmem:[#allocation7 + $0x880] ss:$16 sps:$4 sm:$0xff]  }
 0x2fc   :  { %4456 = vmatprep.subr.bf16.mxu1 %v6710_v59  ;;  %v6774_v59 = vld [vmem:[#allocation7 + $0x888] ss:$16 sps:$4 sm:$0xff]  }
 0x2fe   :  { %4129 = vmatpush1.bf16.msra.mxu0 %v6705_v60  ;;  %v6779_v60 = vld [vmem:[#allocation7 + $0x8a4] ss:$16 sps:$4 sm:$0xff]  }
 0x2ff   :  { %4457 = vmatpush1.bf16.msra.mxu1 %v6708_v61  ;;  %4130 = vmatprep.subr.bf16.mxu0 %v6713_v62  ;;  %v6782_v61 = vld [vmem:[#allocation7 + $0x8ac] ss:$16 sps:$4 sm:$0xff]   ;;  %v6777_v62 = vld [vmem:[#allocation7 + $0x8a0] ss:$16 sps:$4 sm:$0xff]  }
 0x300   :  { %4458 = vmatprep.subr.bf16.mxu1 %v6716_v63  ;;  %v6780_v63 = vld [vmem:[#allocation7 + $0x8a8] ss:$16 sps:$4 sm:$0xff]  }
 0x302   :  { %4131 = vmatpush1.bf16.msra.mxu0 %v6711_v11  ;;  %v6785_v11 = vld [vmem:[#allocation7 + $0x8c4] ss:$16 sps:$4 sm:$0xff]  }
 0x303   :  { %4459 = vmatpush1.bf16.msra.mxu1 %v6714_v3  ;;  %4132 = vmatprep.subr.bf16.mxu0 %v6719_v12  ;;  %v6788_v3 = vld [vmem:[#allocation7 + $0x8cc] ss:$16 sps:$4 sm:$0xff]   ;;  %v6783_v12 = vld [vmem:[#allocation7 + $0x8c0] ss:$16 sps:$4 sm:$0xff]  }
 0x304   :  { %4460 = vmatprep.subr.bf16.mxu1 %v6722_v0  ;;  %v6786_v0 = vld [vmem:[#allocation7 + $0x8c8] ss:$16 sps:$4 sm:$0xff]  }
 0x306   :  { %4133 = vmatpush1.bf16.msra.mxu0 %v6717_v13  ;;  %v6791_v13 = vld [vmem:[#allocation7 + $0x8e4] ss:$16 sps:$4 sm:$0xff]  }
 0x307   :  { %4461 = vmatpush1.bf16.msra.mxu1 %v6720_v4  ;;  %4134 = vmatprep.subr.bf16.mxu0 %v6725_v16  ;;  %v6794_v4 = vld [vmem:[#allocation7 + $0x8ec] ss:$16 sps:$4 sm:$0xff]   ;;  %v6789_v16 = vld [vmem:[#allocation7 + $0x8e0] ss:$16 sps:$4 sm:$0xff]  }
 0x308   :  { %4462 = vmatprep.subr.bf16.mxu1 %v6728_v19  ;;  %v6792_v19 = vld [vmem:[#allocation7 + $0x8e8] ss:$16 sps:$4 sm:$0xff]  }
 0x30a   :  { %4135 = vmatpush1.bf16.msra.mxu0 %v6723_v6  ;;  %v6797_v6 = vld [vmem:[#allocation7 + $0x904] ss:$16 sps:$4 sm:$0xff]  }
 0x30b   :  { %4463 = vmatpush1.bf16.msra.mxu1 %v6726_v21  ;;  %4136 = vmatprep.subr.bf16.mxu0 %v6731_v23  ;;  %v6800_v21 = vld [vmem:[#allocation7 + $0x90c] ss:$16 sps:$4 sm:$0xff]   ;;  %v6795_v23 = vld [vmem:[#allocation7 + $0x900] ss:$16 sps:$4 sm:$0xff]  }
 0x30c   :  { %4464 = vmatprep.subr.bf16.mxu1 %v6734_v39  ;;  %v6798_v39 = vld [vmem:[#allocation7 + $0x908] ss:$16 sps:$4 sm:$0xff]  }
 0x30e   :  { %4137 = vmatpush1.bf16.msra.mxu0 %v6729_v24  ;;  %v6803_v24 = vld [vmem:[#allocation7 + $0x924] ss:$16 sps:$4 sm:$0xff]  }
 0x30f   :  { %4465 = vmatpush1.bf16.msra.mxu1 %v6732_v25  ;;  %4138 = vmatprep.subr.bf16.mxu0 %v6737_v58  ;;  %v6806_v25 = vld [vmem:[#allocation7 + $0x92c] ss:$16 sps:$4 sm:$0xff]   ;;  %v6801_v58 = vld [vmem:[#allocation7 + $0x920] ss:$16 sps:$4 sm:$0xff]  }
 0x310   :  { %4466 = vmatprep.subr.bf16.mxu1 %v6740_v26  ;;  %v6804_v26 = vld [vmem:[#allocation7 + $0x928] ss:$16 sps:$4 sm:$0xff]  }
 0x312   :  { %4139 = vmatpush1.bf16.msra.mxu0 %v6735_v7  ;;  %v6809_v7 = vld [vmem:[#allocation7 + $0x944] ss:$16 sps:$4 sm:$0xff]  }
 0x313   :  { %4467 = vmatpush1.bf16.msra.mxu1 %v6738_v28  ;;  %4140 = vmatprep.subr.bf16.mxu0 %v6743_v8  ;;  %v6807_v28 = vld [vmem:[#allocation7 + $0x940] ss:$16 sps:$4 sm:$0xff]   ;;  %v6810_v8 = vld [vmem:[#allocation7 + $0x948] ss:$16 sps:$4 sm:$0xff]  }
 0x314   :  { %4468 = vmatprep.subr.bf16.mxu1 %v6746_v29  ;;  %v6815_v29 = vld [vmem:[#allocation7 + $0x964] ss:$16 sps:$4 sm:$0xff]  }
 0x316   :  { %4141 = vmatpush1.bf16.msra.mxu0 %v6741_v31  ;;  %v6813_v31 = vld [vmem:[#allocation7 + $0x960] ss:$16 sps:$4 sm:$0xff]  }
 0x317   :  { %4469 = vmatpush1.bf16.msra.mxu1 %v6744_v34  ;;  %4151 = vmatprep.subr.bf16.mxu0 %v6749_v51  ;;  %v6821_v34 = vld [vmem:[#allocation7 + $0x984] ss:$16 sps:$4 sm:$0xff]   ;;  %v6824_v51 = vld [vmem:[#allocation7 + $0x98c] ss:$16 sps:$4 sm:$0xff]  }
 0x318   :  { %4479 = vmatprep.subr.bf16.mxu1 %v6752_v35  ;;  %v6819_v35 = vld [vmem:[#allocation7 + $0x980] ss:$16 sps:$4 sm:$0xff]  }
 0x319   :  { %4143 = vmatmul.mubr.bf16.vlgmr.msra.gmra.mrb[0].mxu0 %v883_v37 }
 0x31a   :  { %4471 = vmatmul.mubr.bf16.vlgmr.msra.gmra.mrb[32].mxu1 %v883_v37  ;;  %4152 = vmatpush1.bf16.msra.mxu0 %v6747_v10  ;;  %v6827_v10 = vld [vmem:[#allocation7 + $0x9a4] ss:$16 sps:$4 sm:$0xff]   ;;  %v6830_v37 = vld [vmem:[#allocation7 + $0x9ac] ss:$16 sps:$4 sm:$0xff]  }
 0x31b   :  { %4183 = vmatprep.mubr.bf16.mxu0 %v886_v38  ;;  %4480 = vmatpush1.bf16.msra.mxu1 %v6750_v1  ;;  %v6825_v1 = vld [vmem:[#allocation7 + $0x9a0] ss:$16 sps:$4 sm:$0xff]  }
 0x31c   :  { %4511 = vmatprep.mubr.bf16.mxu1 %v886_v38  ;;  %4153 = vmatprep.subr.bf16.mxu0 %v6755_v2  ;;  %v6828_v2 = vld [vmem:[#allocation7 + $0x9a8] ss:$16 sps:$4 sm:$0xff]   ;;  %v6833_v38 = vld [vmem:[#allocation7 + $0x9c4] ss:$16 sps:$4 sm:$0xff]  }
 0x31d   :  { %4481 = vmatprep.subr.bf16.mxu1 %v6758_v40  ;;  %v6836_v40 = vld [vmem:[#allocation7 + $0x9cc] ss:$16 sps:$4 sm:$0xff]  }
 0x31e   :  { %4154 = vmatpush1.bf16.msra.mxu0 %v6753_v55  ;;  %v6831_v55 = vld [vmem:[#allocation7 + $0x9c0] ss:$16 sps:$4 sm:$0xff]  }
 0x31f   :  { %4482 = vmatpush1.bf16.msra.mxu1 %v6756_v45  ;;  %4155 = vmatprep.subr.bf16.mxu0 %v6761_v41  ;;  %v7287_v45 = vld [vmem:[#allocation5 + $0x8] sm:$0xff] }
 0x320   :  { %4483 = vmatprep.subr.bf16.mxu1 %v6764_v17  ;;  %v314_v41 = vrot.slane %v7287_v45, %v7924_v9  ;;  %v6834_v17 = vld [vmem:[#allocation7 + $0x9c8] ss:$16 sps:$4 sm:$0xff]   ;;  %v6911_v45 = vld [vmem:[#allocation7 + $0xb64] ss:$16 sps:$4 sm:$0xff]  }
 0x322   :  { %4156 = vmatpush1.bf16.msra.mxu0 %v6759_v44  ;;  %v6839_v44 = vld [vmem:[#allocation7 + $0x9e4] ss:$16 sps:$4 sm:$0xff]  }
 0x323   :  { %4484 = vmatpush1.bf16.msra.mxu1 %v6762_v42  ;;  %4157 = vmatprep.subr.bf16.mxu0 %v6767_v46  ;;  %v6842_v42 = vld [vmem:[#allocation7 + $0x9ec] ss:$16 sps:$4 sm:$0xff]   ;;  %v6837_v46 = vld [vmem:[#allocation7 + $0x9e0] ss:$16 sps:$4 sm:$0xff]  }
 0x324   :  { %4485 = vmatprep.subr.bf16.mxu1 %v6770_v47  ;;  %v748_v47 = vadd.f32 %v7950_v14, %v314_v41  ;;  %v6849_v14 = vld [vmem:[#allocation7 + $0xa20] ss:$16 sps:$4 sm:$0xff]   ;;  %v6914_v41 = vld [vmem:[#allocation7 + $0xb6c] ss:$16 sps:$4 sm:$0xff]  }
 0x326   :  { %4158 = vmatpush1.bf16.msra.mxu0 %v6765_v48  ;;  %v6840_v48 = vld [vmem:[#allocation7 + $0x9e8] ss:$16 sps:$4 sm:$0xff]  }
 0x327   :  { %4486 = vmatpush1.bf16.msra.mxu1 %v6768_v49  ;;  %4159 = vmatprep.subr.bf16.mxu0 %v6773_v53  ;;  %v6845_v49 = vld [vmem:[#allocation7 + $0xa04] ss:$16 sps:$4 sm:$0xff]   ;;  %v6848_v53 = vld [vmem:[#allocation7 + $0xa0c] ss:$16 sps:$4 sm:$0xff]  }
 0x328   :  { %4487 = vmatprep.subr.bf16.mxu1 %v6776_v54  ;;  %v6843_v54 = vld [vmem:[#allocation7 + $0xa00] ss:$16 sps:$4 sm:$0xff]  }
 0x32a   :  { %4160 = vmatpush1.bf16.msra.mxu0 %v6771_v56  ;;  %v885_v56 = vpack.c.bf16 %v748_v47, %v748_v47  ;;  %v6915_v47 = vld [vmem:[#allocation7 + $0xb80] ss:$16 sps:$4 sm:$0xff]  }
 0x32b   :  { %4488 = vmatpush1.bf16.msra.mxu1 %v6774_v59  ;;  %4161 = vmatprep.subr.bf16.mxu0 %v6779_v60  ;;  %v6846_v59 = vld [vmem:[#allocation7 + $0xa08] ss:$16 sps:$4 sm:$0xff]   ;;  %v6851_v60 = vld [vmem:[#allocation7 + $0xa24] ss:$16 sps:$4 sm:$0xff]  }
 0x32c   :  { %4489 = vmatprep.subr.bf16.mxu1 %v6782_v61  ;;  %v888_v61 = vpack.c.bf16 %v7963_v36, %v7963_v36  ;;  %v6866_v36 = vld [vmem:[#allocation7 + $0xa6c] ss:$16 sps:$4 sm:$0xff]  }
 0x32e   :  { %4162 = vmatpush1.bf16.msra.mxu0 %v6777_v62  ;;  %v6854_v62 = vld [vmem:[#allocation7 + $0xa2c] ss:$16 sps:$4 sm:$0xff]  }
 0x32f   :  { %4490 = vmatpush1.bf16.msra.mxu1 %v6780_v63  ;;  %4163 = vmatprep.subr.bf16.mxu0 %v6785_v11  ;;  %v6852_v63 = vld [vmem:[#allocation7 + $0xa28] ss:$16 sps:$4 sm:$0xff]   ;;  %v6857_v11 = vld [vmem:[#allocation7 + $0xa44] ss:$16 sps:$4 sm:$0xff]  }
 0x330   :  { %4491 = vmatprep.subr.bf16.mxu1 %v6788_v3  ;;  %v6860_v3 = vld [vmem:[#allocation7 + $0xa4c] ss:$16 sps:$4 sm:$0xff]  }
 0x332   :  { %4164 = vmatpush1.bf16.msra.mxu0 %v6783_v12  ;;  %v6855_v12 = vld [vmem:[#allocation7 + $0xa40] ss:$16 sps:$4 sm:$0xff]  }
 0x333   :  { %4492 = vmatpush1.bf16.msra.mxu1 %v6786_v0  ;;  %4165 = vmatprep.subr.bf16.mxu0 %v6791_v13  ;;  %v6858_v0 = vld [vmem:[#allocation7 + $0xa48] ss:$16 sps:$4 sm:$0xff]   ;;  %v6863_v13 = vld [vmem:[#allocation7 + $0xa64] ss:$16 sps:$4 sm:$0xff]  }
 0x334   :  { %4493 = vmatprep.subr.bf16.mxu1 %v6794_v4  ;;  %v6861_v4 = vld [vmem:[#allocation7 + $0xa60] ss:$16 sps:$4 sm:$0xff]  }
 0x336   :  { %4166 = vmatpush1.bf16.msra.mxu0 %v6789_v16  ;;  %v6864_v16 = vld [vmem:[#allocation7 + $0xa68] ss:$16 sps:$4 sm:$0xff]  }
 0x337   :  { %4494 = vmatpush1.bf16.msra.mxu1 %v6792_v19  ;;  %4167 = vmatprep.subr.bf16.mxu0 %v6797_v6  ;;  %v6869_v19 = vld [vmem:[#allocation7 + $0xa84] ss:$16 sps:$4 sm:$0xff]   ;;  %v6872_v6 = vld [vmem:[#allocation7 + $0xa8c] ss:$16 sps:$4 sm:$0xff]  }
 0x338   :  { %4495 = vmatprep.subr.bf16.mxu1 %v6800_v21  ;;  %v6867_v21 = vld [vmem:[#allocation7 + $0xa80] ss:$16 sps:$4 sm:$0xff]  }
 0x33a   :  { %4168 = vmatpush1.bf16.msra.mxu0 %v6795_v23  ;;  %v6870_v23 = vld [vmem:[#allocation7 + $0xa88] ss:$16 sps:$4 sm:$0xff]  }
 0x33b   :  { %4496 = vmatpush1.bf16.msra.mxu1 %v6798_v39  ;;  %4169 = vmatprep.subr.bf16.mxu0 %v6803_v24  ;;  %v6875_v39 = vld [vmem:[#allocation7 + $0xaa4] ss:$16 sps:$4 sm:$0xff]   ;;  %v6878_v24 = vld [vmem:[#allocation7 + $0xaac] ss:$16 sps:$4 sm:$0xff]  }
 0x33c   :  { %4497 = vmatprep.subr.bf16.mxu1 %v6806_v25  ;;  %v6873_v25 = vld [vmem:[#allocation7 + $0xaa0] ss:$16 sps:$4 sm:$0xff]  }
 0x33e   :  { %4170 = vmatpush1.bf16.msra.mxu0 %v6801_v58  ;;  %v6876_v58 = vld [vmem:[#allocation7 + $0xaa8] ss:$16 sps:$4 sm:$0xff]  }
 0x33f   :  { %4498 = vmatpush1.bf16.msra.mxu1 %v6804_v26  ;;  %4171 = vmatprep.subr.bf16.mxu0 %v6809_v7  ;;  %v6881_v26 = vld [vmem:[#allocation7 + $0xac4] ss:$16 sps:$4 sm:$0xff]   ;;  %v6884_v7 = vld [vmem:[#allocation7 + $0xacc] ss:$16 sps:$4 sm:$0xff]  }
 0x340   :  { %4499 = vmatprep.subr.bf16.mxu1 %v6812_v27  ;;  %v6879_v27 = vld [vmem:[#allocation7 + $0xac0] ss:$16 sps:$4 sm:$0xff]  }
 0x342   :  { %4172 = vmatpush1.bf16.msra.mxu0 %v6807_v28  ;;  %v6882_v28 = vld [vmem:[#allocation7 + $0xac8] ss:$16 sps:$4 sm:$0xff]  }
 0x343   :  { %4500 = vmatpush1.bf16.msra.mxu1 %v6810_v8  ;;  %4173 = vmatprep.subr.bf16.mxu0 %v6815_v29  ;;  %v6887_v8 = vld [vmem:[#allocation7 + $0xae4] ss:$16 sps:$4 sm:$0xff]   ;;  %v6890_v29 = vld [vmem:[#allocation7 + $0xaec] ss:$16 sps:$4 sm:$0xff]  }
 0x344   :  { %4501 = vmatprep.subr.bf16.mxu1 %v6818_v30  ;;  %v6885_v30 = vld [vmem:[#allocation7 + $0xae0] ss:$16 sps:$4 sm:$0xff]  }
 0x346   :  { %4174 = vmatpush1.bf16.msra.mxu0 %v6813_v31  ;;  %v6888_v31 = vld [vmem:[#allocation7 + $0xae8] ss:$16 sps:$4 sm:$0xff]  }
 0x347   :  { %4502 = vmatpush1.bf16.msra.mxu1 %v6816_v32  ;;  %4175 = vmatprep.subr.bf16.mxu0 %v6821_v34  ;;  %v6893_v32 = vld [vmem:[#allocation7 + $0xb04] ss:$16 sps:$4 sm:$0xff]   ;;  %v6896_v34 = vld [vmem:[#allocation7 + $0xb0c] ss:$16 sps:$4 sm:$0xff]  }
 0x348   :  { %4503 = vmatprep.subr.bf16.mxu1 %v6824_v51  ;;  %v6891_v51 = vld [vmem:[#allocation7 + $0xb00] ss:$16 sps:$4 sm:$0xff]  }
 0x34a   :  { %4176 = vmatpush1.bf16.msra.mxu0 %v6819_v35  ;;  %v6894_v35 = vld [vmem:[#allocation7 + $0xb08] ss:$16 sps:$4 sm:$0xff]  }
 0x34b   :  { %4504 = vmatpush1.bf16.msra.mxu1 %v6822_v5  ;;  %4177 = vmatprep.subr.bf16.mxu0 %v6827_v10  ;;  %v6899_v5 = vld [vmem:[#allocation7 + $0xb24] ss:$16 sps:$4 sm:$0xff]   ;;  %v6902_v10 = vld [vmem:[#allocation7 + $0xb2c] ss:$16 sps:$4 sm:$0xff]  }
 0x34c   :  { %4505 = vmatprep.subr.bf16.mxu1 %v6830_v37  ;;  %v6897_v37 = vld [vmem:[#allocation7 + $0xb20] ss:$16 sps:$4 sm:$0xff]  }
 0x34e   :  { %4178 = vmatpush1.bf16.msra.mxu0 %v6825_v1  ;;  %v6900_v1 = vld [vmem:[#allocation7 + $0xb28] ss:$16 sps:$4 sm:$0xff]  }
 0x34f   :  { %4506 = vmatpush1.bf16.msra.mxu1 %v6828_v2  ;;  %4179 = vmatprep.subr.bf16.mxu0 %v6833_v38  ;;  %v6905_v2 = vld [vmem:[#allocation7 + $0xb44] ss:$16 sps:$4 sm:$0xff]   ;;  %v6908_v38 = vld [vmem:[#allocation7 + $0xb4c] ss:$16 sps:$4 sm:$0xff]  }
 0x350   :  { %4507 = vmatprep.subr.bf16.mxu1 %v6836_v40  ;;  %v6903_v40 = vld [vmem:[#allocation7 + $0xb40] ss:$16 sps:$4 sm:$0xff]  }
 0x352   :  { %4180 = vmatpush1.bf16.msra.mxu0 %v6831_v55  ;;  %v6906_v55 = vld [vmem:[#allocation7 + $0xb48] ss:$16 sps:$4 sm:$0xff]  }
 0x353   :  { %4508 = vmatpush1.bf16.msra.mxu1 %v6834_v17  ;;  %4181 = vmatprep.subr.bf16.mxu0 %v6839_v44  ;;  %v6909_v17 = vld [vmem:[#allocation7 + $0xb60] ss:$16 sps:$4 sm:$0xff]   ;;  %v6912_v44 = vld [vmem:[#allocation7 + $0xb68] ss:$16 sps:$4 sm:$0xff]  }
 0x354   :  { %4509 = vmatprep.subr.bf16.mxu1 %v6842_v42  ;;  %v6917_v42 = vld [vmem:[#allocation7 + $0xb84] ss:$16 sps:$4 sm:$0xff]  }
 0x356   :  { %4182 = vmatpush1.bf16.msra.mxu0 %v6837_v46  ;;  %v6920_v46 = vld [vmem:[#allocation7 + $0xb8c] ss:$16 sps:$4 sm:$0xff]  }
 0x357   :  { %4510 = vmatpush1.bf16.msra.mxu1 %v6840_v48  ;;  %4192 = vmatprep.subr.bf16.mxu0 %v6845_v49  ;;  %v6918_v48 = vld [vmem:[#allocation7 + $0xb88] ss:$16 sps:$4 sm:$0xff]   ;;  %v6923_v49 = vld [vmem:[#allocation7 + $0xba4] ss:$16 sps:$4 sm:$0xff]  }
 0x358   :  { %4520 = vmatprep.subr.bf16.mxu1 %v6848_v53  ;;  %v6926_v53 = vld [vmem:[#allocation7 + $0xbac] ss:$16 sps:$4 sm:$0xff]  }
 0x359   :  { %4184 = vmatmul.mubr.bf16.vlgmr.msra.gmra.mrb[0].mxu0 %v885_v56 }
 0x35a   :  { %4512 = vmatmul.mubr.bf16.vlgmr.msra.gmra.mrb[32].mxu1 %v885_v56  ;;  %4193 = vmatpush1.bf16.msra.mxu0 %v6843_v54  ;;  %v6921_v54 = vld [vmem:[#allocation7 + $0xba0] ss:$16 sps:$4 sm:$0xff]   ;;  %v6924_v56 = vld [vmem:[#allocation7 + $0xba8] ss:$16 sps:$4 sm:$0xff]  }
 0x35b   :  { %4224 = vmatprep.mubr.bf16.mxu0 %v888_v61  ;;  %4521 = vmatpush1.bf16.msra.mxu1 %v6846_v59  ;;  %v6929_v59 = vld [vmem:[#allocation7 + $0xbc4] ss:$16 sps:$4 sm:$0xff]  }
 0x35c   :  { %4552 = vmatprep.mubr.bf16.mxu1 %v888_v61  ;;  %4194 = vmatprep.subr.bf16.mxu0 %v6851_v60  ;;  %v6932_v60 = vld [vmem:[#allocation7 + $0xbcc] ss:$16 sps:$4 sm:$0xff]   ;;  %v6927_v61 = vld [vmem:[#allocation7 + $0xbc0] ss:$16 sps:$4 sm:$0xff]  }
 0x35d   :  { %4522 = vmatprep.subr.bf16.mxu1 %v6854_v62  ;;  %v6930_v62 = vld [vmem:[#allocation7 + $0xbc8] ss:$16 sps:$4 sm:$0xff]  }
 0x35e   :  { %4195 = vmatpush1.bf16.msra.mxu0 %v6849_v14  ;;  %v6935_v14 = vld [vmem:[#allocation7 + $0xbe4] ss:$16 sps:$4 sm:$0xff]  }
 0x35f   :  { %4523 = vmatpush1.bf16.msra.mxu1 %v6852_v63  ;;  %4196 = vmatprep.subr.bf16.mxu0 %v6857_v11  ;;  %v6938_v63 = vld [vmem:[#allocation7 + $0xbec] ss:$16 sps:$4 sm:$0xff]   ;;  %v6933_v11 = vld [vmem:[#allocation7 + $0xbe0] ss:$16 sps:$4 sm:$0xff]  }
 0x360   :  { %4524 = vmatprep.subr.bf16.mxu1 %v6860_v3  ;;  %v6936_v3 = vld [vmem:[#allocation7 + $0xbe8] ss:$16 sps:$4 sm:$0xff]  }
 0x362   :  { %4197 = vmatpush1.bf16.msra.mxu0 %v6855_v12  ;;  %v6941_v12 = vld [vmem:[#allocation7 + $0xc04] ss:$16 sps:$4 sm:$0xff]  }
 0x363   :  { %4525 = vmatpush1.bf16.msra.mxu1 %v6858_v0  ;;  %4198 = vmatprep.subr.bf16.mxu0 %v6863_v13  ;;  %v6944_v0 = vld [vmem:[#allocation7 + $0xc0c] ss:$16 sps:$4 sm:$0xff]   ;;  %v6939_v13 = vld [vmem:[#allocation7 + $0xc00] ss:$16 sps:$4 sm:$0xff]  }
 0x364   :  { %4526 = vmatprep.subr.bf16.mxu1 %v6866_v36  ;;  %v887_v36 = vpack.c.bf16 %v7961_v33, %v7961_v33  ;;  %v6956_v33 = vld [vmem:[#allocation7 + $0xc4c] ss:$16 sps:$4 sm:$0xff]  }
 0x366   :  { %4199 = vmatpush1.bf16.msra.mxu0 %v6861_v4  ;;  %v6942_v4 = vld [vmem:[#allocation7 + $0xc08] ss:$16 sps:$4 sm:$0xff]  }
 0x367   :  { %4527 = vmatpush1.bf16.msra.mxu1 %v6864_v16  ;;  %4200 = vmatprep.subr.bf16.mxu0 %v6869_v19  ;;  %v6947_v16 = vld [vmem:[#allocation7 + $0xc24] ss:$16 sps:$4 sm:$0xff]   ;;  %v890_v19 = vpack.c.bf16 %v7969_v57, %v7969_v57  ;;  %v6962_v57 = vld [vmem:[#allocation7 + $0xc6c] ss:$16 sps:$4 sm:$0xff]  }
 0x368   :  { %4528 = vmatprep.subr.bf16.mxu1 %v6872_v6  ;;  %v6950_v6 = vld [vmem:[#allocation7 + $0xc2c] ss:$16 sps:$4 sm:$0xff]  }
 0x36a   :  { %4201 = vmatpush1.bf16.msra.mxu0 %v6867_v21  ;;  %v6945_v21 = vld [vmem:[#allocation7 + $0xc20] ss:$16 sps:$4 sm:$0xff]  }
 0x36b   :  { %4529 = vmatpush1.bf16.msra.mxu1 %v6870_v23  ;;  %4202 = vmatprep.subr.bf16.mxu0 %v6875_v39  ;;  %v6948_v23 = vld [vmem:[#allocation7 + $0xc28] ss:$16 sps:$4 sm:$0xff]   ;;  %v6953_v39 = vld [vmem:[#allocation7 + $0xc44] ss:$16 sps:$4 sm:$0xff]  }
 0x36c   :  { %4530 = vmatprep.subr.bf16.mxu1 %v6878_v24  ;;  %v6951_v24 = vld [vmem:[#allocation7 + $0xc40] ss:$16 sps:$4 sm:$0xff]  }
 0x36e   :  { %4203 = vmatpush1.bf16.msra.mxu0 %v6873_v25  ;;  %v6954_v25 = vld [vmem:[#allocation7 + $0xc48] ss:$16 sps:$4 sm:$0xff]  }
 0x36f   :  { %4531 = vmatpush1.bf16.msra.mxu1 %v6876_v58  ;;  %4204 = vmatprep.subr.bf16.mxu0 %v6881_v26  ;;  %v6959_v58 = vld [vmem:[#allocation7 + $0xc64] ss:$16 sps:$4 sm:$0xff]   ;;  %v6957_v26 = vld [vmem:[#allocation7 + $0xc60] ss:$16 sps:$4 sm:$0xff]  }
 0x370   :  { %4532 = vmatprep.subr.bf16.mxu1 %v6884_v7  ;;  %v6960_v7 = vld [vmem:[#allocation7 + $0xc68] ss:$16 sps:$4 sm:$0xff]  }
 0x372   :  { %4205 = vmatpush1.bf16.msra.mxu0 %v6879_v27  ;;  %v6965_v27 = vld [vmem:[#allocation7 + $0xc84] ss:$16 sps:$4 sm:$0xff]  }
 0x373   :  { %4533 = vmatpush1.bf16.msra.mxu1 %v6882_v28  ;;  %4206 = vmatprep.subr.bf16.mxu0 %v6887_v8  ;;  %v6968_v28 = vld [vmem:[#allocation7 + $0xc8c] ss:$16 sps:$4 sm:$0xff]   ;;  %v6963_v8 = vld [vmem:[#allocation7 + $0xc80] ss:$16 sps:$4 sm:$0xff]  }
 0x374   :  { %4534 = vmatprep.subr.bf16.mxu1 %v6890_v29  ;;  %v6966_v29 = vld [vmem:[#allocation7 + $0xc88] ss:$16 sps:$4 sm:$0xff]  }
 0x376   :  { %4207 = vmatpush1.bf16.msra.mxu0 %v6885_v30  ;;  %v6971_v30 = vld [vmem:[#allocation7 + $0xca4] ss:$16 sps:$4 sm:$0xff]  }
 0x377   :  { %4535 = vmatpush1.bf16.msra.mxu1 %v6888_v31  ;;  %4208 = vmatprep.subr.bf16.mxu0 %v6893_v32  ;;  %v6974_v31 = vld [vmem:[#allocation7 + $0xcac] ss:$16 sps:$4 sm:$0xff]   ;;  %v6969_v32 = vld [vmem:[#allocation7 + $0xca0] ss:$16 sps:$4 sm:$0xff]  }
 0x378   :  { %4536 = vmatprep.subr.bf16.mxu1 %v6896_v34  ;;  %v6972_v34 = vld [vmem:[#allocation7 + $0xca8] ss:$16 sps:$4 sm:$0xff]  }
 0x37a   :  { %4209 = vmatpush1.bf16.msra.mxu0 %v6891_v51  ;;  %v6977_v51 = vld [vmem:[#allocation7 + $0xcc4] ss:$16 sps:$4 sm:$0xff]  }
 0x37b   :  { %4537 = vmatpush1.bf16.msra.mxu1 %v6894_v35  ;;  %4210 = vmatprep.subr.bf16.mxu0 %v6899_v5  ;;  %v6980_v35 = vld [vmem:[#allocation7 + $0xccc] ss:$16 sps:$4 sm:$0xff]   ;;  %v6975_v5 = vld [vmem:[#allocation7 + $0xcc0] ss:$16 sps:$4 sm:$0xff]  }
 0x37c   :  { %4538 = vmatprep.subr.bf16.mxu1 %v6902_v10  ;;  %v6978_v10 = vld [vmem:[#allocation7 + $0xcc8] ss:$16 sps:$4 sm:$0xff]  }
 0x37e   :  { %4211 = vmatpush1.bf16.msra.mxu0 %v6897_v37  ;;  %v6983_v37 = vld [vmem:[#allocation7 + $0xce4] ss:$16 sps:$4 sm:$0xff]  }
 0x37f   :  { %4539 = vmatpush1.bf16.msra.mxu1 %v6900_v1  ;;  %4212 = vmatprep.subr.bf16.mxu0 %v6905_v2  ;;  %v6986_v1 = vld [vmem:[#allocation7 + $0xcec] ss:$16 sps:$4 sm:$0xff]   ;;  %v6981_v2 = vld [vmem:[#allocation7 + $0xce0] ss:$16 sps:$4 sm:$0xff]  }
 0x380   :  { %4540 = vmatprep.subr.bf16.mxu1 %v6908_v38  ;;  %v6984_v38 = vld [vmem:[#allocation7 + $0xce8] ss:$16 sps:$4 sm:$0xff]  }
 0x382   :  { %4213 = vmatpush1.bf16.msra.mxu0 %v6903_v40  ;;  %v6989_v40 = vld [vmem:[#allocation7 + $0xd04] ss:$16 sps:$4 sm:$0xff]  }
 0x383   :  { %4541 = vmatpush1.bf16.msra.mxu1 %v6906_v55  ;;  %4214 = vmatprep.subr.bf16.mxu0 %v6911_v45  ;;  %v6992_v55 = vld [vmem:[#allocation7 + $0xd0c] ss:$16 sps:$4 sm:$0xff]   ;;  %v6987_v45 = vld [vmem:[#allocation7 + $0xd00] ss:$16 sps:$4 sm:$0xff]  }
 0x384   :  { %4542 = vmatprep.subr.bf16.mxu1 %v6914_v41  ;;  %v6990_v41 = vld [vmem:[#allocation7 + $0xd08] ss:$16 sps:$4 sm:$0xff]  }
 0x386   :  { %4215 = vmatpush1.bf16.msra.mxu0 %v6909_v17  ;;  %v6995_v17 = vld [vmem:[#allocation7 + $0xd24] ss:$16 sps:$4 sm:$0xff]  }
 0x387   :  { %4543 = vmatpush1.bf16.msra.mxu1 %v6912_v44  ;;  %4216 = vmatprep.subr.bf16.mxu0 %v6917_v42  ;;  %v6998_v44 = vld [vmem:[#allocation7 + $0xd2c] ss:$16 sps:$4 sm:$0xff]   ;;  %v6993_v42 = vld [vmem:[#allocation7 + $0xd20] ss:$16 sps:$4 sm:$0xff]  }
 0x388   :  { %4544 = vmatprep.subr.bf16.mxu1 %v6920_v46  ;;  %v6996_v46 = vld [vmem:[#allocation7 + $0xd28] ss:$16 sps:$4 sm:$0xff]  }
 0x38a   :  { %4217 = vmatpush1.bf16.msra.mxu0 %v6915_v47  ;;  %v7001_v47 = vld [vmem:[#allocation7 + $0xd44] ss:$16 sps:$4 sm:$0xff]  }
 0x38b   :  { %4545 = vmatpush1.bf16.msra.mxu1 %v6918_v48  ;;  %4218 = vmatprep.subr.bf16.mxu0 %v6923_v49  ;;  %v7004_v48 = vld [vmem:[#allocation7 + $0xd4c] ss:$16 sps:$4 sm:$0xff]   ;;  %v6999_v49 = vld [vmem:[#allocation7 + $0xd40] ss:$16 sps:$4 sm:$0xff]  }
 0x38c   :  { %4546 = vmatprep.subr.bf16.mxu1 %v6926_v53  ;;  %v7002_v53 = vld [vmem:[#allocation7 + $0xd48] ss:$16 sps:$4 sm:$0xff]  }
 0x38e   :  { %4219 = vmatpush1.bf16.msra.mxu0 %v6921_v54  ;;  %v7007_v54 = vld [vmem:[#allocation7 + $0xd64] ss:$16 sps:$4 sm:$0xff]  }
 0x38f   :  { %4547 = vmatpush1.bf16.msra.mxu1 %v6924_v56  ;;  %4220 = vmatprep.subr.bf16.mxu0 %v6929_v59  ;;  %v7010_v56 = vld [vmem:[#allocation7 + $0xd6c] ss:$16 sps:$4 sm:$0xff]   ;;  %v7005_v59 = vld [vmem:[#allocation7 + $0xd60] ss:$16 sps:$4 sm:$0xff]  }
 0x390   :  { %4548 = vmatprep.subr.bf16.mxu1 %v6932_v60  ;;  %v7008_v60 = vld [vmem:[#allocation7 + $0xd68] ss:$16 sps:$4 sm:$0xff]  }
 0x392   :  { %4221 = vmatpush1.bf16.msra.mxu0 %v6927_v61  ;;  %v7013_v61 = vld [vmem:[#allocation7 + $0xd84] ss:$16 sps:$4 sm:$0xff]  }
 0x393   :  { %4549 = vmatpush1.bf16.msra.mxu1 %v6930_v62  ;;  %4222 = vmatprep.subr.bf16.mxu0 %v6935_v14  ;;  %v7016_v62 = vld [vmem:[#allocation7 + $0xd8c] ss:$16 sps:$4 sm:$0xff]   ;;  %v7011_v14 = vld [vmem:[#allocation7 + $0xd80] ss:$16 sps:$4 sm:$0xff]  }
 0x394   :  { %4550 = vmatprep.subr.bf16.mxu1 %v6938_v63  ;;  %v7014_v63 = vld [vmem:[#allocation7 + $0xd88] ss:$16 sps:$4 sm:$0xff]  }
 0x396   :  { %4223 = vmatpush1.bf16.msra.mxu0 %v6933_v11  ;;  %v7019_v11 = vld [vmem:[#allocation7 + $0xda4] ss:$16 sps:$4 sm:$0xff]  }
 0x397   :  { %4551 = vmatpush1.bf16.msra.mxu1 %v6936_v3  ;;  %4233 = vmatprep.subr.bf16.mxu0 %v6941_v12  ;;  %v7022_v3 = vld [vmem:[#allocation7 + $0xdac] ss:$16 sps:$4 sm:$0xff]   ;;  %v7017_v12 = vld [vmem:[#allocation7 + $0xda0] ss:$16 sps:$4 sm:$0xff]  }
 0x398   :  { %4561 = vmatprep.subr.bf16.mxu1 %v6944_v0  ;;  %v7020_v0 = vld [vmem:[#allocation7 + $0xda8] ss:$16 sps:$4 sm:$0xff]  }
 0x399   :  { %4225 = vmatmul.mubr.bf16.vlgmr.msra.gmra.mrb[0].mxu0 %v887_v36 }
 0x39a   :  { %4553 = vmatmul.mubr.bf16.vlgmr.msra.gmra.mrb[32].mxu1 %v887_v36  ;;  %4234 = vmatpush1.bf16.msra.mxu0 %v6939_v13  ;;  %v7025_v13 = vld [vmem:[#allocation7 + $0xdc4] ss:$16 sps:$4 sm:$0xff]   ;;  %v7028_v36 = vld [vmem:[#allocation7 + $0xdcc] ss:$16 sps:$4 sm:$0xff]  }
 0x39b   :  { %4265 = vmatprep.mubr.bf16.mxu0 %v890_v19  ;;  %4562 = vmatpush1.bf16.msra.mxu1 %v6942_v4  ;;  %v7023_v4 = vld [vmem:[#allocation7 + $0xdc0] ss:$16 sps:$4 sm:$0xff]  }
 0x39c   :  { %4593 = vmatprep.mubr.bf16.mxu1 %v890_v19  ;;  %4235 = vmatprep.subr.bf16.mxu0 %v6947_v16  ;;  %v7026_v16 = vld [vmem:[#allocation7 + $0xdc8] ss:$16 sps:$4 sm:$0xff]   ;;  %v7031_v19 = vld [vmem:[#allocation7 + $0xde4] ss:$16 sps:$4 sm:$0xff]  }
 0x39d   :  { %4563 = vmatprep.subr.bf16.mxu1 %v6950_v6  ;;  %v7034_v6 = vld [vmem:[#allocation7 + $0xdec] ss:$16 sps:$4 sm:$0xff]  }
 0x39e   :  { %4236 = vmatpush1.bf16.msra.mxu0 %v6945_v21  ;;  %v7029_v21 = vld [vmem:[#allocation7 + $0xde0] ss:$16 sps:$4 sm:$0xff]  }
 0x39f   :  { %4564 = vmatpush1.bf16.msra.mxu1 %v6948_v23  ;;  %4237 = vmatprep.subr.bf16.mxu0 %v6953_v39  ;;  %v7032_v23 = vld [vmem:[#allocation7 + $0xde8] ss:$16 sps:$4 sm:$0xff]   ;;  %v7037_v39 = vld [vmem:[#allocation7 + $0xe04] ss:$16 sps:$4 sm:$0xff]  }
 0x3a0   :  { %4565 = vmatprep.subr.bf16.mxu1 %v6956_v33  ;;  %v7040_v33 = vld [vmem:[#allocation7 + $0xe0c] ss:$16 sps:$4 sm:$0xff]  }
 0x3a2   :  { %4238 = vmatpush1.bf16.msra.mxu0 %v6951_v24  ;;  %v7035_v24 = vld [vmem:[#allocation7 + $0xe00] ss:$16 sps:$4 sm:$0xff]  }
 0x3a3   :  { %4566 = vmatpush1.bf16.msra.mxu1 %v6954_v25  ;;  %4239 = vmatprep.subr.bf16.mxu0 %v6959_v58  ;;  %v889_v25 = vpack.c.bf16 %v7966_v50, %v7966_v50  ;;  %v7038_v58 = vld [vmem:[#allocation7 + $0xe08] ss:$16 sps:$4 sm:$0xff]   ;;  %v7052_v50 = vld [vmem:[#allocation7 + $0xe4c] ss:$16 sps:$4 sm:$0xff]  }
 0x3a4   :  { %4567 = vmatprep.subr.bf16.mxu1 %v6962_v57  ;;  %v7043_v57 = vld [vmem:[#allocation7 + $0xe24] ss:$16 sps:$4 sm:$0xff]  }
 0x3a6   :  { %4240 = vmatpush1.bf16.msra.mxu0 %v6957_v26  ;;  %v892_v26 = vpack.c.bf16 %v7975_v20, %v7975_v20  ;;  %v7058_v20 = vld [vmem:[#allocation7 + $0xe6c] ss:$16 sps:$4 sm:$0xff]  }
 0x3a7   :  { %4568 = vmatpush1.bf16.msra.mxu1 %v6960_v7  ;;  %4241 = vmatprep.subr.bf16.mxu0 %v6965_v27  ;;  %v7046_v7 = vld [vmem:[#allocation7 + $0xe2c] ss:$16 sps:$4 sm:$0xff]   ;;  %v7041_v27 = vld [vmem:[#allocation7 + $0xe20] ss:$16 sps:$4 sm:$0xff]  }
 0x3a8   :  { %4569 = vmatprep.subr.bf16.mxu1 %v6968_v28  ;;  %v7044_v28 = vld [vmem:[#allocation7 + $0xe28] ss:$16 sps:$4 sm:$0xff]  }
 0x3aa   :  { %4242 = vmatpush1.bf16.msra.mxu0 %v6963_v8  ;;  %v7049_v8 = vld [vmem:[#allocation7 + $0xe44] ss:$16 sps:$4 sm:$0xff]  }
 0x3ab   :  { %4570 = vmatpush1.bf16.msra.mxu1 %v6966_v29  ;;  %4243 = vmatprep.subr.bf16.mxu0 %v6971_v30  ;;  %v7047_v29 = vld [vmem:[#allocation7 + $0xe40] ss:$16 sps:$4 sm:$0xff]   ;;  %v7050_v30 = vld [vmem:[#allocation7 + $0xe48] ss:$16 sps:$4 sm:$0xff]  }
 0x3ac   :  { %4571 = vmatprep.subr.bf16.mxu1 %v6974_v31  ;;  %v7055_v31 = vld [vmem:[#allocation7 + $0xe64] ss:$16 sps:$4 sm:$0xff]  }
 0x3ae   :  { %4244 = vmatpush1.bf16.msra.mxu0 %v6969_v32  ;;  %v7053_v32 = vld [vmem:[#allocation7 + $0xe60] ss:$16 sps:$4 sm:$0xff]  }
 0x3af   :  { %4572 = vmatpush1.bf16.msra.mxu1 %v6972_v34  ;;  %4245 = vmatprep.subr.bf16.mxu0 %v6977_v51  ;;  %v7056_v34 = vld [vmem:[#allocation7 + $0xe68] ss:$16 sps:$4 sm:$0xff]   ;;  %v7061_v51 = vld [vmem:[#allocation7 + $0xe84] ss:$16 sps:$4 sm:$0xff]  }
 0x3b0   :  { %4573 = vmatprep.subr.bf16.mxu1 %v6980_v35  ;;  %v7064_v35 = vld [vmem:[#allocation7 + $0xe8c] ss:$16 sps:$4 sm:$0xff]  }
 0x3b2   :  { %4246 = vmatpush1.bf16.msra.mxu0 %v6975_v5  ;;  %v7059_v5 = vld [vmem:[#allocation7 + $0xe80] ss:$16 sps:$4 sm:$0xff]  }
 0x3b3   :  { %4574 = vmatpush1.bf16.msra.mxu1 %v6978_v10  ;;  %4247 = vmatprep.subr.bf16.mxu0 %v6983_v37  ;;  %v7062_v10 = vld [vmem:[#allocation7 + $0xe88] ss:$16 sps:$4 sm:$0xff]   ;;  %v7067_v37 = vld [vmem:[#allocation7 + $0xea4] ss:$16 sps:$4 sm:$0xff]  }
 0x3b4   :  { %4575 = vmatprep.subr.bf16.mxu1 %v6986_v1  ;;  %v7070_v1 = vld [vmem:[#allocation7 + $0xeac] ss:$16 sps:$4 sm:$0xff]  }
 0x3b6   :  { %4248 = vmatpush1.bf16.msra.mxu0 %v6981_v2  ;;  %v7065_v2 = vld [vmem:[#allocation7 + $0xea0] ss:$16 sps:$4 sm:$0xff]  }
 0x3b7   :  { %4576 = vmatpush1.bf16.msra.mxu1 %v6984_v38  ;;  %4249 = vmatprep.subr.bf16.mxu0 %v6989_v40  ;;  %v7068_v38 = vld [vmem:[#allocation7 + $0xea8] ss:$16 sps:$4 sm:$0xff]   ;;  %v7073_v40 = vld [vmem:[#allocation7 + $0xec4] ss:$16 sps:$4 sm:$0xff]  }
 0x3b8   :  { %4577 = vmatprep.subr.bf16.mxu1 %v6992_v55  ;;  %v7076_v55 = vld [vmem:[#allocation7 + $0xecc] ss:$16 sps:$4 sm:$0xff]  }
 0x3ba   :  { %4250 = vmatpush1.bf16.msra.mxu0 %v6987_v45  ;;  %v7071_v45 = vld [vmem:[#allocation7 + $0xec0] ss:$16 sps:$4 sm:$0xff]  }
 0x3bb   :  { %4578 = vmatpush1.bf16.msra.mxu1 %v6990_v41  ;;  %4251 = vmatprep.subr.bf16.mxu0 %v6995_v17  ;;  %v7074_v41 = vld [vmem:[#allocation7 + $0xec8] ss:$16 sps:$4 sm:$0xff]   ;;  %v7079_v17 = vld [vmem:[#allocation7 + $0xee4] ss:$16 sps:$4 sm:$0xff]  }
 0x3bc   :  { %4579 = vmatprep.subr.bf16.mxu1 %v6998_v44  ;;  %v7082_v44 = vld [vmem:[#allocation7 + $0xeec] ss:$16 sps:$4 sm:$0xff]  }
 0x3be   :  { %4252 = vmatpush1.bf16.msra.mxu0 %v6993_v42  ;;  %v7077_v42 = vld [vmem:[#allocation7 + $0xee0] ss:$16 sps:$4 sm:$0xff]  }
 0x3bf   :  { %4580 = vmatpush1.bf16.msra.mxu1 %v6996_v46  ;;  %4253 = vmatprep.subr.bf16.mxu0 %v7001_v47  ;;  %v7080_v46 = vld [vmem:[#allocation7 + $0xee8] ss:$16 sps:$4 sm:$0xff]   ;;  %v7085_v47 = vld [vmem:[#allocation7 + $0xf04] ss:$16 sps:$4 sm:$0xff]  }
 0x3c0   :  { %4581 = vmatprep.subr.bf16.mxu1 %v7004_v48  ;;  %v7088_v48 = vld [vmem:[#allocation7 + $0xf0c] ss:$16 sps:$4 sm:$0xff]  }
 0x3c2   :  { %4254 = vmatpush1.bf16.msra.mxu0 %v6999_v49  ;;  %v7083_v49 = vld [vmem:[#allocation7 + $0xf00] ss:$16 sps:$4 sm:$0xff]  }
 0x3c3   :  { %4582 = vmatpush1.bf16.msra.mxu1 %v7002_v53  ;;  %4255 = vmatprep.subr.bf16.mxu0 %v7007_v54  ;;  %v7086_v53 = vld [vmem:[#allocation7 + $0xf08] ss:$16 sps:$4 sm:$0xff]   ;;  %v7091_v54 = vld [vmem:[#allocation7 + $0xf24] ss:$16 sps:$4 sm:$0xff]  }
 0x3c4   :  { %4583 = vmatprep.subr.bf16.mxu1 %v7010_v56  ;;  %v7094_v56 = vld [vmem:[#allocation7 + $0xf2c] ss:$16 sps:$4 sm:$0xff]  }
 0x3c6   :  { %4256 = vmatpush1.bf16.msra.mxu0 %v7005_v59  ;;  %v7089_v59 = vld [vmem:[#allocation7 + $0xf20] ss:$16 sps:$4 sm:$0xff]  }
 0x3c7   :  { %4584 = vmatpush1.bf16.msra.mxu1 %v7008_v60  ;;  %4257 = vmatprep.subr.bf16.mxu0 %v7013_v61  ;;  %v7092_v60 = vld [vmem:[#allocation7 + $0xf28] ss:$16 sps:$4 sm:$0xff]   ;;  %v7097_v61 = vld [vmem:[#allocation7 + $0xf44] ss:$16 sps:$4 sm:$0xff]  }
 0x3c8   :  { %4585 = vmatprep.subr.bf16.mxu1 %v7016_v62  ;;  %v7100_v62 = vld [vmem:[#allocation7 + $0xf4c] ss:$16 sps:$4 sm:$0xff]  }
 0x3ca   :  { %4258 = vmatpush1.bf16.msra.mxu0 %v7011_v14  ;;  %v7095_v14 = vld [vmem:[#allocation7 + $0xf40] ss:$16 sps:$4 sm:$0xff]  }
 0x3cb   :  { %4586 = vmatpush1.bf16.msra.mxu1 %v7014_v63  ;;  %4259 = vmatprep.subr.bf16.mxu0 %v7019_v11  ;;  %v7098_v63 = vld [vmem:[#allocation7 + $0xf48] ss:$16 sps:$4 sm:$0xff]   ;;  %v7103_v11 = vld [vmem:[#allocation7 + $0xf64] ss:$16 sps:$4 sm:$0xff]  }
 0x3cc   :  { %4587 = vmatprep.subr.bf16.mxu1 %v7022_v3  ;;  %v7106_v3 = vld [vmem:[#allocation7 + $0xf6c] ss:$16 sps:$4 sm:$0xff]  }
 0x3ce   :  { %4260 = vmatpush1.bf16.msra.mxu0 %v7017_v12  ;;  %v7101_v12 = vld [vmem:[#allocation7 + $0xf60] ss:$16 sps:$4 sm:$0xff]  }
 0x3cf   :  { %4588 = vmatpush1.bf16.msra.mxu1 %v7020_v0  ;;  %4261 = vmatprep.subr.bf16.mxu0 %v7025_v13  ;;  %v7104_v0 = vld [vmem:[#allocation7 + $0xf68] ss:$16 sps:$4 sm:$0xff]   ;;  %v7109_v13 = vld [vmem:[#allocation7 + $0xf84] ss:$16 sps:$4 sm:$0xff]  }
 0x3d0   :  { %4589 = vmatprep.subr.bf16.mxu1 %v7028_v36  ;;  %v7112_v36 = vld [vmem:[#allocation7 + $0xf8c] ss:$16 sps:$4 sm:$0xff]  }
 0x3d2   :  { %4262 = vmatpush1.bf16.msra.mxu0 %v7023_v4  ;;  %v7107_v4 = vld [vmem:[#allocation7 + $0xf80] ss:$16 sps:$4 sm:$0xff]  }
 0x3d3   :  { %4590 = vmatpush1.bf16.msra.mxu1 %v7026_v16  ;;  %4263 = vmatprep.subr.bf16.mxu0 %v7031_v19  ;;  %v7110_v16 = vld [vmem:[#allocation7 + $0xf88] ss:$16 sps:$4 sm:$0xff]   ;;  %v7115_v19 = vld [vmem:[#allocation7 + $0xfa4] ss:$16 sps:$4 sm:$0xff]  }
 0x3d4   :  { %4591 = vmatprep.subr.bf16.mxu1 %v7034_v6  ;;  %v7118_v6 = vld [vmem:[#allocation7 + $0xfac] ss:$16 sps:$4 sm:$0xff]  }
 0x3d6   :  { %4264 = vmatpush1.bf16.msra.mxu0 %v7029_v21  ;;  %v7113_v21 = vld [vmem:[#allocation7 + $0xfa0] ss:$16 sps:$4 sm:$0xff]  }
 0x3d7   :  { %4592 = vmatpush1.bf16.msra.mxu1 %v7032_v23  ;;  %4274 = vmatprep.subr.bf16.mxu0 %v7037_v39  ;;  %v7116_v23 = vld [vmem:[#allocation7 + $0xfa8] ss:$16 sps:$4 sm:$0xff]   ;;  %v7121_v39 = vld [vmem:[#allocation7 + $0xfc4] ss:$16 sps:$4 sm:$0xff]  }
 0x3d8   :  { %4602 = vmatprep.subr.bf16.mxu1 %v7040_v33  ;;  %v7124_v33 = vld [vmem:[#allocation7 + $0xfcc] ss:$16 sps:$4 sm:$0xff]  }
 0x3d9   :  { %4266 = vmatmul.mubr.bf16.vlgmr.msra.gmra.mrb[0].mxu0 %v889_v25 }
 0x3da   :  { %4594 = vmatmul.mubr.bf16.vlgmr.msra.gmra.mrb[32].mxu1 %v889_v25  ;;  %4275 = vmatpush1.bf16.msra.mxu0 %v7035_v24  ;;  %v7119_v24 = vld [vmem:[#allocation7 + $0xfc0] ss:$16 sps:$4 sm:$0xff]   ;;  %v7122_v25 = vld [vmem:[#allocation7 + $0xfc8] ss:$16 sps:$4 sm:$0xff]  }
 0x3db   :  { %4306 = vmatprep.mubr.bf16.mxu0 %v892_v26  ;;  %4603 = vmatpush1.bf16.msra.mxu1 %v7038_v58  ;;  %v7127_v58 = vld [vmem:[#allocation7 + $0xfe4] ss:$16 sps:$4 sm:$0xff]  }
 0x3dc   :  { %4634 = vmatprep.mubr.bf16.mxu1 %v892_v26  ;;  %4276 = vmatprep.subr.bf16.mxu0 %v7043_v57  ;;  %v7130_v57 = vld [vmem:[#allocation7 + $0xfec] ss:$16 sps:$4 sm:$0xff]   ;;  %v7125_v26 = vld [vmem:[#allocation7 + $0xfe0] ss:$16 sps:$4 sm:$0xff]  }
 0x3dd   :  { %4604 = vmatprep.subr.bf16.mxu1 %v7046_v7  ;;  %v7128_v7 = vld [vmem:[#allocation7 + $0xfe8] ss:$16 sps:$4 sm:$0xff]  }
 0x3de   :  { %4277 = vmatpush1.bf16.msra.mxu0 %v7041_v27  ;;  %v7133_v27 = vld [vmem:[#allocation13 + $0x4] ss:$8 sps:$4 sm:$0xff]  }
 0x3df   :  { %4605 = vmatpush1.bf16.msra.mxu1 %v7044_v28  ;;  %4278 = vmatprep.subr.bf16.mxu0 %v7049_v8  ;;  %v7131_v28 = vld [vmem:[#allocation13] ss:$8 sps:$4 sm:$0xff]   ;;  %v891_v8 = vpack.c.bf16 %v7972_v15, %v7972_v15  ;;  %v7148_v15 = vld [vmem:[#allocation13 + $0x54] ss:$8 sps:$4 sm:$0xff]  }
 0x3e0   :  { %4606 = vmatprep.subr.bf16.mxu1 %v7052_v50  ;;  %v7136_v50 = vld [vmem:[#allocation13 + $0x14] ss:$8 sps:$4 sm:$0xff]  }
 0x3e2   :  { %4279 = vmatpush1.bf16.msra.mxu0 %v7047_v29  ;;  %v7134_v29 = vld [vmem:[#allocation13 + $0x10] ss:$8 sps:$4 sm:$0xff]  }
 0x3e3   :  { %4607 = vmatpush1.bf16.msra.mxu1 %v7050_v30  ;;  %4280 = vmatprep.subr.bf16.mxu0 %v7055_v31  ;;  %v7139_v30 = vld [vmem:[#allocation13 + $0x24] ss:$8 sps:$4 sm:$0xff]   ;;  %v7137_v31 = vld [vmem:[#allocation13 + $0x20] ss:$8 sps:$4 sm:$0xff]  }
 0x3e4   :  { %4608 = vmatprep.subr.bf16.mxu1 %v7058_v20  ;;  %v7142_v20 = vld [vmem:[#allocation13 + $0x34] ss:$8 sps:$4 sm:$0xff]  }
 0x3e6   :  { %4281 = vmatpush1.bf16.msra.mxu0 %v7053_v32  ;;  %v7140_v32 = vld [vmem:[#allocation13 + $0x30] ss:$8 sps:$4 sm:$0xff]  }
 0x3e7   :  { %4609 = vmatpush1.bf16.msra.mxu1 %v7056_v34  ;;  %4282 = vmatprep.subr.bf16.mxu0 %v7061_v51  ;;  %v7145_v34 = vld [vmem:[#allocation13 + $0x44] ss:$8 sps:$4 sm:$0xff]   ;;  %v7143_v51 = vld [vmem:[#allocation13 + $0x40] ss:$8 sps:$4 sm:$0xff]  }
 0x3e8   :  { %4610 = vmatprep.subr.bf16.mxu1 %v7064_v35  ;;  %v7146_v35 = vld [vmem:[#allocation13 + $0x50] ss:$8 sps:$4 sm:$0xff]  }
 0x3ea   :  { %4283 = vmatpush1.bf16.msra.mxu0 %v7059_v5  ;;  %v7151_v5 = vld [vmem:[#allocation13 + $0x64] ss:$8 sps:$4 sm:$0xff]  }
 0x3eb   :  { %4611 = vmatpush1.bf16.msra.mxu1 %v7062_v10  ;;  %4284 = vmatprep.subr.bf16.mxu0 %v7067_v37  ;;  %v7149_v10 = vld [vmem:[#allocation13 + $0x60] ss:$8 sps:$4 sm:$0xff]   ;;  %v7154_v37 = vld [vmem:[#allocation13 + $0x74] ss:$8 sps:$4 sm:$0xff]  }
 0x3ec   :  { %4612 = vmatprep.subr.bf16.mxu1 %v7070_v1  ;;  %v7152_v1 = vld [vmem:[#allocation13 + $0x70] ss:$8 sps:$4 sm:$0xff]  }
 0x3ee   :  { %4285 = vmatpush1.bf16.msra.mxu0 %v7065_v2  ;;  %v7157_v2 = vld [vmem:[#allocation13 + $0x84] ss:$8 sps:$4 sm:$0xff]  }
 0x3ef   :  { %4613 = vmatpush1.bf16.msra.mxu1 %v7068_v38  ;;  %4286 = vmatprep.subr.bf16.mxu0 %v7073_v40  ;;  %v7155_v38 = vld [vmem:[#allocation13 + $0x80] ss:$8 sps:$4 sm:$0xff]   ;;  %v7160_v40 = vld [vmem:[#allocation13 + $0x94] ss:$8 sps:$4 sm:$0xff]  }
 0x3f0   :  { %4614 = vmatprep.subr.bf16.mxu1 %v7076_v55  ;;  %v7158_v55 = vld [vmem:[#allocation13 + $0x90] ss:$8 sps:$4 sm:$0xff]  }
 0x3f2   :  { %4287 = vmatpush1.bf16.msra.mxu0 %v7071_v45  ;;  %v7163_v45 = vld [vmem:[#allocation13 + $0xa4] ss:$8 sps:$4 sm:$0xff]  }
 0x3f3   :  { %4615 = vmatpush1.bf16.msra.mxu1 %v7074_v41  ;;  %4288 = vmatprep.subr.bf16.mxu0 %v7079_v17  ;;  %v7161_v41 = vld [vmem:[#allocation13 + $0xa0] ss:$8 sps:$4 sm:$0xff]   ;;  %v7166_v17 = vld [vmem:[#allocation13 + $0xb4] ss:$8 sps:$4 sm:$0xff]  }
 0x3f4   :  { %4616 = vmatprep.subr.bf16.mxu1 %v7082_v44  ;;  %v7164_v44 = vld [vmem:[#allocation13 + $0xb0] ss:$8 sps:$4 sm:$0xff]  }
 0x3f6   :  { %4289 = vmatpush1.bf16.msra.mxu0 %v7077_v42  ;;  %v7169_v42 = vld [vmem:[#allocation13 + $0xc4] ss:$8 sps:$4 sm:$0xff]  }
 0x3f7   :  { %4617 = vmatpush1.bf16.msra.mxu1 %v7080_v46  ;;  %4290 = vmatprep.subr.bf16.mxu0 %v7085_v47  ;;  %v7167_v46 = vld [vmem:[#allocation13 + $0xc0] ss:$8 sps:$4 sm:$0xff]   ;;  %v7170_v47 = vld [vmem:[#allocation13 + $0xd0] ss:$8 sps:$4 sm:$0xff]  }
 0x3f8   :  { %4618 = vmatprep.subr.bf16.mxu1 %v7088_v48  ;;  %v7172_v48 = vld [vmem:[#allocation13 + $0xd4] ss:$8 sps:$4 sm:$0xff]  }
 0x3fa   :  { %4291 = vmatpush1.bf16.msra.mxu0 %v7083_v49  ;;  %v7175_v49 = vld [vmem:[#allocation13 + $0xe4] ss:$8 sps:$4 sm:$0xff]  }
 0x3fb   :  { %4619 = vmatpush1.bf16.msra.mxu1 %v7086_v53  ;;  %4292 = vmatprep.subr.bf16.mxu0 %v7091_v54  ;;  %v7173_v53 = vld [vmem:[#allocation13 + $0xe0] ss:$8 sps:$4 sm:$0xff]   ;;  %v7178_v54 = vld [vmem:[#allocation13 + $0xf4] ss:$8 sps:$4 sm:$0xff]  }
 0x3fc   :  { %4620 = vmatprep.subr.bf16.mxu1 %v7094_v56  ;;  %v7176_v56 = vld [vmem:[#allocation13 + $0xf0] ss:$8 sps:$4 sm:$0xff]  }
 0x3fe   :  { %4293 = vmatpush1.bf16.msra.mxu0 %v7089_v59  ;;  %v7181_v59 = vld [vmem:[#allocation13 + $0x104] ss:$8 sps:$4 sm:$0xff]  }
 0x3ff   :  { %4621 = vmatpush1.bf16.msra.mxu1 %v7092_v60  ;;  %4294 = vmatprep.subr.bf16.mxu0 %v7097_v61  ;;  %v7227_v60 = vld [vmem:[#allocation19] ss:$8 sps:$4 sm:$0xff]   ;;  %v7229_v61 = vld [vmem:[#allocation19 + $0x4] ss:$8 sps:$4 sm:$0xff]  }
 0x400   :  { %4622 = vmatprep.subr.bf16.mxu1 %v7100_v62  ;;  %v7232_v62 = vld [vmem:[#allocation19 + $0x14] ss:$8 sps:$4 sm:$0xff]  }
 0x402   :  { %4295 = vmatpush1.bf16.msra.mxu0 %v7095_v14  ;;  %v7230_v14 = vld [vmem:[#allocation19 + $0x10] ss:$8 sps:$4 sm:$0xff]  }
 0x403   :  { %4623 = vmatpush1.bf16.msra.mxu1 %v7098_v63  ;;  %4296 = vmatprep.subr.bf16.mxu0 %v7103_v11  ;;  %v7235_v63 = vld [vmem:[#allocation19 + $0x24] ss:$8 sps:$4 sm:$0xff]   ;;  %v7233_v11 = vld [vmem:[#allocation19 + $0x20] ss:$8 sps:$4 sm:$0xff]  }
 0x404   :  { %4624 = vmatprep.subr.bf16.mxu1 %v7106_v3  ;;  %v7238_v3 = vld [vmem:[#allocation19 + $0x34] ss:$8 sps:$4 sm:$0xff]  }
 0x406   :  { %4297 = vmatpush1.bf16.msra.mxu0 %v7101_v12  ;;  %v1405_v12 = vld [vmem:[#allocation8] sm:$0xf] }
 0x407   :  { %4625 = vmatpush1.bf16.msra.mxu1 %v7104_v0  ;;  %4298 = vmatprep.subr.bf16.mxu0 %v7109_v13  ;;  %v7236_v0 = vld [vmem:[#allocation19 + $0x30] ss:$8 sps:$4 sm:$0xff]   ;;  %v1410_v13 = vrot.slane %v1405_v12, %v7924_v9 }
 0x408   :  { %4626 = vmatprep.subr.bf16.mxu1 %v7112_v36  ;;  %v7241_v36 = vld [vmem:[#allocation19 + $0x44] ss:$8 sps:$4 sm:$0xff]  }
 0x40a   :  { %4299 = vmatpush1.bf16.msra.mxu0 %v7107_v4  ;;  %v1418_v4 = vrot.slane %v1405_v12, %v7955_v22 }
 0x40b   :  { %4627 = vmatpush1.bf16.msra.mxu1 %v7110_v16  ;;  %4300 = vmatprep.subr.bf16.mxu0 %v7115_v19  ;;  %v1414_v16 = vrot.slane %v1405_v12, %v7929_v52  ;;  %v1422_v19 = vrot.slane %v1405_v12, %v7936_v18 }
 0x40c   :  { %4628 = vmatprep.subr.bf16.mxu1 %v7118_v6 }
 0x40e   :  { %4301 = vmatpush1.bf16.msra.mxu0 %v7113_v21  ;;  %v7239_v21 = vld [vmem:[#allocation19 + $0x40] ss:$8 sps:$4 sm:$0xff]  }
 0x40f   :  { %4629 = vmatpush1.bf16.msra.mxu1 %v7116_v23  ;;  %4302 = vmatprep.subr.bf16.mxu0 %v7121_v39 }
 0x410   :  { %4630 = vmatprep.subr.bf16.mxu1 %v7124_v33 }
 0x412   :  { %4303 = vmatpush1.bf16.msra.mxu0 %v7119_v24 }
 0x413   :  { %4631 = vmatpush1.bf16.msra.mxu1 %v7122_v25  ;;  %4304 = vmatprep.subr.bf16.mxu0 %v7127_v58 }
 0x414   :  { %4632 = vmatprep.subr.bf16.mxu1 %v7130_v57 }
 0x416   :  { %4305 = vmatpush1.bf16.msra.mxu0 %v7125_v26 }
 0x417   :  { %4633 = vmatpush1.bf16.msra.mxu1 %v7128_v7  ;;  %5223 = vmatprep.subr.bf16.mxu0 %v7133_v27 }
 0x418   :  { %5587 = vmatprep.subr.bf16.mxu1 %v7229_v61 }
 0x419   :  { %4307 = vmatmul.mubr.bf16.vlgmr.msra.gmra.mrb[0].mxu0 %v891_v8 }
 0x41a   :  { %4635 = vmatmul.mubr.bf16.vlgmr.msra.gmra.mrb[32].mxu1 %v891_v8  ;;  %5224 = vmatpush1.bf16.msra.mxu0 %v7131_v28 }
 0x41b   :  { %5225 = vmatprep.subr.bf16.mxu0 %v7136_v50  ;;  %5588 = vmatpush1.bf16.msra.mxu1 %v7227_v60 }
 0x41c   :  { %5589 = vmatprep.subr.bf16.mxu1 %v7232_v62 }
 0x41e   :  { %5226 = vmatpush1.bf16.msra.mxu0 %v7134_v29 }
 0x41f   :  { %5227 = vmatprep.subr.bf16.mxu0 %v7139_v30  ;;  %5590 = vmatpush1.bf16.msra.mxu1 %v7230_v14 }
 0x420   :  { %5591 = vmatprep.subr.bf16.mxu1 %v7235_v63 }
 0x422   :  { %5228 = vmatpush1.bf16.msra.mxu0 %v7137_v31 }
 0x423   :  { %5229 = vmatprep.subr.bf16.mxu0 %v7142_v20  ;;  %5592 = vmatpush1.bf16.msra.mxu1 %v7233_v11 }
 0x424   :  { %5593 = vmatprep.subr.bf16.mxu1 %v7238_v3 }
 0x426   :  { %5230 = vmatpush1.bf16.msra.mxu0 %v7140_v32 }
 0x427   :  { %5231 = vmatprep.subr.bf16.mxu0 %v7145_v34  ;;  %5594 = vmatpush1.bf16.msra.mxu1 %v7236_v0 }
 0x428   :  { %5595 = vmatprep.subr.bf16.mxu1 %v7241_v36 }
 0x42a   :  { %5232 = vmatpush1.bf16.msra.mxu0 %v7143_v51 }
 0x42b   :  { %5233 = vmatprep.subr.bf16.mxu0 %v7148_v15  ;;  %5596 = vmatpush1.bf16.msra.mxu1 %v7239_v21 }
 0x42e   :  { %5234 = vmatpush1.bf16.msra.mxu0 %v7146_v35 }
 0x42f   :  { %5235 = vmatprep.subr.bf16.mxu0 %v7151_v5 }
 0x432   :  { %5236 = vmatpush1.bf16.msra.mxu0 %v7149_v10  ;;  %v8039_v10 = vld [vmem:[#allocation10] sm:$0xf] }
 0x433   :  { %5237 = vmatprep.subr.bf16.mxu0 %v7154_v37 }
 0x436   :  { %5238 = vmatpush1.bf16.msra.mxu0 %v7152_v1 }
 0x437   :  { %5239 = vmatprep.subr.bf16.mxu0 %v7157_v2 }
 0x43a   :  { %5240 = vmatpush1.bf16.msra.mxu0 %v7155_v38 }
 0x43b   :  { %5241 = vmatprep.subr.bf16.mxu0 %v7160_v40 }
 0x43e   :  { %5242 = vmatpush1.bf16.msra.mxu0 %v7158_v55 }
 0x43f   :  { %5243 = vmatprep.subr.bf16.mxu0 %v7163_v45 }
 0x442   :  { %5244 = vmatpush1.bf16.msra.mxu0 %v7161_v41 }
 0x443   :  { %5245 = vmatprep.subr.bf16.mxu0 %v7166_v17 }
 0x446   :  { %5246 = vmatpush1.bf16.msra.mxu0 %v7164_v44 }
 0x447   :  { %5247 = vmatprep.subr.bf16.mxu0 %v7169_v42 }
 0x44a   :  { %5248 = vmatpush1.bf16.msra.mxu0 %v7167_v46 }
 0x44b   :  { %5249 = vmatprep.subr.bf16.mxu0 %v7172_v48  ;;  %v4772_v48 = vrot.slane %v8039_v10, %v7955_v22 }
 0x44e   :  { %5250 = vmatpush1.bf16.msra.mxu0 %v7170_v47 }
 0x44f   :  { %5251 = vmatprep.subr.bf16.mxu0 %v7175_v49 }
 0x452   :  { %5252 = vmatpush1.bf16.msra.mxu0 %v7173_v53 }
 0x453   :  { %5253 = vmatprep.subr.bf16.mxu0 %v7178_v54 }
 0x456   :  { %5254 = vmatpush1.bf16.msra.mxu0 %v7176_v56 }
 0x457   :  { %5264 = vmatprep.subr.bf16.mxu0 %v7181_v59 }
 0x4ec   :  { %v4308_v6 = vpop.f32.mrb[0].mxu0 }
 0x4ed   :  { %v6267_v23 = vadd.f32 %v4308_v6, %v1410_v13  ;;  %v4636_v39 = vpop.f32.mrb[32].mxu1  ;;  %v4310_v33 = vpop.f32.mrb[1].mxu0 }
 0x4ee   :  { %v6269_v24 = vadd.f32 %v4636_v39, %v1418_v4  ;;  %v6268_v25 = vadd.f32 %v4310_v33, %v1414_v16  ;;  %v4638_v58 = vpop.f32.mrb[33].mxu1  ;;  %v4312_v57 = vpop.f32.mrb[2].mxu0 }
 0x4ef   :  { %v4643_v26 = vmax.f32 %v6267_v23, 0.0  ;;  %v6270_v7 = vadd.f32 %v4638_v58, %v1422_v19  ;;  %v4640_v27 = vpop.f32.mrb[34].mxu1  ;;  %v4313_v28 = vpop.f32.mrb[3].mxu0 }
 0x4f0   :  { %v4645_v8 = vmax.f32 %v6269_v24, 0.0  ;;  %v4644_v50 = vmax.f32 %v6268_v25, 0.0  ;;  %v4641_v29 = vpop.f32.mrb[35].mxu1 }
 0x4f1   :  { %v8020_v30 = vsel %vm4652_vm10, %v4643_v26, 0.0  ;;  %v4646_v31 = vmax.f32 %v6270_v7, 0.0 }
 0x4f2   :  { %v4679_v20 = vsel %vm4652_vm10, %v8020_v30, 0.0  ;;  %v8027_v32 = vsel %vm4652_vm10, %v4645_v8, 0.0  ;;  %v8031_v34 = vsel %vm4652_vm10, %v4644_v50, 0.0 }
 0x4f3   :  { %v4683_v51 = vrot.slane %v4679_v20, 4  ;;  %v4711_v15 = vmul.f32 %v4679_v20, %v4679_v20  ;;  %v4681_v35 = vsel %vm4652_vm10, %v8027_v32, 0.0  ;;  %v4680_v5 = vsel %vm4652_vm10, %v8031_v34, 0.0 }
 0x4f4   :  { %v4695_v37 = vrot.slane %v4681_v35, 4  ;;  %v4713_v1 = vmul.f32 %v4681_v35, %v4681_v35  ;;  %v4689_v2 = vrot.slane %v4680_v5, 4  ;;  %v4712_v38 = vmul.f32 %v4680_v5, %v4680_v5 }
 0x4f5   :  { %v4684_v40 = vadd.f32 %v4683_v51, %v4679_v20  ;;  %v4715_v55 = vrot.slane %v4711_v15, 4  ;;  %v8043_v45 = vsel %vm4652_vm10, %v4646_v31, 0.0 }
 0x4f6   :  { %v4696_v41 = vadd.f32 %v4695_v37, %v4681_v35  ;;  %v4727_v17 = vrot.slane %v4713_v1, 4  ;;  %v4690_v44 = vadd.f32 %v4689_v2, %v4680_v5  ;;  %v4721_v42 = vrot.slane %v4712_v38, 4 }
 0x4f7   :  { %v4685_v46 = vrot.slane %v4684_v40, 2  ;;  %v4716_v47 = vadd.f32 %v4715_v55, %v4711_v15  ;;  %v4682_v49 = vsel %vm4652_vm10, %v8043_v45, 0.0 }
 0x4f8   :  { %v4697_v53 = vrot.slane %v4696_v41, 2  ;;  %v4728_v54 = vadd.f32 %v4727_v17, %v4713_v1  ;;  %v4691_v56 = vrot.slane %v4690_v44, 2  ;;  %v4722_v59 = vadd.f32 %v4721_v42, %v4712_v38 }
 0x4f9   :  { %v4686_v60 = vadd.f32 %v4685_v46, %v4684_v40  ;;  %v4717_v61 = vrot.slane %v4716_v47, 2  ;;  %v4701_v62 = vrot.slane %v4682_v49, 4  ;;  %v4714_v14 = vmul.f32 %v4682_v49, %v4682_v49 }
 0x4fa   :  { %v4698_v63 = vadd.f32 %v4697_v53, %v4696_v41  ;;  %v4729_v11 = vrot.slane %v4728_v54, 2  ;;  %v4692_v3 = vadd.f32 %v4691_v56, %v4690_v44  ;;  %v4723_v12 = vrot.slane %v4722_v59, 2 }
 0x4fb   :  { %v4687_v0 = vrot.slane %v4686_v60, 1  ;;  %v4718_v13 = vadd.f32 %v4717_v61, %v4716_v47  ;;  %v4702_v36 = vadd.f32 %v4701_v62, %v4682_v49  ;;  %v4733_v4 = vrot.slane %v4714_v14, 4 }
 0x4fc   :  { %v4699_v16 = vrot.slane %v4698_v63, 1  ;;  %v4730_v19 = vadd.f32 %v4729_v11, %v4728_v54  ;;  %v4693_v6 = vrot.slane %v4692_v3, 1  ;;  %v4724_v21 = vadd.f32 %v4723_v12, %v4722_v59 }
 0x4fd   :  { %v4688_v23 = vadd.f32 %v4687_v0, %v4686_v60  ;;  %v4719_v39 = vrot.slane %v4718_v13, 1  ;;  %v4703_v33 = vrot.slane %v4702_v36, 2  ;;  %v4734_v24 = vadd.f32 %v4733_v4, %v4714_v14 }
 0x4fe   :  { %v4700_v25 = vadd.f32 %v4699_v16, %v4698_v63  ;;  %v4731_v58 = vrot.slane %v4730_v19, 1  ;;  %v4694_v57 = vadd.f32 %v4693_v6, %v4692_v3  ;;  %v4725_v26 = vrot.slane %v4724_v21, 1 }
 0x4ff   :  { %v4707_v7 = vmul.f32 0.5, %v4688_v23  ;;  %v4720_v27 = vadd.f32 %v4719_v39, %v4718_v13  ;;  %v4704_v28 = vadd.f32 %v4703_v33, %v4702_v36  ;;  %v4735_v8 = vrot.slane %v4734_v24, 2  ;;  %v4797_v13 = vld [vmem:[#allocation11] sm:$0xf] }
 0x500   :  { %v4709_v50 = vmul.f32 0.5, %v4700_v25  ;;  %v4732_v29 = vadd.f32 %v4731_v58, %v4730_v19  ;;  %v4708_v31 = vmul.f32 0.5, %v4694_v57  ;;  %v4726_v20 = vadd.f32 %v4725_v26, %v4724_v21 }
 0x501   :  { %v4739_v51 = vmul.f32 0.5, %v4720_v27  ;;  %v4743_v15 = vmul.f32 %v4707_v7, %v4707_v7  ;;  %v4705_v35 = vrot.slane %v4704_v28, 1  ;;  %v4736_v44 = vadd.f32 %v4735_v8, %v4734_v24  ;;  %v7179_v27 = vld [vmem:[#allocation13 + $0x100] ss:$8 sps:$4 sm:$0xff]  }
 0x502   :  { %v4741_v5 = vmul.f32 0.5, %v4732_v29  ;;  %v4745_v37 = vmul.f32 %v4709_v50, %v4709_v50  ;;  %v4758_v1 = vsub.f32 %v8027_v32, %v4709_v50  ;;  %v4740_v2 = vmul.f32 0.5, %v4726_v20  ;;  %v7184_v50 = vld [vmem:[#allocation13 + $0x114] ss:$8 sps:$4 sm:$0xff]  }
 0x503   :  { %v4747_v38 = vsub.f32 %v4739_v51, %v4743_v15  ;;  %v4744_v40 = vmul.f32 %v4708_v31, %v4708_v31  ;;  %v4706_v17 = vadd.f32 %v4705_v35, %v4704_v28  ;;  %v4737_v53 = vrot.slane %v4736_v44, 1  ;;  %v7185_v15 = vld [vmem:[#allocation13 + $0x120] ss:$8 sps:$4 sm:$0xff]   ;;  %v7190_v35 = vld [vmem:[#allocation13 + $0x134] ss:$8 sps:$4 sm:$0xff]  }
 0x504   :  { %v4749_v55 = vsub.f32 %v4741_v5, %v4745_v37  ;;  %v4783_v41 = vmul.f32 %v4772_v48, %v4758_v1  ;;  %v4756_v48 = vsub.f32 %v8020_v30, %v4707_v7  ;;  %v4764_v63 = vrot.slane %v8039_v10, %v7924_v9  ;;  %v7188_v5 = vld [vmem:[#allocation13 + $0x130] ss:$8 sps:$4 sm:$0xff]   ;;  %v7191_v37 = vld [vmem:[#allocation13 + $0x140] ss:$8 sps:$4 sm:$0xff]   ;;  %v7196_v1 = vld [vmem:[#allocation13 + $0x154] ss:$8 sps:$4 sm:$0xff]  }
 0x505   :  { %v4751_v42 = vmax.f32 %v4747_v38, 0.0  ;;  %v4748_v46 = vsub.f32 %v4740_v2, %v4744_v40  ;;  %v4710_v49 = vmul.f32 0.5, %v4706_v17  ;;  %v4738_v60 = vadd.f32 %v4737_v53, %v4736_v44  ;;  %v7194_v2 = vld [vmem:[#allocation13 + $0x150] ss:$8 sps:$4 sm:$0xff]   ;;  %v7199_v38 = vld [vmem:[#allocation13 + $0x164] ss:$8 sps:$4 sm:$0xff]  }
 0x506   :  { %v4753_v47 = vmax.f32 %v4749_v55, 0.0  ;;  %v4757_v3 = vsub.f32 %v8031_v34, %v4708_v31  ;;  %v4768_v12 = vrot.slane %v8039_v10, %v7929_v52  ;;  %v4781_v36 = vmul.f32 %v4764_v63, %v4756_v48  ;;  %v7197_v40 = vld [vmem:[#allocation13 + $0x160] ss:$8 sps:$4 sm:$0xff]   ;;  %v7202_v55 = vld [vmem:[#allocation13 + $0x174] ss:$8 sps:$4 sm:$0xff]  }
 0x507   :  { %v4785_v54 = vadd.f32 1e-05, %v4751_v42  ;;  %v4752_v56 = vmax.f32 %v4748_v46, 0.0  ;;  %v4746_v61 = vmul.f32 %v4710_v49, %v4710_v49  ;;  %v4742_v32 = vmul.f32 0.5, %v4738_v60  ;;  %v7205_v17 = vld [vmem:[#allocation13 + $0x184] ss:$8 sps:$4 sm:$0xff]  }
 0x508   :  { %v4787_v59 = vadd.f32 1e-05, %v4753_v47  ;;  %v4802_v16 = vrot.slane %v4797_v13, %v7924_v9  ;;  %v4810_v19 = vrot.slane %v4797_v13, %v7955_v22  ;;  %v4782_v21 = vmul.f32 %v4768_v12, %v4757_v3  ;;  %v7203_v44 = vld [vmem:[#allocation13 + $0x180] ss:$8 sps:$4 sm:$0xff]   ;;  %v7208_v42 = vld [vmem:[#allocation13 + $0x194] ss:$8 sps:$4 sm:$0xff]  }
 0x509   :  { %7275 = vrsqrt.f32 %v4785_v54  ;;  %v4786_v62 = vadd.f32 1e-05, %v4752_v56  ;;  %v4750_v14 = vsub.f32 %v4742_v32, %v4746_v61  ;;  %v4806_v23 = vrot.slane %v4797_v13, %v7929_v52  ;;  %v7206_v46 = vld [vmem:[#allocation13 + $0x190] ss:$8 sps:$4 sm:$0xff]   ;;  %v7211_v47 = vld [vmem:[#allocation13 + $0x1a4] ss:$8 sps:$4 sm:$0xff]  }
 0x50a   :  { %7277 = vrsqrt.f32 %v4787_v59  ;;  %v4759_v24 = vsub.f32 %v8043_v45, %v4710_v49  ;;  %v4776_v25 = vrot.slane %v8039_v10, %v7936_v18  ;;  %v4814_v8 = vrot.slane %v4797_v13, %v7936_v18  ;;  %v7182_v45 = vld [vmem:[#allocation13 + $0x110] ss:$8 sps:$4 sm:$0xff]   ;;  %v7187_v10 = vld [vmem:[#allocation13 + $0x124] ss:$8 sps:$4 sm:$0xff]   ;;  %v7209_v49 = vld [vmem:[#allocation13 + $0x1a0] ss:$8 sps:$4 sm:$0xff]  }
 0x50b   :  { %7279 = vrsqrt.f32 %v4786_v62  ;;  %v4754_v11 = vmax.f32 %v4750_v14, 0.0  ;;  %v7193_v18 = vld [vmem:[#allocation13 + $0x144] ss:$8 sps:$4 sm:$0xff]   ;;  %v7214_v53 = vld [vmem:[#allocation13 + $0x1b4] ss:$8 sps:$4 sm:$0xff]  }
 0x50c   :  { %v4784_v22 = vmul.f32 %v4776_v25, %v4759_v24  ;;  %v7212_v54 = vld [vmem:[#allocation13 + $0x1b0] ss:$8 sps:$4 sm:$0xff]   ;;  %v7217_v56 = vld [vmem:[#allocation13 + $0x1c4] ss:$8 sps:$4 sm:$0xff]   ;;  %v7215_v59 = vld [vmem:[#allocation13 + $0x1c0] ss:$8 sps:$4 sm:$0xff]  }
 0x50d   :  { %v4788_v0 = vadd.f32 1e-05, %v4754_v11  ;;  %v7220_v60 = vld [vmem:[#allocation13 + $0x1d4] ss:$8 sps:$4 sm:$0xff]   ;;  %v7218_v61 = vld [vmem:[#allocation13 + $0x1d0] ss:$8 sps:$4 sm:$0xff]  }
 0x50e   :  { %v7223_v62 = vld [vmem:[#allocation13 + $0x1e4] ss:$8 sps:$4 sm:$0xff]   ;;  %v7221_v32 = vld [vmem:[#allocation13 + $0x1e0] ss:$8 sps:$4 sm:$0xff]   ;;  %v7226_v14 = vld [vmem:[#allocation13 + $0x1f4] ss:$8 sps:$4 sm:$0xff]  }
 0x50f   :  { %7281 = vrsqrt.f32 %v4788_v0  ;;  %v7224_v48 = vld [vmem:[#allocation13 + $0x1f0] ss:$8 sps:$4 sm:$0xff]  }
 0x510   :  { %v7244_v11 = vld [vmem:[#allocation19 + $0x54] ss:$8 sps:$4 sm:$0xff]   ;;  %v7242_v3 = vld [vmem:[#allocation19 + $0x50] ss:$8 sps:$4 sm:$0xff]   ;;  %v7247_v12 = vld [vmem:[#allocation19 + $0x64] ss:$8 sps:$4 sm:$0xff]  }
 0x511   :  { %5597 = vmatprep.subr.bf16.mxu1 %v7244_v11  ;;  %v7245_v0 = vld [vmem:[#allocation19 + $0x60] ss:$8 sps:$4 sm:$0xff]   ;;  %v7250_v13 = vld [vmem:[#allocation19 + $0x74] ss:$8 sps:$4 sm:$0xff]   ;;  %v7266_v24 = vld [vmem:[#allocation19 + $0xd0] ss:$8 sps:$4 sm:$0xff]  }
 0x512   :  { %5598 = vmatpush1.bf16.msra.mxu1 %v7242_v3  ;;  %v7268_v25 = vld [vmem:[#allocation19 + $0xd4] ss:$8 sps:$4 sm:$0xff]  }
 0x513   :  { %v7276_v4 = vpop.eup %7275  ;;  %5599 = vmatprep.subr.bf16.mxu1 %v7247_v12 }
 0x514   :  { %v7278_v6 = vpop.eup %7277  ;;  %v4793_v30 = vmul.f32 %v7276_v4, %v4781_v36  ;;  %v7248_v36 = vld [vmem:[#allocation19 + $0x70] ss:$8 sps:$4 sm:$0xff]   ;;  %v7253_v4 = vld [vmem:[#allocation19 + $0x84] ss:$8 sps:$4 sm:$0xff]  }
 0x515   :  { %v7280_v39 = vpop.eup %7279  ;;  %v4795_v33 = vmul.f32 %v7278_v6, %v4783_v41  ;;  %v7200_v41 = vld [vmem:[#allocation13 + $0x170] ss:$8 sps:$4 sm:$0xff]  }
 0x516   :  { %v4794_v34 = vmul.f32 %v7280_v39, %v4782_v21  ;;  %v4819_v58 = vadd.f32 %v4802_v16, %v4793_v30  ;;  %5600 = vmatpush1.bf16.msra.mxu1 %v7245_v0  ;;  %v7251_v16 = vld [vmem:[#allocation19 + $0x80] ss:$8 sps:$4 sm:$0xff]   ;;  %v7254_v6 = vld [vmem:[#allocation19 + $0x90] ss:$8 sps:$4 sm:$0xff]   ;;  %v7259_v30 = vld [vmem:[#allocation19 + $0xa4] ss:$8 sps:$4 sm:$0xff]  }
 0x517   :  { %v8063_v57 = vadd.f32 %v4810_v19, %v4795_v33  ;;  %5601 = vmatprep.subr.bf16.mxu1 %v7250_v13  ;;  %v7256_v19 = vld [vmem:[#allocation19 + $0x94] ss:$8 sps:$4 sm:$0xff]   ;;  %v7257_v21 = vld [vmem:[#allocation19 + $0xa0] ss:$8 sps:$4 sm:$0xff]   ;;  %v7260_v39 = vld [vmem:[#allocation19 + $0xb0] ss:$8 sps:$4 sm:$0xff]  }
 0x518   :  { %v4820_v26 = vadd.f32 %v4806_v23, %v4794_v34  ;;  %v4823_v28 = vpack.c.bf16 %v4819_v58, %v4819_v58  ;;  %v7262_v23 = vld [vmem:[#allocation19 + $0xb4] ss:$8 sps:$4 sm:$0xff]   ;;  %v7265_v33 = vld [vmem:[#allocation19 + $0xc4] ss:$8 sps:$4 sm:$0xff]   ;;  %v7263_v34 = vld [vmem:[#allocation19 + $0xc0] ss:$8 sps:$4 sm:$0xff]  }
 0x519   :  { %v7282_v29 = vpop.eup %7281  ;;  %v4825_v63 = vpack.c.bf16 %v8063_v57, %v8063_v57  ;;  %v7271_v58 = vld [vmem:[#allocation19 + $0xe4] ss:$8 sps:$4 sm:$0xff]   ;;  %v7269_v57 = vld [vmem:[#allocation19 + $0xe0] ss:$8 sps:$4 sm:$0xff]  }
 0x51a   :  { %v4824_v7 = vpack.c.bf16 %v4820_v26, %v4820_v26  ;;  %v4796_v31 = vmul.f32 %v7282_v29, %v4784_v22  ;;  %5602 = vmatpush1.bf16.msra.mxu1 %v7248_v36  ;;  %v7274_v26 = vld [vmem:[#allocation19 + $0xf4] ss:$8 sps:$4 sm:$0xff]  }
 0x51b   :  { %5603 = vmatprep.subr.bf16.mxu1 %v7253_v4 }
 0x51c   :  { %5255 = vmatprep.mubr.bf16.mxu0 %v4824_v7  ;;  %v4822_v20 = vadd.f32 %v4814_v8, %v4796_v31  ;;  %v7272_v7 = vld [vmem:[#allocation19 + $0xf0] ss:$8 sps:$4 sm:$0xff]  }
 0x51d   :  { %5256 = vmatmul.mubr.bf16.vlgmr.msra.gmra.mrb[4].mxu0 %v4823_v28 }
 0x51e   :  { %5265 = vmatpush1.bf16.msra.mxu0 %v7179_v27  ;;  %v4826_v51 = vpack.c.bf16 %v4822_v20, %v4822_v20  ;;  %5604 = vmatpush1.bf16.msra.mxu1 %v7251_v16  ;;  %v4891_v27 = vld [vmem:[#allocation14] sm:$0x3] }
 0x51f   :  { %5266 = vmatprep.subr.bf16.mxu0 %v7184_v50  ;;  %5605 = vmatprep.subr.bf16.mxu1 %v7256_v19  ;;  %v4896_v22 = vrot.slane %v4891_v27, %v7924_v9  ;;  %v4900_v28 = vrot.slane %v4891_v27, %v7929_v52 }
 0x520   :  { %5296 = vmatprep.mubr.bf16.mxu0 %v4826_v51 }
 0x522   :  { %5267 = vmatpush1.bf16.msra.mxu0 %v7182_v45  ;;  %5606 = vmatpush1.bf16.msra.mxu1 %v7254_v6 }
 0x523   :  { %5268 = vmatprep.subr.bf16.mxu0 %v7187_v10  ;;  %5607 = vmatprep.subr.bf16.mxu1 %v7259_v30 }
 0x526   :  { %5269 = vmatpush1.bf16.msra.mxu0 %v7185_v15  ;;  %5608 = vmatpush1.bf16.msra.mxu1 %v7257_v21  ;;  %v5345_v21 = vld [vmem:[#allocation16] sm:$0x3] }
 0x527   :  { %5270 = vmatprep.subr.bf16.mxu0 %v7190_v35  ;;  %5609 = vmatprep.subr.bf16.mxu1 %v7262_v23 }
 0x52a   :  { %5271 = vmatpush1.bf16.msra.mxu0 %v7188_v5  ;;  %5610 = vmatpush1.bf16.msra.mxu1 %v7260_v39  ;;  %v5352_v39 = vrot.slane %v5345_v21, %v7924_v9 }
 0x52b   :  { %5272 = vmatprep.subr.bf16.mxu0 %v7193_v18  ;;  %5611 = vmatprep.subr.bf16.mxu1 %v7265_v33 }
 0x52e   :  { %5273 = vmatpush1.bf16.msra.mxu0 %v7191_v37  ;;  %5612 = vmatpush1.bf16.msra.mxu1 %v7263_v34  ;;  %v5356_v34 = vrot.slane %v5345_v21, %v7929_v52 }
 0x52f   :  { %5274 = vmatprep.subr.bf16.mxu0 %v7196_v1  ;;  %5613 = vmatprep.subr.bf16.mxu1 %v7268_v25 }
 0x532   :  { %5275 = vmatpush1.bf16.msra.mxu0 %v7194_v2  ;;  %5614 = vmatpush1.bf16.msra.mxu1 %v7266_v24  ;;  %v5367_v24 = vld [vmem:[#allocation17] sm:$0x3] }
 0x533   :  { %5276 = vmatprep.subr.bf16.mxu0 %v7199_v38  ;;  %5615 = vmatprep.subr.bf16.mxu1 %v7271_v58  ;;  %v5372_v58 = vrot.slane %v5367_v24, %v7924_v9 }
 0x536   :  { %5277 = vmatpush1.bf16.msra.mxu0 %v7197_v40  ;;  %5616 = vmatpush1.bf16.msra.mxu1 %v7269_v57 }
 0x537   :  { %5278 = vmatprep.subr.bf16.mxu0 %v7202_v55  ;;  %5617 = vmatprep.subr.bf16.mxu1 %v7274_v26 }
 0x53a   :  { %5279 = vmatpush1.bf16.msra.mxu0 %v7200_v41  ;;  %5618 = vmatpush1.bf16.msra.mxu1 %v7272_v7  ;;  %v5376_v7 = vrot.slane %v5367_v24, %v7929_v52 }
 0x53b   :  { %5280 = vmatprep.subr.bf16.mxu0 %v7205_v17 }
 0x53e   :  { %5281 = vmatpush1.bf16.msra.mxu0 %v7203_v44 }
 0x53f   :  { %5282 = vmatprep.subr.bf16.mxu0 %v7208_v42 }
 0x542   :  { %5283 = vmatpush1.bf16.msra.mxu0 %v7206_v46 }
 0x543   :  { %5284 = vmatprep.subr.bf16.mxu0 %v7211_v47 }
 0x546   :  { %5285 = vmatpush1.bf16.msra.mxu0 %v7209_v49 }
 0x547   :  { %5286 = vmatprep.subr.bf16.mxu0 %v7214_v53 }
 0x54a   :  { %5287 = vmatpush1.bf16.msra.mxu0 %v7212_v54 }
 0x54b   :  { %5288 = vmatprep.subr.bf16.mxu0 %v7217_v56 }
 0x54e   :  { %5289 = vmatpush1.bf16.msra.mxu0 %v7215_v59 }
 0x54f   :  { %5290 = vmatprep.subr.bf16.mxu0 %v7220_v60 }
 0x552   :  { %5291 = vmatpush1.bf16.msra.mxu0 %v7218_v61 }
 0x553   :  { %5292 = vmatprep.subr.bf16.mxu0 %v7223_v62 }
 0x556   :  { %5293 = vmatpush1.bf16.msra.mxu0 %v7221_v32 }
 0x557   :  { %5294 = vmatprep.subr.bf16.mxu0 %v7226_v14 }
 0x55a   :  { %5295 = vmatpush1.bf16.msra.mxu0 %v7224_v48 }
 0x55d   :  { %5297 = vmatmul.mubr.bf16.vlgmr.msra.gmra.mrb[4].mxu0 %v4825_v63 }
 0x630   :  { %v5298_v8 = vpop.f32.mrb[4].mxu0 }
 0x631   :  { %v6271_v50 = vadd.f32 %v5298_v8, %v4896_v22  ;;  %v5300_v29 = vpop.f32.mrb[5].mxu0 }
 0x632   :  { %v6272_v31 = vadd.f32 %v5300_v29, %v4900_v28  ;;  %v5302_v45 = vpop.f32.mrb[6].mxu0 }
 0x633   :  { %v5305_v20 = vmax.f32 %v6271_v50, 0.0  ;;  %v5303_v10 = vpop.f32.mrb[7].mxu0  ;;  %v5415_v45 = vld [vmem:[#allocation20] sm:$0x3] }
 0x634   :  { %v5306_v51 = vmax.f32 %v6272_v31, 0.0  ;;  %v5424_v10 = vrot.slane %v5415_v45, %v7929_v52 }
 0x635   :  { %v5307_v15 = vsel %vm4652_vm10, %v5305_v20, 0.0 }
 0x636   :  { %v5309_v35 = vrot.slane %v5307_v15, 4  ;;  %v5323_v5 = vmul.f32 %v5307_v15, %v5307_v15  ;;  %v5308_v18 = vsel %vm4652_vm10, %v5306_v51, 0.0 }
 0x637   :  { %v5315_v37 = vrot.slane %v5308_v18, 4  ;;  %v5324_v1 = vmul.f32 %v5308_v18, %v5308_v18 }
 0x638   :  { %v5310_v2 = vadd.f32 %v5309_v35, %v5307_v15  ;;  %v5325_v38 = vrot.slane %v5323_v5, 4 }
 0x639   :  { %v5316_v40 = vadd.f32 %v5315_v37, %v5308_v18  ;;  %v5331_v55 = vrot.slane %v5324_v1, 4 }
 0x63a   :  { %v5311_v41 = vrot.slane %v5310_v2, 2  ;;  %v5326_v17 = vadd.f32 %v5325_v38, %v5323_v5 }
 0x63b   :  { %v5317_v44 = vrot.slane %v5316_v40, 2  ;;  %v5332_v42 = vadd.f32 %v5331_v55, %v5324_v1 }
 0x63c   :  { %v5312_v46 = vadd.f32 %v5311_v41, %v5310_v2  ;;  %v5327_v47 = vrot.slane %v5326_v17, 2 }
 0x63d   :  { %v5318_v49 = vadd.f32 %v5317_v44, %v5316_v40  ;;  %v5333_v53 = vrot.slane %v5332_v42, 2 }
 0x63e   :  { %v5313_v54 = vrot.slane %v5312_v46, 1  ;;  %v5328_v56 = vadd.f32 %v5327_v47, %v5326_v17 }
 0x63f   :  { %v5319_v59 = vrot.slane %v5318_v49, 1  ;;  %v5334_v60 = vadd.f32 %v5333_v53, %v5332_v42 }
 0x640   :  { %v5314_v43 = vadd.f32 %v5313_v54, %v5312_v46  ;;  %v5329_v61 = vrot.slane %v5328_v56, 1 }
 0x641   :  { %v5320_v62 = vadd.f32 %v5319_v59, %v5318_v49  ;;  %v5335_v32 = vrot.slane %v5334_v60, 1 }
 0x642   :  { %v5321_v14 = vmul.f32 0.5, %v5314_v43  ;;  %v5330_v48 = vadd.f32 %v5329_v61, %v5328_v56 }
 0x643   :  { %v5322_v63 = vmul.f32 0.5, %v5320_v62  ;;  %v5336_v11 = vadd.f32 %v5335_v32, %v5334_v60 }
 0x644   :  { %v5337_v3 = vmul.f32 0.5, %v5330_v48  ;;  %v5339_v12 = vmul.f32 %v5321_v14, %v5321_v14  ;;  %v5346_v23 = vsub.f32 %v5305_v20, %v5321_v14  ;;  %v5420_v20 = vrot.slane %v5415_v45, %v7924_v9 }
 0x645   :  { %v5338_v0 = vmul.f32 0.5, %v5336_v11  ;;  %v5340_v13 = vmul.f32 %v5322_v63, %v5322_v63  ;;  %v5347_v33 = vsub.f32 %v5306_v51, %v5322_v63 }
 0x646   :  { %v5341_v36 = vsub.f32 %v5337_v3, %v5339_v12  ;;  %v5359_v25 = vmul.f32 %v5352_v39, %v5346_v23 }
 0x647   :  { %v5342_v4 = vsub.f32 %v5338_v0, %v5340_v13  ;;  %v5360_v26 = vmul.f32 %v5356_v34, %v5347_v33 }
 0x648   :  { %v5343_v16 = vmax.f32 %v5341_v36, 0.0 }
 0x649   :  { %v5344_v19 = vmax.f32 %v5342_v4, 0.0 }
 0x64a   :  { %v5361_v6 = vadd.f32 1e-05, %v5343_v16 }
 0x64b   :  { %v5362_v30 = vadd.f32 1e-05, %v5344_v19 }
 0x64c   :  { %7283 = vrsqrt.f32 %v5361_v6 }
 0x64d   :  { %7285 = vrsqrt.f32 %v5362_v30 }
 0x656   :  { %v7284_v57 = vpop.eup %7283 }
 0x657   :  { %v7286_v27 = vpop.eup %7285  ;;  %v5365_v22 = vmul.f32 %v7284_v57, %v5359_v25 }
 0x658   :  { %v5366_v28 = vmul.f32 %v7286_v27, %v5360_v26 }
 0x659   :  { %v5379_v8 = vadd.f32 %v5372_v58, %v5365_v22 }
 0x65a   :  { %v5380_v50 = vadd.f32 %v5376_v7, %v5366_v28 }
 0x65b   :  { %v5381_v31 = vpack.c.bf16 %v5379_v8, %v5379_v8 }
 0x65c   :  { %v5382_v29 = vpack.c.bf16 %v5380_v50, %v5380_v50 }
 0x65e   :  { %5619 = vmatprep.mubr.bf16.mxu1 %v5382_v29 }
 0x65f   :  { %5620 = vmatmul.mubr.bf16.vlgmr.msra.gmra.mrb[36].mxu1 %v5381_v31 }
 0x732   :  { %v5621_v51 = vpop.f32.mrb[36].mxu1 }
 0x733   :  { %v5622_v15 = vadd.f32 %v5621_v51, %v5420_v20  ;;  %v5623_v35 = vpop.f32.mrb[37].mxu1 }
 0x734   :  { %v5624_v5 = vadd.f32 %v5623_v35, %v5424_v10  ;;  %v5625_v18 = vpop.f32.mrb[38].mxu1 }
 0x735   :  { %5628 = vst [vmem:[%s8099_s13] sm:$0xff] %v5622_v15  ;;  %v5626_v37 = vpop.f32.mrb[39].mxu1 }
 0x736   :  { %5629 = vst [vmem:[%s8099_s13 + $0x8] sm:$0xff] %v5624_v5 }
 0x737   :  { %5634 = vsyncpa [#allocation4], 1 }
 0x738   :  { %5635 = vsyncpa [#allocation6], 1 }
 0x739   :  { %5636 = vsyncpa [#allocation9], 1 }
 0x73a   :  { %5637 = vsyncpa [#allocation12], 1 }
 0x73b   :  { %5638 = vsyncpa [#allocation15], 1 }
 0x73c   :  { %5639 = vsyncpa [#allocation18], 1 }
 0x73d   :  { %5640 = vsyncpa [#allocation21], 1 }

</bundles_post_ra>
